<compile_context>
chip_gen: v6e
topology: v6e:2x2x1
jax: 0.10.0
libtpu: 0.0.40
codegen_flags: <defaults>
</compile_context>

<pallas_src>
import jax
import jax.numpy as jnp
from jax.experimental import pallas as pl
from jax.experimental.pallas import tpu as pltpu


def _gated_conv1x1_kernel(s_ref, x_ref, w_ref, o_ref):
    # s_ref: (C, 1)   f32  per-channel pre-sigmoid gate (resident)
    # x_ref: (C, M)   f32  activations in native NCHW-flat layout (resident)
    # w_ref: (TCO, C) bf16 one Cout tile of the 1x1 conv weight (pipelined)
    # o_ref: (TCO, M)      output tile, already NCHW-flat
    gate = jax.nn.sigmoid(s_ref[...])                        # EUP, (C, 1)
    xg = (x_ref[...] * gate).astype(w_ref.dtype)             # VPU: gate the SMALL operand
    o_ref[...] = jnp.dot(
        w_ref[...], xg, preferred_element_type=jnp.float32   # MXU, f32 accumulate
    ).astype(o_ref.dtype)


def sigmoid_mul_conv2d(x533, x529, weight):
    """sigmoid(x533) * x529 followed by a 1x1 conv (no bias).

    x533: (N, C, 1, 1), x529: (N, C, H, W), weight: (Cout, C, 1, 1) -> (N, Cout, H, W)
    """
    N, C, H, W = x529.shape
    Cout = weight.shape[0]
    assert x533.shape == (N, C, 1, 1)
    assert weight.shape[1:] == (C, 1, 1)
    assert N == 1, "kernel written for batch 1 (as in the reference module)"
    M = H * W

    # Free reshapes only -- no data movement, no transposes.
    s2d = x533.reshape(C, 1)            # (C, 1)
    x2d = x529.reshape(C, M)            # (C, M)
    w2d = weight.reshape(Cout, C)       # (Cout, C)
    # bf16 weight halves the dominant HBM transfer; in a real model this cast is
    # done once at init (here it is a no-op because __main__ pre-casts).
    if w2d.dtype != jnp.bfloat16:
        w2d = w2d.astype(jnp.bfloat16)

    # Tile over Cout so the weight DMA overlaps with compute and both v7x TCs work.
    tco = 128 if Cout % 128 == 0 else Cout
    grid = (Cout // tco,)

    out2d = pl.pallas_call(
        _gated_conv1x1_kernel,
        out_shape=jax.ShapeDtypeStruct((Cout, M), x529.dtype),
        grid_spec=pltpu.PrefetchScalarGridSpec(
            num_scalar_prefetch=0,
            grid=grid,
            in_specs=[
                pl.BlockSpec((C, 1), lambda i: (0, 0)),     # gate (constant block -> no re-DMA)
                pl.BlockSpec((C, M), lambda i: (0, 0)),     # activations (constant block)
                pl.BlockSpec((tco, C), lambda i: (i, 0)),   # weight tile (double-buffered)
            ],
            out_specs=pl.BlockSpec((tco, M), lambda i: (i, 0)),
        ),
        compiler_params=pltpu.CompilerParams(
            dimension_semantics=("parallel",),
        ),
    )(s2d, x2d, w2d)

    # (Cout, H*W) -> (1, Cout, H, W): already NCHW, free reshape.
    return out2d.reshape(N, Cout, H, W)


if __name__ == "__main__":
    key = jax.random.PRNGKey(0)
    k1, k2, k3 = jax.random.split(key, 3)

    # Shapes implied by the module's forward (Conv2d(1536, 256, kernel=1, bias=False)).
    N, C, H, W, Cout = 1, 1536, 7, 7, 256
    x529 = jax.random.normal(k1, (N, C, H, W), dtype=jnp.float32)
    x533 = jax.random.normal(k2, (N, C, 1, 1), dtype=jnp.float32)
    weight = jax.random.normal(k3, (Cout, C, 1, 1), dtype=jnp.float32) * (1.0 / jnp.sqrt(C))

    # Init-time pre-cast of the conv weight to bf16 (kernel accumulates in f32).
    weight_bf16 = weight.astype(jnp.bfloat16)

    out = sigmoid_mul_conv2d(x533, x529, weight_bf16)
    out = jax.block_until_ready(out)
    assert out.shape == (N, Cout, H, W), out.shape

    # Reference in plain f32 JAX (same math as the PyTorch module).
    gated = jax.nn.sigmoid(x533) * x529
    ref = jnp.einsum("nchw,oc->nohw", gated, weight.reshape(Cout, C))
    # Loosened tolerance for the bf16 weight/activation feed (f32 accumulate over C=1536).
    assert jnp.allclose(out, ref, atol=5e-2, rtol=5e-2), float(jnp.max(jnp.abs(out - ref)))

    print("KERNEL_OK")
</pallas_src>

<mosaic_0001>
module attributes {stable_mosaic.version = 11 : i64} {
  func.func @_gated_conv1x1_kernel(%arg0: i32, %arg1: memref<1536x1xf32, #tpu.memory_space<vmem>>, %arg2: memref<1536x49xf32, #tpu.memory_space<vmem>>, %arg3: memref<128x1536xbf16, #tpu.memory_space<vmem>>, %arg4: memref<128x49xf32, #tpu.memory_space<vmem>>) attributes {dimension_semantics = [#tpu.dimension_semantics<parallel>], iteration_bounds = array<i64: 2>, scalar_prefetch = 0 : i64, scratch_operands = 0 : i64, tpu.core_type = #tpu.core_type<tc>, window_params = [{pipeline_mode = #tpu.pipeline_mode<synchronous>, transform_indices = @transform_0, window_bounds = array<i64: 1536, 1>}, {pipeline_mode = #tpu.pipeline_mode<synchronous>, transform_indices = @transform_1, window_bounds = array<i64: 1536, 49>}, {transform_indices = @transform_2, window_bounds = array<i64: 128, 1536>}, {transform_indices = @transform_3, window_bounds = array<i64: 128, 49>}]} {
    %c0 = arith.constant 0 : index
    %c0_0 = arith.constant 0 : index
    %0 = vector.load %arg1[%c0, %c0_0] : memref<1536x1xf32, #tpu.memory_space<vmem>>, vector<1536x1xf32>
    %1 = arith.negf %0 : vector<1536x1xf32>
    %2 = math.exp %1 : vector<1536x1xf32>
    %cst = arith.constant 1.000000e+00 : f32
    %3 = vector.broadcast %cst : f32 to vector<1536x1xf32>
    %4 = arith.addf %3, %2 : vector<1536x1xf32>
    %5 = arith.divf %3, %4 : vector<1536x1xf32>
    %c0_1 = arith.constant 0 : index
    %c0_2 = arith.constant 0 : index
    %6 = vector.load %arg2[%c0_1, %c0_2] : memref<1536x49xf32, #tpu.memory_space<vmem>>, vector<1536x49xf32>
    %7 = vector.broadcast %5 : vector<1536x1xf32> to vector<1536x49xf32>
    %8 = arith.mulf %6, %7 : vector<1536x49xf32>
    %9 = arith.truncf %8 : vector<1536x49xf32> to vector<1536x49xbf16>
    %c0_3 = arith.constant 0 : index
    %c0_4 = arith.constant 0 : index
    %10 = vector.load %arg3[%c0_3, %c0_4] : memref<128x1536xbf16, #tpu.memory_space<vmem>>, vector<128x1536xbf16>
    %cst_5 = arith.constant dense<0.000000e+00> : vector<128x49xf32>
    %11 = tpu.matmul %10, %9, %cst_5 {dimension_numbers = #tpu.dot_dimension_numbers<[1], [0], [0], [1], [0, 0, 1, 1], [], []>} : vector<128x1536xbf16>, vector<1536x49xbf16>, vector<128x49xf32> -> vector<128x49xf32>
    %c0_6 = arith.constant 0 : index
    %c0_7 = arith.constant 0 : index
    %12 = vector.load %arg4[%c0_6, %c0_7] : memref<128x49xf32, #tpu.memory_space<vmem>>, vector<128x49xf32>
    tpu.vector_store %arg4[%c0_6, %c0_7], %11 {strides = array<i32>} : memref<128x49xf32, #tpu.memory_space<vmem>>, vector<128x49xf32>,
    return
  }
  func.func @transform_0(%arg0: i32) -> (i32, i32) {
    %c0_i32 = arith.constant 0 : i32
    %c0_i32_0 = arith.constant 0 : i32
    %c0_i32_1 = arith.constant 0 : i32
    return %c0_i32, %c0_i32_0 : i32, i32
  }
  func.func @transform_1(%arg0: i32) -> (i32, i32) {
    %c0_i32 = arith.constant 0 : i32
    %c0_i32_0 = arith.constant 0 : i32
    %c0_i32_1 = arith.constant 0 : i32
    return %c0_i32, %c0_i32_0 : i32, i32
  }
  func.func @transform_2(%arg0: i32) -> (i32, i32) {
    %c0_i32 = arith.constant 0 : i32
    %c0_i32_0 = arith.constant 0 : i32
    return %arg0, %c0_i32 : i32, i32
  }
  func.func @transform_3(%arg0: i32) -> (i32, i32) {
    %c0_i32 = arith.constant 0 : i32
    %c0_i32_0 = arith.constant 0 : i32
    return %arg0, %c0_i32 : i32, i32
  }
}

</mosaic_0001>

<bundles_post_ra>
// kernel: tpu_custom_call.1
= control target key start
LH: loop header
LB: loop body
LE: loop exit
PB: predicated region body
PF: predicated region fallthrough
CT: control target
= control target key end

     0   :  { %s5829_s12 = smov 0   ;;  %s7790_s0 = inlined_call_operand.vmem [shape: f32[1536,1], index: 0, kind: input, shape index: {}]   ;;  %s7791_s1 = inlined_call_operand.vmem [shape: f32[1536,49], index: 1, kind: input, shape index: {}]   ;;  %s7792_s2 = inlined_call_operand.vmem [shape: bf16[256,1536], index: 2, kind: input, shape index: {}]   ;;  %s7793_s3 = inlined_call_operand.vmem [shape: f32[256,49], index: 3, kind: output, shape index: {}]  }
   0x1 LB: > { %s4193_s13 = sadd.s32 4294967295, %s5806_s12   ;;  %p4197_p0 = scmp.ge.s32.totalorder %s5806_s12, 1  ;;  %s5806_s12 = sphi %s5829_s12, %s13_s12  }
   0x2   : > { %p139_p1 = scmp.lt.s32.totalorder %s5806_s12, 3 }
   0x4   : > { %p140_p2 = pnand %p4197_p0, %p139_p1 }
   0x6   : > { %143 = sbr.rel (%p140_p2) target bundleno = 816 (0x330), region = 32 }
   0xb   : > { %v180_v0 = vld [vmem:[%s7790_s0 + $0x10] sm:$0xff]  ;;  %v178_v1 = vld [vmem:[%s7790_s0] sm:$0xff]  ;;  %v181_v2 = vld [vmem:[%s7790_s0 + $0x18] sm:$0xff]  ;;  %v5808_v3 = vmov 0   ;;  %s4198_s24 = sshll.u32 %s4193_s13, 4  ;;  %vm4120_vm0 = vcmask 400384  }
   0xc   : > { %4887 = vset.pattern.permute.xlu1 %v5808_v3  ;;  %4886 = vset.pattern.permute.xlu0 %v5808_v3  ;;  %v4204_v4 = vmul.f32 -1.442695, %v180_v0  ;;  %v4202_v5 = vmul.f32 -1.442695, %v178_v1  ;;  %v4205_v6 = vmul.f32 -1.442695, %v181_v2 }
   0xd   : > { %v179_v7 = vld [vmem:[%s7790_s0 + $0x8] sm:$0xff]  ;;  %v182_v9 = vld [vmem:[%s7790_s0 + $0x20] sm:$0xff]  ;;  %v185_v13 = vld [vmem:[%s7790_s0 + $0x38] sm:$0xff]  ;;  %p165_p3 = scmp.lt.s32.totalorder %s4198_s24, 31 }
   0xe   : > { %v183_v8 = vld [vmem:[%s7790_s0 + $0x28] sm:$0xff]  ;;  %5032 = vpow2.f32 %v4204_v4  ;;  %v4203_v10 = vmul.f32 -1.442695, %v179_v7  ;;  %v4206_v12 = vmul.f32 -1.442695, %v182_v9  ;;  %v184_v14 = vld [vmem:[%s7790_s0 + $0x30] sm:$0xff] }
   0xf   : > { %v4207_v11 = vmul.f32 -1.442695, %v183_v8  ;;  %5034 = vpow2.f32 %v4202_v5  ;;  %v187_v15 = vld [vmem:[%s7790_s0 + $0x48] sm:$0xff]  ;;  %v4209_v16 = vmul.f32 -1.442695, %v185_v13  ;;  %v186_v18 = vld [vmem:[%s7790_s0 + $0x40] sm:$0xff] }
  0x10   : > { %5036 = vpow2.f32 %v4205_v6  ;;  %v4208_v17 = vmul.f32 -1.442695, %v184_v14  ;;  %v189_v19 = vld [vmem:[%s7790_s0 + $0x58] sm:$0xff]  ;;  %v4211_v20 = vmul.f32 -1.442695, %v187_v15  ;;  %v188_v21 = vld [vmem:[%s7790_s0 + $0x50] sm:$0xff] }
  0x11   : > { %5038 = vpow2.f32 %v4203_v10  ;;  %v4210_v22 = vmul.f32 -1.442695, %v186_v18  ;;  %v191_v23 = vld [vmem:[%s7790_s0 + $0x68] sm:$0xff]  ;;  %v4213_v24 = vmul.f32 -1.442695, %v189_v19  ;;  %v190_v25 = vld [vmem:[%s7790_s0 + $0x60] sm:$0xff] }
  0x12   : > { %5040 = vpow2.f32 %v4207_v11  ;;  %v4212_v26 = vmul.f32 -1.442695, %v188_v21  ;;  %v193_v27 = vld [vmem:[%s7790_s0 + $0x78] sm:$0xff]  ;;  %v4215_v28 = vmul.f32 -1.442695, %v191_v23  ;;  %v192_v29 = vld [vmem:[%s7790_s0 + $0x70] sm:$0xff] }
  0x13   : > { %5042 = vpow2.f32 %v4206_v12  ;;  %v4214_v30 = vmul.f32 -1.442695, %v190_v25  ;;  %v4217_v31 = vmul.f32 -1.442695, %v193_v27  ;;  %v4216_v32 = vmul.f32 -1.442695, %v192_v29 }
  0x14   : > { %5044 = vpow2.f32 %v4209_v16  ;;  %v195_v58 = vld [vmem:[%s7790_s0 + $0x88] sm:$0xff]  ;;  %v194_v61 = vld [vmem:[%s7790_s0 + $0x80] sm:$0xff]  ;;  %v197_v0 = vld [vmem:[%s7790_s0 + $0x98] sm:$0xff]  ;;  %s7855_s24 = smov (!%p165_p3, %s4198_s24), 31 }
  0x15   : > { %5046 = vpow2.f32 %v4208_v17  ;;  %v4219_v3 = vmul.f32 -1.442695, %v195_v58  ;;  %v196_v4 = vld [vmem:[%s7790_s0 + $0x90] sm:$0xff]  ;;  %v4218_v7 = vmul.f32 -1.442695, %v194_v61  ;;  %v199_v8 = vld [vmem:[%s7790_s0 + $0xa8] sm:$0xff] }
  0x16   : > { %5048 = vpow2.f32 %v4211_v20  ;;  %v4221_v10 = vmul.f32 -1.442695, %v197_v0  ;;  %v198_v11 = vld [vmem:[%s7790_s0 + $0xa0] sm:$0xff]  ;;  %v4220_v13 = vmul.f32 -1.442695, %v196_v4  ;;  %v201_v14 = vld [vmem:[%s7790_s0 + $0xb8] sm:$0xff] }
  0x17   : > { %5050 = vpow2.f32 %v4210_v22  ;;  %v4223_v16 = vmul.f32 -1.442695, %v199_v8  ;;  %v200_v17 = vld [vmem:[%s7790_s0 + $0xb0] sm:$0xff]  ;;  %v4222_v19 = vmul.f32 -1.442695, %v198_v11  ;;  %v203_v20 = vld [vmem:[%s7790_s0 + $0xc8] sm:$0xff] }
  0x18   : > { %5052 = vpow2.f32 %v4213_v24  ;;  %v4225_v22 = vmul.f32 -1.442695, %v201_v14  ;;  %v202_v23 = vld [vmem:[%s7790_s0 + $0xc0] sm:$0xff]  ;;  %v4224_v25 = vmul.f32 -1.442695, %v200_v17  ;;  %v204_v29 = vld [vmem:[%s7790_s0 + $0xd0] sm:$0xff] }
  0x19   : > { %5054 = vpow2.f32 %v4212_v26  ;;  %v205_v26 = vld [vmem:[%s7790_s0 + $0xd8] sm:$0xff]  ;;  %s4876_s7 = smul.u32 48, %s7855_s24 }
  0x1a   : > { %5056 = vpow2.f32 %v4215_v28  ;;  %v4227_v28 = vmul.f32 -1.442695, %v203_v20  ;;  %v212_v20 = vld [vmem:[%s7790_s0 + $0x110] sm:$0xff] }
  0x1b   : > { %v5033_v33 = vpop.eup %5032  ;;  %5058 = vpow2.f32 %v4214_v30  ;;  %s6229_s16 = scalar_lea.vmem %s7792_s2, %s4876_s7 }
  0x1c   : > { %v5035_v34 = vpop.eup %5034  ;;  %v948_v35 = vadd.f32 1.0, %v5033_v33  ;;  %5060 = vpow2.f32 %v4217_v31  ;;  %v4226_v31 = vmul.f32 -1.442695, %v202_v23 }
  0x1d   : > { %v5037_v36 = vpop.eup %5036  ;;  %v946_v37 = vadd.f32 1.0, %v5035_v34  ;;  %5062 = vpow2.f32 %v4216_v32  ;;  %v207_v32 = vld [vmem:[%s7790_s0 + $0xe8] sm:$0xff]  ;;  %v4229_v34 = vmul.f32 -1.442695, %v205_v26 }
  0x1e   : > { %v5039_v38 = vpop.eup %5038  ;;  %5064 = vrcp.f32 %v948_v35  ;;  %v949_v39 = vadd.f32 1.0, %v5037_v36  ;;  %v206_v35 = vld [vmem:[%s7790_s0 + $0xe0] sm:$0xff] }
  0x1f   : > { %v5041_v40 = vpop.eup %5040  ;;  %5066 = vrcp.f32 %v946_v37  ;;  %v947_v41 = vadd.f32 1.0, %v5039_v38  ;;  %v4228_v37 = vmul.f32 -1.442695, %v204_v29  ;;  %v209_v38 = vld [vmem:[%s7790_s0 + $0xf8] sm:$0xff]  ;;  %v4236_v29 = vmul.f32 -1.442695, %v212_v20 }
  0x20   : > { %v5043_v42 = vpop.eup %5042  ;;  %5068 = vrcp.f32 %v949_v39  ;;  %v951_v43 = vadd.f32 1.0, %v5041_v40  ;;  %v4231_v40 = vmul.f32 -1.442695, %v207_v32 }
  0x21   : > { %v5045_v44 = vpop.eup %5044  ;;  %5070 = vrcp.f32 %v947_v41  ;;  %v950_v45 = vadd.f32 1.0, %v5043_v42  ;;  %v208_v41 = vld [vmem:[%s7790_s0 + $0xf0] sm:$0xff] }
  0x22   : > { %v5047_v46 = vpop.eup %5046  ;;  %5072 = vrcp.f32 %v951_v43  ;;  %v953_v47 = vadd.f32 1.0, %v5045_v44  ;;  %v4230_v43 = vmul.f32 -1.442695, %v206_v35 }
  0x23   : > { %v5049_v48 = vpop.eup %5048  ;;  %5074 = vrcp.f32 %v950_v45  ;;  %v952_v49 = vadd.f32 1.0, %v5047_v46  ;;  %v4233_v45 = vmul.f32 -1.442695, %v209_v38 }
  0x24   : > { %v5051_v50 = vpop.eup %5050  ;;  %5076 = vrcp.f32 %v953_v47  ;;  %v955_v51 = vadd.f32 1.0, %v5049_v48  ;;  %v4232_v47 = vmul.f32 -1.442695, %v208_v41 }
  0x25   : > { %v5053_v52 = vpop.eup %5052  ;;  %5078 = vrcp.f32 %v952_v49  ;;  %v954_v53 = vadd.f32 1.0, %v5051_v50 }
  0x26   : > { %v5055_v54 = vpop.eup %5054  ;;  %5080 = vrcp.f32 %v955_v51  ;;  %v957_v55 = vadd.f32 1.0, %v5053_v52 }
  0x27   : > { %v5057_v56 = vpop.eup %5056  ;;  %5082 = vrcp.f32 %v954_v53  ;;  %v956_v57 = vadd.f32 1.0, %v5055_v54 }
  0x28   : > { %v5059_v59 = vpop.eup %5058  ;;  %5084 = vrcp.f32 %v957_v55  ;;  %v959_v60 = vadd.f32 1.0, %v5057_v56 }
  0x29   : > { %v5061_v62 = vpop.eup %5060  ;;  %5086 = vrcp.f32 %v956_v57  ;;  %v958_v63 = vadd.f32 1.0, %v5059_v59 }
  0x2a   : > { %v5063_v1 = vpop.eup %5062  ;;  %5088 = vrcp.f32 %v959_v60  ;;  %v961_v2 = vadd.f32 1.0, %v5061_v62 }
  0x2b   : > { %v5065_v5 = vpop.eup %5064  ;;  %5090 = vrcp.f32 %v958_v63  ;;  %v960_v6 = vadd.f32 1.0, %v5063_v1 }
  0x2c   : > { %v5067_v9 = vpop.eup %5066  ;;  %1726 = vperm.xlu1 %4887, %v5065_v5   ;;  %5092 = vrcp.f32 %v961_v2 }
  0x2d   : > { %v5069_v12 = vpop.eup %5068  ;;  %1716 = vperm.xlu0 %4886, %v5067_v9   ;;  %5094 = vrcp.f32 %v960_v6 }
  0x2e   : > { %v5071_v15 = vpop.eup %5070  ;;  %5096 = vpow2.f32 %v4219_v3 }
  0x2f   : > { %v5073_v18 = vpop.eup %5072  ;;  %5098 = vpow2.f32 %v4218_v7 }
  0x30   : > { %v5075_v21 = vpop.eup %5074  ;;  %1731 = vperm.xlu1 %4887, %v5069_v12   ;;  %5100 = vpow2.f32 %v4221_v10  ;;  %v211_v10 = vld [vmem:[%s7790_s0 + $0x108] sm:$0xff] }
  0x31   : > { %v5077_v24 = vpop.eup %5076  ;;  %1721 = vperm.xlu0 %4886, %v5071_v15   ;;  %5102 = vpow2.f32 %v4220_v13  ;;  %v210_v13 = vld [vmem:[%s7790_s0 + $0x100] sm:$0xff] }
  0x32   : > { %v5079_v27 = vpop.eup %5078  ;;  %5104 = vpow2.f32 %v4223_v16  ;;  %v213_v16 = vld [vmem:[%s7790_s0 + $0x118] sm:$0xff]  ;;  %v4234_v23 = vmul.f32 -1.442695, %v210_v13 }
  0x33   : > { %v5081_v30 = vpop.eup %5080  ;;  %5106 = vpow2.f32 %v4222_v19  ;;  %v4235_v19 = vmul.f32 -1.442695, %v211_v10  ;;  %v4237_v26 = vmul.f32 -1.442695, %v213_v16 }
  0x34   : > { %v5083_v33 = vpop.eup %5082  ;;  %1741 = vperm.xlu1 %4887, %v5073_v18   ;;  %5108 = vpow2.f32 %v4225_v22 }
  0x35   : > { %v5085_v36 = vpop.eup %5084  ;;  %1736 = vperm.xlu0 %4886, %v5075_v21   ;;  %5110 = vpow2.f32 %v4224_v25 }
  0x36   : > { %v5087_v39 = vpop.eup %5086  ;;  %5112 = vpow2.f32 %v4227_v28 }
  0x37   : > { %v5089_v42 = vpop.eup %5088  ;;  %5114 = vpow2.f32 %v4226_v31 }
  0x38   : > { %v5091_v44 = vpop.eup %5090  ;;  %1751 = vperm.xlu1 %4887, %v5077_v24   ;;  %5116 = vpow2.f32 %v4229_v34  ;;  %v215_v24 = vld [vmem:[%s7790_s0 + $0x128] sm:$0xff] }
  0x39   : > { %v5093_v46 = vpop.eup %5092  ;;  %1746 = vperm.xlu0 %4886, %v5079_v27   ;;  %5118 = vpow2.f32 %v4228_v37  ;;  %v214_v27 = vld [vmem:[%s7790_s0 + $0x120] sm:$0xff]  ;;  %v4239_v32 = vmul.f32 -1.442695, %v215_v24 }
  0x3a   : > { %v5095_v48 = vpop.eup %5094  ;;  %5120 = vpow2.f32 %v4231_v40  ;;  %v4238_v35 = vmul.f32 -1.442695, %v214_v27 }
  0x3b   : > { %v5097_v49 = vpop.eup %5096  ;;  %5122 = vpow2.f32 %v4230_v43 }
  0x3c   : > { %v5099_v50 = vpop.eup %5098  ;;  %1761 = vperm.xlu1 %4887, %v5081_v30   ;;  %v963_v51 = vadd.f32 1.0, %v5097_v49  ;;  %5124 = vpow2.f32 %v4233_v45  ;;  %v217_v30 = vld [vmem:[%s7790_s0 + $0x138] sm:$0xff]  ;;  %v220_v45 = vld [vmem:[%s7790_s0 + $0x150] sm:$0xff] }
  0x3d   : > { %v5101_v52 = vpop.eup %5100  ;;  %1756 = vperm.xlu0 %4886, %v5083_v33   ;;  %v962_v53 = vadd.f32 1.0, %v5099_v50  ;;  %5126 = vpow2.f32 %v4232_v47  ;;  %v216_v33 = vld [vmem:[%s7790_s0 + $0x130] sm:$0xff]  ;;  %v4241_v38 = vmul.f32 -1.442695, %v217_v30 }
  0x3e   : > { %v5103_v54 = vpop.eup %5102  ;;  %5128 = vrcp.f32 %v963_v51  ;;  %v965_v55 = vadd.f32 1.0, %v5101_v52  ;;  %v4240_v41 = vmul.f32 -1.442695, %v216_v33  ;;  %v222_v51 = vld [vmem:[%s7790_s0 + $0x160] sm:$0xff] }
  0x3f   : > { %v5105_v56 = vpop.eup %5104  ;;  %5130 = vrcp.f32 %v962_v53  ;;  %v964_v57 = vadd.f32 1.0, %v5103_v54  ;;  %v4244_v53 = vmul.f32 -1.442695, %v220_v45  ;;  %v225_v54 = vld [vmem:[%s7790_s0 + $0x178] sm:$0xff] }
  0x40   : > { %v5107_v58 = vpop.eup %5106  ;;  %1771 = vperm.xlu1 %4887, %v5085_v36   ;;  %5132 = vrcp.f32 %v965_v55  ;;  %v967_v59 = vadd.f32 1.0, %v5105_v56  ;;  %v219_v36 = vld [vmem:[%s7790_s0 + $0x148] sm:$0xff] }
  0x41   : > { %v5109_v60 = vpop.eup %5108  ;;  %1766 = vperm.xlu0 %4886, %v5087_v39   ;;  %5134 = vrcp.f32 %v964_v57  ;;  %v966_v61 = vadd.f32 1.0, %v5107_v58  ;;  %v218_v39 = vld [vmem:[%s7790_s0 + $0x140] sm:$0xff]  ;;  %v224_v57 = vld [vmem:[%s7790_s0 + $0x170] sm:$0xff] }
  0x42   : > { %v5111_v62 = vpop.eup %5110  ;;  %5136 = vrcp.f32 %v967_v59  ;;  %v969_v63 = vadd.f32 1.0, %v5109_v60  ;;  %v4242_v47 = vmul.f32 -1.442695, %v218_v39  ;;  %v4246_v59 = vmul.f32 -1.442695, %v222_v51 }
  0x43   : > { %v5113_v0 = vpop.eup %5112  ;;  %5138 = vrcp.f32 %v966_v61  ;;  %v968_v1 = vadd.f32 1.0, %v5111_v62  ;;  %v4249_v61 = vmul.f32 -1.442695, %v225_v54 }
  0x44   : > { %v5115_v2 = vpop.eup %5114  ;;  %1781 = vperm.xlu1 %4887, %v5089_v42   ;;  %5140 = vrcp.f32 %v969_v63  ;;  %v971_v3 = vadd.f32 1.0, %v5113_v0  ;;  %v221_v42 = vld [vmem:[%s7790_s0 + $0x158] sm:$0xff]  ;;  %v4248_v63 = vmul.f32 -1.442695, %v224_v57 }
  0x45   : > { %v5117_v4 = vpop.eup %5116  ;;  %1776 = vperm.xlu0 %4886, %v5091_v44   ;;  %5142 = vrcp.f32 %v968_v1  ;;  %v970_v5 = vadd.f32 1.0, %v5115_v2  ;;  %v4243_v44 = vmul.f32 -1.442695, %v219_v36  ;;  %v4245_v50 = vmul.f32 -1.442695, %v221_v42  ;;  %v228_v36 = vld [vmem:[%s7790_s0 + $0x190] sm:$0xff] }
  0x46   : > { %v5119_v6 = vpop.eup %5118  ;;  %5144 = vrcp.f32 %v971_v3  ;;  %v973_v7 = vadd.f32 1.0, %v5117_v4  ;;  %v4252_v45 = vmul.f32 -1.442695, %v228_v36 }
  0x47   : > { %v5121_v8 = vpop.eup %5120  ;;  %5146 = vrcp.f32 %v970_v5  ;;  %v972_v9 = vadd.f32 1.0, %v5119_v6 }
  0x48   : > { %v5123_v11 = vpop.eup %5122  ;;  %1791 = vperm.xlu1 %4887, %v5093_v46   ;;  %5148 = vrcp.f32 %v973_v7  ;;  %v975_v12 = vadd.f32 1.0, %v5121_v8 }
  0x49   : > { %v5125_v14 = vpop.eup %5124  ;;  %1786 = vperm.xlu0 %4886, %v5095_v48   ;;  %5150 = vrcp.f32 %v972_v9  ;;  %v974_v15 = vadd.f32 1.0, %v5123_v11  ;;  %v223_v48 = vld [vmem:[%s7790_s0 + $0x168] sm:$0xff] }
  0x4a   : > { %v5127_v17 = vpop.eup %5126  ;;  %5152 = vrcp.f32 %v975_v12  ;;  %v977_v18 = vadd.f32 1.0, %v5125_v14  ;;  %v4247_v56 = vmul.f32 -1.442695, %v223_v48 }
  0x4b   : > { %v5129_v21 = vpop.eup %5128  ;;  %5154 = vrcp.f32 %v974_v15  ;;  %v976_v22 = vadd.f32 1.0, %v5127_v17 }
  0x4c   : > { %v5131_v25 = vpop.eup %5130  ;;  %1801 = vperm.xlu1 %4887, %v5129_v21   ;;  %5156 = vrcp.f32 %v977_v18 }
  0x4d   : > { %v5133_v28 = vpop.eup %5132  ;;  %1796 = vperm.xlu0 %4886, %v5131_v25   ;;  %5158 = vrcp.f32 %v976_v22 }
  0x4e   : > { %v5135_v31 = vpop.eup %5134  ;;  %5160 = vpow2.f32 %v4235_v19 }
  0x4f   : > { %v5137_v34 = vpop.eup %5136  ;;  %5162 = vpow2.f32 %v4234_v23 }
  0x50   : > { %v5139_v37 = vpop.eup %5138  ;;  %1811 = vperm.xlu1 %4887, %v5133_v28   ;;  %5164 = vpow2.f32 %v4237_v26  ;;  %v227_v26 = vld [vmem:[%s7790_s0 + $0x188] sm:$0xff] }
  0x51   : > { %v5141_v40 = vpop.eup %5140  ;;  %1806 = vperm.xlu0 %4886, %v5135_v31   ;;  %5166 = vpow2.f32 %v4236_v29  ;;  %v226_v29 = vld [vmem:[%s7790_s0 + $0x180] sm:$0xff] }
  0x52   : > { %v5143_v43 = vpop.eup %5142  ;;  %5168 = vpow2.f32 %v4239_v32  ;;  %v229_v32 = vld [vmem:[%s7790_s0 + $0x198] sm:$0xff]  ;;  %v4250_v39 = vmul.f32 -1.442695, %v226_v29 }
  0x53   : > { %v5145_v46 = vpop.eup %5144  ;;  %5170 = vpow2.f32 %v4238_v35  ;;  %v4251_v35 = vmul.f32 -1.442695, %v227_v26  ;;  %v4253_v42 = vmul.f32 -1.442695, %v229_v32 }
  0x54   : > { %v5147_v49 = vpop.eup %5146  ;;  %1821 = vperm.xlu1 %4887, %v5137_v34   ;;  %5172 = vpow2.f32 %v4241_v38 }
  0x55   : > { %v5149_v52 = vpop.eup %5148  ;;  %1816 = vperm.xlu0 %4886, %v5139_v37   ;;  %5174 = vpow2.f32 %v4240_v41 }
  0x56   : > { %v5151_v55 = vpop.eup %5150  ;;  %5176 = vpow2.f32 %v4243_v44 }
  0x57   : > { %v5153_v58 = vpop.eup %5152  ;;  %5178 = vpow2.f32 %v4242_v47 }
  0x58   : > { %v5155_v60 = vpop.eup %5154  ;;  %1831 = vperm.xlu1 %4887, %v5141_v40   ;;  %5180 = vpow2.f32 %v4245_v50  ;;  %v231_v40 = vld [vmem:[%s7790_s0 + $0x1a8] sm:$0xff] }
  0x59   : > { %v5157_v62 = vpop.eup %5156  ;;  %1826 = vperm.xlu0 %4886, %v5143_v43   ;;  %5182 = vpow2.f32 %v4244_v53  ;;  %v230_v43 = vld [vmem:[%s7790_s0 + $0x1a0] sm:$0xff]  ;;  %v4255_v48 = vmul.f32 -1.442695, %v231_v40 }
  0x5a   : > { %v5159_v0 = vpop.eup %5158  ;;  %5184 = vpow2.f32 %v4247_v56  ;;  %v4254_v51 = vmul.f32 -1.442695, %v230_v43 }
  0x5b   : > { %v5161_v1 = vpop.eup %5160  ;;  %5186 = vpow2.f32 %v4246_v59 }
  0x5c   : > { %v5163_v2 = vpop.eup %5162  ;;  %1841 = vperm.xlu1 %4887, %v5145_v46   ;;  %v979_v3 = vadd.f32 1.0, %v5161_v1  ;;  %5188 = vpow2.f32 %v4249_v61  ;;  %v233_v46 = vld [vmem:[%s7790_s0 + $0x1b8] sm:$0xff]  ;;  %v236_v61 = vld [vmem:[%s7790_s0 + $0x1d0] sm:$0xff] }
  0x5d   : > { %v5165_v4 = vpop.eup %5164  ;;  %1836 = vperm.xlu0 %4886, %v5147_v49   ;;  %v978_v5 = vadd.f32 1.0, %v5163_v2  ;;  %5190 = vpow2.f32 %v4248_v63  ;;  %v232_v49 = vld [vmem:[%s7790_s0 + $0x1b0] sm:$0xff]  ;;  %v4257_v54 = vmul.f32 -1.442695, %v233_v46 }
  0x5e   : > { %v5167_v6 = vpop.eup %5166  ;;  %5192 = vrcp.f32 %v979_v3  ;;  %v981_v7 = vadd.f32 1.0, %v5165_v4  ;;  %v4256_v57 = vmul.f32 -1.442695, %v232_v49  ;;  %v238_v3 = vld [vmem:[%s7790_s0 + $0x1e0] sm:$0xff] }
  0x5f   : > { %v5169_v8 = vpop.eup %5168  ;;  %5194 = vrcp.f32 %v978_v5  ;;  %v980_v9 = vadd.f32 1.0, %v5167_v6  ;;  %v4260_v5 = vmul.f32 -1.442695, %v236_v61  ;;  %v241_v6 = vld [vmem:[%s7790_s0 + $0x1f8] sm:$0xff] }
  0x60   : > { %v5171_v10 = vpop.eup %5170  ;;  %1851 = vperm.xlu1 %4887, %v5149_v52   ;;  %5196 = vrcp.f32 %v981_v7  ;;  %v983_v11 = vadd.f32 1.0, %v5169_v8  ;;  %v235_v52 = vld [vmem:[%s7790_s0 + $0x1c8] sm:$0xff] }
  0x61   : > { %v5173_v12 = vpop.eup %5172  ;;  %1846 = vperm.xlu0 %4886, %v5151_v55   ;;  %5198 = vrcp.f32 %v980_v9  ;;  %v982_v13 = vadd.f32 1.0, %v5171_v10  ;;  %v234_v55 = vld [vmem:[%s7790_s0 + $0x1c0] sm:$0xff]  ;;  %v240_v9 = vld [vmem:[%s7790_s0 + $0x1f0] sm:$0xff] }
  0x62   : > { %v5175_v14 = vpop.eup %5174  ;;  %5200 = vrcp.f32 %v983_v11  ;;  %v985_v15 = vadd.f32 1.0, %v5173_v12  ;;  %v4258_v63 = vmul.f32 -1.442695, %v234_v55  ;;  %v4262_v11 = vmul.f32 -1.442695, %v238_v3 }
  0x63   : > { %v5177_v16 = vpop.eup %5176  ;;  %5202 = vrcp.f32 %v982_v13  ;;  %v984_v17 = vadd.f32 1.0, %v5175_v14  ;;  %v4265_v13 = vmul.f32 -1.442695, %v241_v6 }
  0x64   : > { %v5179_v18 = vpop.eup %5178  ;;  %1861 = vperm.xlu1 %4887, %v5153_v58   ;;  %5204 = vrcp.f32 %v985_v15  ;;  %v987_v19 = vadd.f32 1.0, %v5177_v16  ;;  %v237_v58 = vld [vmem:[%s7790_s0 + $0x1d8] sm:$0xff]  ;;  %v4264_v15 = vmul.f32 -1.442695, %v240_v9 }
  0x65   : > { %v5181_v20 = vpop.eup %5180  ;;  %1856 = vperm.xlu0 %4886, %v5155_v60   ;;  %5206 = vrcp.f32 %v984_v17  ;;  %v986_v21 = vadd.f32 1.0, %v5179_v18  ;;  %v4259_v60 = vmul.f32 -1.442695, %v235_v52  ;;  %v4261_v2 = vmul.f32 -1.442695, %v237_v58  ;;  %v244_v52 = vld [vmem:[%s7790_s0 + $0x210] sm:$0xff] }
  0x66   : > { %v5183_v22 = vpop.eup %5182  ;;  %5208 = vrcp.f32 %v987_v19  ;;  %v989_v23 = vadd.f32 1.0, %v5181_v20  ;;  %v4268_v61 = vmul.f32 -1.442695, %v244_v52 }
  0x67   : > { %v5185_v24 = vpop.eup %5184  ;;  %5210 = vrcp.f32 %v986_v21  ;;  %v988_v25 = vadd.f32 1.0, %v5183_v22 }
  0x68   : > { %v5187_v27 = vpop.eup %5186  ;;  %1871 = vperm.xlu1 %4887, %v5157_v62   ;;  %5212 = vrcp.f32 %v989_v23  ;;  %v991_v28 = vadd.f32 1.0, %v5185_v24 }
  0x69   : > { %v5189_v30 = vpop.eup %5188  ;;  %1866 = vperm.xlu0 %4886, %v5159_v0   ;;  %5214 = vrcp.f32 %v988_v25  ;;  %v990_v31 = vadd.f32 1.0, %v5187_v27  ;;  %v239_v0 = vld [vmem:[%s7790_s0 + $0x1e8] sm:$0xff] }
  0x6a   : > { %v5191_v33 = vpop.eup %5190  ;;  %5216 = vrcp.f32 %v991_v28  ;;  %v993_v34 = vadd.f32 1.0, %v5189_v30  ;;  %v4263_v8 = vmul.f32 -1.442695, %v239_v0 }
  0x6b   : > { %v5193_v37 = vpop.eup %5192  ;;  %5218 = vrcp.f32 %v990_v31  ;;  %v992_v38 = vadd.f32 1.0, %v5191_v33 }
  0x6c   : > { %v5195_v41 = vpop.eup %5194  ;;  %1881 = vperm.xlu1 %4887, %v5193_v37   ;;  %5220 = vrcp.f32 %v993_v34 }
  0x6d   : > { %v5197_v44 = vpop.eup %5196  ;;  %1876 = vperm.xlu0 %4886, %v5195_v41   ;;  %5222 = vrcp.f32 %v992_v38 }
  0x6e   : > { %v5199_v47 = vpop.eup %5198  ;;  %5224 = vpow2.f32 %v4251_v35 }
  0x6f   : > { %v5201_v50 = vpop.eup %5200  ;;  %5226 = vpow2.f32 %v4250_v39 }
  0x70   : > { %v5203_v53 = vpop.eup %5202  ;;  %1891 = vperm.xlu1 %4887, %v5197_v44   ;;  %5228 = vpow2.f32 %v4253_v42  ;;  %v243_v42 = vld [vmem:[%s7790_s0 + $0x208] sm:$0xff] }
  0x71   : > { %v5205_v56 = vpop.eup %5204  ;;  %1886 = vperm.xlu0 %4886, %v5199_v47   ;;  %5230 = vpow2.f32 %v4252_v45  ;;  %v242_v45 = vld [vmem:[%s7790_s0 + $0x200] sm:$0xff] }
  0x72   : > { %v5207_v59 = vpop.eup %5206  ;;  %5232 = vpow2.f32 %v4255_v48  ;;  %v245_v48 = vld [vmem:[%s7790_s0 + $0x218] sm:$0xff]  ;;  %v4266_v55 = vmul.f32 -1.442695, %v242_v45 }
  0x73   : > { %v5209_v62 = vpop.eup %5208  ;;  %5234 = vpow2.f32 %v4254_v51  ;;  %v4267_v51 = vmul.f32 -1.442695, %v243_v42  ;;  %v4269_v58 = vmul.f32 -1.442695, %v245_v48 }
  0x74   : > { %v5211_v1 = vpop.eup %5210  ;;  %1901 = vperm.xlu1 %4887, %v5201_v50   ;;  %5236 = vpow2.f32 %v4257_v54 }
  0x75   : > { %v5213_v4 = vpop.eup %5212  ;;  %1896 = vperm.xlu0 %4886, %v5203_v53   ;;  %5238 = vpow2.f32 %v4256_v57 }
  0x76   : > { %v5215_v7 = vpop.eup %5214  ;;  %5240 = vpow2.f32 %v4259_v60 }
  0x77   : > { %v5217_v10 = vpop.eup %5216  ;;  %5242 = vpow2.f32 %v4258_v63 }
  0x78   : > { %v5219_v12 = vpop.eup %5218  ;;  %1911 = vperm.xlu1 %4887, %v5205_v56   ;;  %5244 = vpow2.f32 %v4261_v2  ;;  %v247_v56 = vld [vmem:[%s7790_s0 + $0x228] sm:$0xff] }
  0x79   : > { %v5221_v14 = vpop.eup %5220  ;;  %1906 = vperm.xlu0 %4886, %v5207_v59   ;;  %5246 = vpow2.f32 %v4260_v5  ;;  %v246_v59 = vld [vmem:[%s7790_s0 + $0x220] sm:$0xff]  ;;  %v4271_v0 = vmul.f32 -1.442695, %v247_v56 }
  0x7a   : > { %v5223_v16 = vpop.eup %5222  ;;  %5248 = vpow2.f32 %v4263_v8  ;;  %v4270_v3 = vmul.f32 -1.442695, %v246_v59  ;;  %v259_v59 = vld [vmem:[%s7790_s0 + $0x288] sm:$0xff] }
  0x7b   : > { %v5225_v17 = vpop.eup %5224  ;;  %5250 = vpow2.f32 %v4262_v11 }
  0x7c   : > { %v5227_v18 = vpop.eup %5226  ;;  %1921 = vperm.xlu1 %4887, %v5209_v62   ;;  %v995_v19 = vadd.f32 1.0, %v5225_v17  ;;  %5252 = vpow2.f32 %v4265_v13  ;;  %v249_v62 = vld [vmem:[%s7790_s0 + $0x238] sm:$0xff]  ;;  %v252_v13 = vld [vmem:[%s7790_s0 + $0x250] sm:$0xff] }
  0x7d   : > { %v5229_v20 = vpop.eup %5228  ;;  %1916 = vperm.xlu0 %4886, %v5211_v1   ;;  %v994_v21 = vadd.f32 1.0, %v5227_v18  ;;  %5254 = vpow2.f32 %v4264_v15  ;;  %v248_v1 = vld [vmem:[%s7790_s0 + $0x230] sm:$0xff]  ;;  %v4273_v6 = vmul.f32 -1.442695, %v249_v62 }
  0x7e   : > { %v5231_v22 = vpop.eup %5230  ;;  %5256 = vrcp.f32 %v995_v19  ;;  %v997_v23 = vadd.f32 1.0, %v5229_v20  ;;  %v4272_v9 = vmul.f32 -1.442695, %v248_v1  ;;  %v254_v19 = vld [vmem:[%s7790_s0 + $0x260] sm:$0xff] }
  0x7f   : > { %v5233_v24 = vpop.eup %5232  ;;  %5258 = vrcp.f32 %v994_v21  ;;  %v996_v25 = vadd.f32 1.0, %v5231_v22  ;;  %v4276_v21 = vmul.f32 -1.442695, %v252_v13  ;;  %v257_v22 = vld [vmem:[%s7790_s0 + $0x278] sm:$0xff] }
  0x80   : > { %v5235_v26 = vpop.eup %5234  ;;  %1931 = vperm.xlu1 %4887, %v5213_v4   ;;  %5260 = vrcp.f32 %v997_v23  ;;  %v999_v27 = vadd.f32 1.0, %v5233_v24  ;;  %v251_v4 = vld [vmem:[%s7790_s0 + $0x248] sm:$0xff] }
  0x81   : > { %v5237_v28 = vpop.eup %5236  ;;  %1926 = vperm.xlu0 %4886, %v5215_v7   ;;  %5262 = vrcp.f32 %v996_v25  ;;  %v998_v29 = vadd.f32 1.0, %v5235_v26  ;;  %v250_v7 = vld [vmem:[%s7790_s0 + $0x240] sm:$0xff]  ;;  %v256_v25 = vld [vmem:[%s7790_s0 + $0x270] sm:$0xff] }
  0x82   : > { %v5239_v30 = vpop.eup %5238  ;;  %5264 = vrcp.f32 %v999_v27  ;;  %v1001_v31 = vadd.f32 1.0, %v5237_v28  ;;  %v4274_v15 = vmul.f32 -1.442695, %v250_v7  ;;  %v4278_v27 = vmul.f32 -1.442695, %v254_v19 }
  0x83   : > { %v5241_v32 = vpop.eup %5240  ;;  %5266 = vrcp.f32 %v998_v29  ;;  %v1000_v33 = vadd.f32 1.0, %v5239_v30  ;;  %v4281_v29 = vmul.f32 -1.442695, %v257_v22 }
  0x84   : > { %v5243_v34 = vpop.eup %5242  ;;  %1941 = vperm.xlu1 %4887, %v5217_v10   ;;  %5268 = vrcp.f32 %v1001_v31  ;;  %v1003_v35 = vadd.f32 1.0, %v5241_v32  ;;  %v253_v10 = vld [vmem:[%s7790_s0 + $0x258] sm:$0xff]  ;;  %v4280_v31 = vmul.f32 -1.442695, %v256_v25 }
  0x85   : > { %v5245_v36 = vpop.eup %5244  ;;  %1936 = vperm.xlu0 %4886, %v5219_v12   ;;  %5270 = vrcp.f32 %v1000_v33  ;;  %v1002_v37 = vadd.f32 1.0, %v5243_v34  ;;  %v4275_v12 = vmul.f32 -1.442695, %v251_v4  ;;  %v4277_v18 = vmul.f32 -1.442695, %v253_v10  ;;  %v305_v25 = vld [vmem:[%s7790_s0 + $0x3f8] sm:$0xff] }
  0x86   : > { %v5247_v38 = vpop.eup %5246  ;;  %5272 = vrcp.f32 %v1003_v35  ;;  %v1005_v39 = vadd.f32 1.0, %v5245_v36 }
  0x87   : > { %v5249_v40 = vpop.eup %5248  ;;  %5274 = vrcp.f32 %v1002_v37  ;;  %v1004_v41 = vadd.f32 1.0, %v5247_v38 }
  0x88   : > { %v5251_v43 = vpop.eup %5250  ;;  %1951 = vperm.xlu1 %4887, %v5221_v14   ;;  %5276 = vrcp.f32 %v1005_v39  ;;  %v1007_v44 = vadd.f32 1.0, %v5249_v40 }
  0x89   : > { %v5253_v46 = vpop.eup %5252  ;;  %1946 = vperm.xlu0 %4886, %v5223_v16   ;;  %5278 = vrcp.f32 %v1004_v41  ;;  %v1006_v47 = vadd.f32 1.0, %v5251_v43  ;;  %v255_v16 = vld [vmem:[%s7790_s0 + $0x268] sm:$0xff] }
  0x8a   : > { %v5255_v49 = vpop.eup %5254  ;;  %5280 = vrcp.f32 %v1007_v44  ;;  %v1009_v50 = vadd.f32 1.0, %v5253_v46  ;;  %v4279_v24 = vmul.f32 -1.442695, %v255_v16 }
  0x8b   : > { %v5257_v53 = vpop.eup %5256  ;;  %5282 = vrcp.f32 %v1006_v47  ;;  %v1008_v54 = vadd.f32 1.0, %v5255_v49 }
  0x8c   : > { %v5259_v57 = vpop.eup %5258  ;;  %1961 = vperm.xlu1 %4887, %v5257_v53   ;;  %5284 = vrcp.f32 %v1009_v50 }
  0x8d   : > { %v5261_v60 = vpop.eup %5260  ;;  %1956 = vperm.xlu0 %4886, %v5259_v57   ;;  %5286 = vrcp.f32 %v1008_v54 }
  0x8e   : > { %v5263_v63 = vpop.eup %5262  ;;  %5288 = vpow2.f32 %v4267_v51 }
  0x8f   : > { %v5265_v2 = vpop.eup %5264  ;;  %5290 = vpow2.f32 %v4266_v55 }
  0x90   : > { %v5267_v5 = vpop.eup %5266  ;;  %1971 = vperm.xlu1 %4887, %v5261_v60   ;;  %5292 = vpow2.f32 %v4269_v58 }
  0x91   : > { %v5269_v8 = vpop.eup %5268  ;;  %1966 = vperm.xlu0 %4886, %v5263_v63   ;;  %5294 = vpow2.f32 %v4268_v61  ;;  %v258_v63 = vld [vmem:[%s7790_s0 + $0x280] sm:$0xff] }
  0x92   : > { %v5271_v11 = vpop.eup %5270  ;;  %5296 = vpow2.f32 %v4271_v0  ;;  %v4282_v10 = vmul.f32 -1.442695, %v258_v63 }
  0x93   : > { %v5273_v14 = vpop.eup %5272  ;;  %5298 = vpow2.f32 %v4270_v3 }
  0x94   : > { %v5275_v17 = vpop.eup %5274  ;;  %1981 = vperm.xlu1 %4887, %v5265_v2   ;;  %5300 = vpow2.f32 %v4273_v6  ;;  %v261_v2 = vld [vmem:[%s7790_s0 + $0x298] sm:$0xff]  ;;  %v260_v6 = vld [vmem:[%s7790_s0 + $0x290] sm:$0xff] }
  0x95   : > { %v5277_v20 = vpop.eup %5276  ;;  %1976 = vperm.xlu0 %4886, %v5267_v5   ;;  %5302 = vpow2.f32 %v4272_v9  ;;  %v4283_v5 = vmul.f32 -1.442695, %v259_v59 }
  0x96   : > { %v5279_v23 = vpop.eup %5278  ;;  %5304 = vpow2.f32 %v4275_v12 }
  0x97   : > { %v5281_v26 = vpop.eup %5280  ;;  %5306 = vpow2.f32 %v4274_v15  ;;  %v262_v15 = vld [vmem:[%s7790_s0 + $0x2a0] sm:$0xff] }
  0x98   : > { %v5283_v28 = vpop.eup %5282  ;;  %1991 = vperm.xlu1 %4887, %v5269_v8   ;;  %5308 = vpow2.f32 %v4277_v18  ;;  %v273_v18 = vld [vmem:[%s7790_s0 + $0x2f8] sm:$0xff] }
  0x99   : > { %v5285_v30 = vpop.eup %5284  ;;  %1986 = vperm.xlu0 %4886, %v5271_v11   ;;  %5310 = vpow2.f32 %v4276_v21  ;;  %v263_v11 = vld [vmem:[%s7790_s0 + $0x2a8] sm:$0xff]  ;;  %v272_v21 = vld [vmem:[%s7790_s0 + $0x2f0] sm:$0xff] }
  0x9a   : > { %v5287_v32 = vpop.eup %5286  ;;  %5312 = vpow2.f32 %v4279_v24  ;;  %v4286_v24 = vmul.f32 -1.442695, %v262_v15 }
  0x9b   : > { %v5289_v33 = vpop.eup %5288  ;;  %5314 = vpow2.f32 %v4278_v27 }
  0x9c   : > { %v5291_v34 = vpop.eup %5290  ;;  %2001 = vperm.xlu1 %4887, %v5273_v14   ;;  %v1011_v35 = vadd.f32 1.0, %v5289_v33  ;;  %5316 = vpow2.f32 %v4281_v29  ;;  %v4285_v14 = vmul.f32 -1.442695, %v261_v2  ;;  %v304_v29 = vld [vmem:[%s7790_s0 + $0x3f0] sm:$0xff] }
  0x9d   : > { %v5293_v36 = vpop.eup %5292  ;;  %1996 = vperm.xlu0 %4886, %v5275_v17   ;;  %v1010_v37 = vadd.f32 1.0, %v5291_v34  ;;  %5318 = vpow2.f32 %v4280_v31  ;;  %v4284_v17 = vmul.f32 -1.442695, %v260_v6  ;;  %v4296_v31 = vmul.f32 -1.442695, %v272_v21 }
  0x9e   : > { %v5295_v38 = vpop.eup %5294  ;;  %5320 = vrcp.f32 %v1011_v35  ;;  %v1013_v39 = vadd.f32 1.0, %v5293_v36  ;;  %v4329_v34 = vmul.f32 -1.442695, %v305_v25  ;;  %v288_v35 = vld [vmem:[%s7790_s0 + $0x370] sm:$0xff] }
  0x9f   : > { %v5297_v40 = vpop.eup %5296  ;;  %5322 = vrcp.f32 %v1010_v37  ;;  %v1012_v41 = vadd.f32 1.0, %v5295_v38  ;;  %v4328_v38 = vmul.f32 -1.442695, %v304_v29 }
  0xa0   : > { %v5299_v42 = vpop.eup %5298  ;;  %2011 = vperm.xlu1 %4887, %v5277_v20   ;;  %5324 = vrcp.f32 %v1013_v39  ;;  %v1015_v43 = vadd.f32 1.0, %v5297_v40  ;;  %v4287_v20 = vmul.f32 -1.442695, %v263_v11  ;;  %v271_v39 = vld [vmem:[%s7790_s0 + $0x2e8] sm:$0xff] }
  0xa1   : > { %v5301_v44 = vpop.eup %5300  ;;  %2006 = vperm.xlu0 %4886, %v5279_v23   ;;  %5326 = vrcp.f32 %v1012_v41  ;;  %v1014_v45 = vadd.f32 1.0, %v5299_v42 }
  0xa2   : > { %v5303_v46 = vpop.eup %5302  ;;  %5328 = vrcp.f32 %v1015_v43  ;;  %v1017_v47 = vadd.f32 1.0, %v5301_v44  ;;  %v270_v43 = vld [vmem:[%s7790_s0 + $0x2e0] sm:$0xff] }
  0xa3   : > { %v5305_v48 = vpop.eup %5304  ;;  %5330 = vrcp.f32 %v1014_v45  ;;  %v1016_v49 = vadd.f32 1.0, %v5303_v46  ;;  %v4312_v45 = vmul.f32 -1.442695, %v288_v35  ;;  %v303_v46 = vld [vmem:[%s7790_s0 + $0x3e8] sm:$0xff] }
  0xa4   : > { %v5307_v50 = vpop.eup %5306  ;;  %2021 = vperm.xlu1 %4887, %v5281_v26   ;;  %5332 = vrcp.f32 %v1017_v47  ;;  %v1019_v51 = vadd.f32 1.0, %v5305_v48  ;;  %v4295_v48 = vmul.f32 -1.442695, %v271_v39 }
  0xa5   : > { %v5309_v52 = vpop.eup %5308  ;;  %2016 = vperm.xlu0 %4886, %v5283_v28   ;;  %5334 = vrcp.f32 %v1016_v49  ;;  %v1018_v53 = vadd.f32 1.0, %v5307_v50  ;;  %v4297_v28 = vmul.f32 -1.442695, %v273_v18  ;;  %v302_v49 = vld [vmem:[%s7790_s0 + $0x3e0] sm:$0xff] }
  0xa6   : > { %v5311_v54 = vpop.eup %5310  ;;  %5336 = vrcp.f32 %v1019_v51  ;;  %v1021_v55 = vadd.f32 1.0, %v5309_v52  ;;  %v4294_v52 = vmul.f32 -1.442695, %v270_v43 }
  0xa7   : > { %v5313_v56 = vpop.eup %5312  ;;  %v6077_v57 = vpop.permute.xlu1 %1726  ;;  %5338 = vrcp.f32 %v1018_v53  ;;  %v1020_v58 = vadd.f32 1.0, %v5311_v54 }
  0xa8   : > { %v5315_v60 = vpop.eup %5314  ;;  %v6082_v61 = vpop.permute.xlu0 %1716  ;;  %2031 = vperm.xlu1 %4887, %v5285_v30   ;;  %5340 = vrcp.f32 %v1021_v55  ;;  %v1023_v62 = vadd.f32 1.0, %v5313_v56  ;;  %v4327_v55 = vmul.f32 -1.442695, %v303_v46  ;;  %v268_v46 = vld [vmem:[%s7790_s0 + $0x2d0] sm:$0xff] }
  0xa9   : > { %v5317_v0 = vpop.eup %5316  ;;  %2026 = vperm.xlu0 %4886, %v5287_v32   ;;  %5342 = vrcp.f32 %v1020_v58  ;;  %v1022_v1 = vadd.f32 1.0, %v5315_v60  ;;  %v289_v32 = vld [vmem:[%s7790_s0 + $0x378] sm:$0xff]  ;;  %v4326_v58 = vmul.f32 -1.442695, %v302_v49 }
  0xaa   : > { %v5319_v3 = vpop.eup %5318  ;;  %5344 = vrcp.f32 %v1023_v62  ;;  %v1025_v4 = vadd.f32 1.0, %v5317_v0  ;;  %v4313_v42 = vmul.f32 -1.442695, %v289_v32 }
  0xab   : > { %v5321_v7 = vpop.eup %5320  ;;  %v6093_v8 = vpop.permute.xlu1 %1731  ;;  %5346 = vrcp.f32 %v1022_v1  ;;  %v1024_v9 = vadd.f32 1.0, %v5319_v3 }
  0xac   : > { %v5323_v12 = vpop.eup %5322  ;;  %v6098_v13 = vpop.permute.xlu0 %1721  ;;  %2041 = vperm.xlu1 %4887, %v5321_v7   ;;  %5348 = vrcp.f32 %v1025_v4 }
  0xad   : > { %v5325_v16 = vpop.eup %5324  ;;  %2036 = vperm.xlu0 %4886, %v5323_v12   ;;  %5350 = vrcp.f32 %v1024_v9 }
  0xae   : > { %v5327_v19 = vpop.eup %5326  ;;  %5352 = vpow2.f32 %v4283_v5 }
  0xaf   : > { %v5329_v22 = vpop.eup %5328  ;;  %v6109_v23 = vpop.permute.xlu1 %1741  ;;  %5354 = vpow2.f32 %v4282_v10 }
  0xb0   : > { %v5331_v26 = vpop.eup %5330  ;;  %v6114_v27 = vpop.permute.xlu0 %1736  ;;  %2051 = vperm.xlu1 %4887, %v5325_v16   ;;  %5356 = vpow2.f32 %v4285_v14 }
  0xb1   : > { %v5333_v30 = vpop.eup %5332  ;;  %2046 = vperm.xlu0 %4886, %v5327_v19   ;;  %5358 = vpow2.f32 %v4284_v17 }
  0xb2   : > { %v5335_v33 = vpop.eup %5334  ;;  %5360 = vpow2.f32 %v4287_v20 }
  0xb3   : > { %v5337_v36 = vpop.eup %5336  ;;  %v6125_v37 = vpop.permute.xlu1 %1751  ;;  %5362 = vpow2.f32 %v4286_v24 }
  0xb4   : > { %v5339_v40 = vpop.eup %5338  ;;  %v6130_v41 = vpop.permute.xlu0 %1746  ;;  %2061 = vperm.xlu1 %4887, %v5329_v22   ;;  %5364 = vpow2.f32 %v4297_v28 }
  0xb5   : > { %v5341_v44 = vpop.eup %5340  ;;  %2056 = vperm.xlu0 %4886, %v5331_v26   ;;  %5366 = vpow2.f32 %v4296_v31 }
  0xb6   : > { %v5343_v47 = vpop.eup %5342  ;;  %5368 = vpow2.f32 %v4329_v34 }
  0xb7   : > { %v5345_v50 = vpop.eup %5344  ;;  %v6141_v51 = vpop.permute.xlu1 %1761  ;;  %5370 = vpow2.f32 %v4328_v38  ;;  %v286_v38 = vld [vmem:[%s7790_s0 + $0x360] sm:$0xff] }
  0xb8   : > { %v5347_v53 = vpop.eup %5346  ;;  %v6143_v54 = vpop.permute.xlu0 %1756  ;;  %2071 = vperm.xlu1 %4887, %v5333_v30   ;;  %5372 = vpow2.f32 %v4313_v42  ;;  %v269_v42 = vld [vmem:[%s7790_s0 + $0x2d8] sm:$0xff] }
  0xb9   : > { %v5349_v56 = vpop.eup %5348  ;;  %2066 = vperm.xlu0 %4886, %v5335_v33   ;;  %5374 = vpow2.f32 %v4312_v45  ;;  %v287_v33 = vld [vmem:[%s7790_s0 + $0x368] sm:$0xff] }
  0xba   : > { %v5351_v59 = vpop.eup %5350  ;;  %5376 = vpow2.f32 %v4295_v48  ;;  %v4311_v45 = vmul.f32 -1.442695, %v287_v33 }
  0xbb   : > { %v5353_v60 = vpop.eup %5352  ;;  %v6145_v62 = vpop.permute.xlu1 %1771  ;;  %5378 = vpow2.f32 %v4294_v52  ;;  %v301_v52 = vld [vmem:[%s7790_s0 + $0x3d8] sm:$0xff] }
  0xbc   : > { %v5355_v63 = vpop.eup %5354  ;;  %v6147_v0 = vpop.permute.xlu0 %1766  ;;  %2081 = vperm.xlu1 %4887, %v5337_v36   ;;  %v1027_v1 = vadd.f32 1.0, %v5353_v60  ;;  %5380 = vpow2.f32 %v4327_v55  ;;  %v4292_v60 = vmul.f32 -1.442695, %v268_v46 }
  0xbd   : > { %v5357_v2 = vpop.eup %5356  ;;  %2076 = vperm.xlu0 %4886, %v5339_v40   ;;  %v1026_v3 = vadd.f32 1.0, %v5355_v63  ;;  %5382 = vpow2.f32 %v4326_v58  ;;  %v300_v58 = vld [vmem:[%s7790_s0 + $0x3d0] sm:$0xff]  ;;  %v285_v63 = vld [vmem:[%s7790_s0 + $0x358] sm:$0xff] }
  0xbe   : > { %v5359_v4 = vpop.eup %5358  ;;  %5384 = vrcp.f32 %v1027_v1  ;;  %v1029_v5 = vadd.f32 1.0, %v5357_v2  ;;  %v4325_v2 = vmul.f32 -1.442695, %v301_v52  ;;  %v4890_v52 = vld [vmem:[%s6229_s16 + $0x4] ss:$48 sps:$4 sm:$0xff]  }
  0xbf   : > { %v5361_v6 = vpop.eup %5360  ;;  %v6149_v7 = vpop.permute.xlu1 %1781  ;;  %5386 = vrcp.f32 %v1026_v3  ;;  %v1028_v9 = vadd.f32 1.0, %v5359_v4  ;;  %v284_v3 = vld [vmem:[%s7790_s0 + $0x350] sm:$0xff]  ;;  %3570 = vmatprep.mubr.bf16.mxu0 %v4890_v52 }
  0xc0   : > { %v5363_v10 = vpop.eup %5362  ;;  %v6151_v11 = vpop.permute.xlu0 %1776  ;;  %2091 = vperm.xlu1 %4887, %v5341_v44   ;;  %5388 = vrcp.f32 %v1029_v5  ;;  %v1031_v12 = vadd.f32 1.0, %v5361_v6  ;;  %v4324_v6 = vmul.f32 -1.442695, %v300_v58 }
  0xc1   : > { %v5365_v14 = vpop.eup %5364  ;;  %2086 = vperm.xlu0 %4886, %v5343_v47   ;;  %5390 = vrcp.f32 %v1028_v9  ;;  %v1030_v15 = vadd.f32 1.0, %v5363_v10  ;;  %v267_v9 = vld [vmem:[%s7790_s0 + $0x2c8] sm:$0xff] }
  0xc2   : > { %v5367_v16 = vpop.eup %5366  ;;  %5392 = vrcp.f32 %v1031_v12  ;;  %v1041_v17 = vadd.f32 1.0, %v5365_v14  ;;  %v4309_v14 = vmul.f32 -1.442695, %v285_v63 }
  0xc3   : > { %v5369_v18 = vpop.eup %5368  ;;  %v6153_v19 = vpop.permute.xlu1 %1791  ;;  %5394 = vrcp.f32 %v1030_v15  ;;  %v1040_v20 = vadd.f32 1.0, %v5367_v16  ;;  %v266_v15 = vld [vmem:[%s7790_s0 + $0x2c0] sm:$0xff] }
  0xc4   : > { %v5371_v21 = vpop.eup %5370  ;;  %v6155_v22 = vpop.permute.xlu0 %1786  ;;  %2101 = vperm.xlu1 %4887, %v5345_v50   ;;  %5396 = vrcp.f32 %v1041_v17  ;;  %v1073_v24 = vadd.f32 1.0, %v5369_v18  ;;  %v4310_v50 = vmul.f32 -1.442695, %v286_v38  ;;  %v4308_v17 = vmul.f32 -1.442695, %v284_v3  ;;  %v299_v18 = vld [vmem:[%s7790_s0 + $0x3c8] sm:$0xff] }
  0xc5   : > { %v5373_v25 = vpop.eup %5372  ;;  %2096 = vperm.xlu0 %4886, %v5347_v53   ;;  %5398 = vrcp.f32 %v1040_v20  ;;  %v1072_v26 = vadd.f32 1.0, %v5371_v21  ;;  %v4291_v21 = vmul.f32 -1.442695, %v267_v9  ;;  %v4323_v33 = vmul.f32 -1.442695, %v299_v18  ;;  %v297_v3 = vld [vmem:[%s7790_s0 + $0x3b8] sm:$0xff] }
  0xc6   : > { %v5375_v28 = vpop.eup %5374  ;;  %5400 = vrcp.f32 %v1073_v24  ;;  %v1057_v29 = vadd.f32 1.0, %v5373_v25  ;;  %v298_v24 = vld [vmem:[%s7790_s0 + $0x3c0] sm:$0xff]  ;;  %v296_v9 = vld [vmem:[%s7790_s0 + $0x3b0] sm:$0xff]  ;;  %v4893_v18 = vld [vmem:[%s6229_s16 + $0xc] ss:$48 sps:$4 sm:$0xff]  }
  0xc7   : > { %v5377_v30 = vpop.eup %5376  ;;  %v6157_v31 = vpop.permute.xlu1 %1801  ;;  %5402 = vrcp.f32 %v1072_v26  ;;  %v1056_v32 = vadd.f32 1.0, %v5375_v28  ;;  %v4290_v28 = vmul.f32 -1.442695, %v266_v15  ;;  %v4322_v38 = vmul.f32 -1.442695, %v298_v24  ;;  %v1536_v15 = vld [vmem:[%s7791_s1 + $0x70] sm:$0xff]  ;;  %3667 = vmatprep.mubr.bf16.mxu1 %v4893_v18 }
  0xc8   : > { %v5379_v34 = vpop.eup %5378  ;;  %v6162_v35 = vpop.permute.xlu0 %1796  ;;  %2111 = vperm.xlu1 %4887, %v5349_v56   ;;  %5404 = vrcp.f32 %v1057_v29  ;;  %v1039_v36 = vadd.f32 1.0, %v5377_v30  ;;  %v4293_v56 = vmul.f32 -1.442695, %v269_v42  ;;  %v283_v29 = vld [vmem:[%s7790_s0 + $0x348] sm:$0xff] }
  0xc9   : > { %v5381_v39 = vpop.eup %5380  ;;  %2106 = vperm.xlu0 %4886, %v5351_v59   ;;  %5406 = vrcp.f32 %v1056_v32  ;;  %v1038_v40 = vadd.f32 1.0, %v5379_v34  ;;  %v282_v34 = vld [vmem:[%s7790_s0 + $0x340] sm:$0xff]  ;;  %v4307_v42 = vmul.f32 -1.442695, %v283_v29  ;;  %v280_v29 = vld [vmem:[%s7790_s0 + $0x330] sm:$0xff] }
  0xca   : > { %v5383_v43 = vpop.eup %5382  ;;  %5408 = vrcp.f32 %v1039_v36  ;;  %v1071_v44 = vadd.f32 1.0, %v5381_v39  ;;  %v265_v39 = vld [vmem:[%s7790_s0 + $0x2b8] sm:$0xff]  ;;  %v4306_v46 = vmul.f32 -1.442695, %v282_v34 }
  0xcb   : > { %v5385_v47 = vpop.eup %5384  ;;  %v6173_v48 = vpop.permute.xlu1 %1811  ;;  %5410 = vrcp.f32 %v1038_v40  ;;  %v1070_v49 = vadd.f32 1.0, %v5383_v43  ;;  %v264_v43 = vld [vmem:[%s7790_s0 + $0x2b0] sm:$0xff] }
  0xcc   : > { %v5387_v53 = vpop.eup %5386  ;;  %v6178_v55 = vpop.permute.xlu0 %1806  ;;  %2121 = vperm.xlu1 %4887, %v5385_v47   ;;  %5412 = vrcp.f32 %v1071_v44 }
  0xcd   : > { %v5389_v59 = vpop.eup %5388  ;;  %2116 = vperm.xlu0 %4886, %v5387_v53   ;;  %5414 = vrcp.f32 %v1070_v49 }
  0xce   : > { %v5391_v1 = vpop.eup %5390  ;;  %5416 = vpow2.f32 %v4311_v45 }
  0xcf   : > { %v5393_v4 = vpop.eup %5392  ;;  %v6189_v5 = vpop.permute.xlu1 %1821  ;;  %5418 = vpow2.f32 %v4310_v50  ;;  %v4289_v50 = vmul.f32 -1.442695, %v265_v39 }
  0xd0   : > { %v5395_v10 = vpop.eup %5394  ;;  %v6196_v12 = vpop.permute.xlu0 %1816  ;;  %2131 = vperm.xlu1 %4887, %v5389_v59   ;;  %5420 = vpow2.f32 %v4293_v56  ;;  %v4288_v56 = vmul.f32 -1.442695, %v264_v43  ;;  %v6281_v43 = vmul.f32 -1.442695, %v296_v9 }
  0xd1   : > { %v5397_v16 = vpop.eup %5396  ;;  %2126 = vperm.xlu0 %4886, %v5391_v1   ;;  %5422 = vpow2.f32 %v4292_v60 }
  0xd2   : > { %v5399_v20 = vpop.eup %5398  ;;  %5424 = vpow2.f32 %v4325_v2 }
  0xd3   : > { %v5401_v25 = vpop.eup %5400  ;;  %v6209_v26 = vpop.permute.xlu1 %1831  ;;  %5426 = vpow2.f32 %v4324_v6 }
  0xd4   : > { %v5403_v30 = vpop.eup %5402  ;;  %v6214_v32 = vpop.permute.xlu0 %1826  ;;  %2141 = vperm.xlu1 %4887, %v5393_v4   ;;  %5428 = vpow2.f32 %v4309_v14  ;;  %v1537_v14 = vld [vmem:[%s7791_s1 + $0x78] sm:$0xff] }
  0xd5   : > { %v5405_v36 = vpop.eup %5404  ;;  %2136 = vperm.xlu0 %4886, %v5395_v10   ;;  %5430 = vpow2.f32 %v4308_v17  ;;  %v281_v17 = vld [vmem:[%s7790_s0 + $0x338] sm:$0xff] }
  0xd6   : > { %v5407_v40 = vpop.eup %5406  ;;  %5432 = vpow2.f32 %v4291_v21  ;;  %v1551_v21 = vld [vmem:[%s7791_s1 + $0xe8] sm:$0xff] }
  0xd7   : > { %v6231_v44 = vpop.eup %5408  ;;  %v6233_v45 = vpop.permute.xlu1 %1841  ;;  %5434 = vpow2.f32 %v4290_v28 }
  0xd8   : > { %v6235_v47 = vpop.eup %5410  ;;  %v6237_v49 = vpop.permute.xlu0 %1836  ;;  %2191 = vperm.xlu1 %4887, %v5397_v16   ;;  %5436 = vpow2.f32 %v4323_v33  ;;  %v1550_v33 = vld [vmem:[%s7791_s1 + $0xe0] sm:$0xff] }
  0xd9   : > { %v6240_v53 = vpop.eup %5412  ;;  %2186 = vperm.xlu0 %4886, %v5399_v20   ;;  %5438 = vpow2.f32 %v4322_v38  ;;  %v1552_v38 = vld [vmem:[%s7791_s1 + $0xf0] sm:$0xff] }
  0xda   : > { %v6242_v58 = vpop.eup %5414  ;;  %5440 = vpow2.f32 %v4307_v42  ;;  %v6279_v42 = vmul.f32 -1.442695, %v297_v3  ;;  %v2689_v3 = vmul.f32 %v6153_v19, %v1537_v14  ;;  %v1548_v19 = vld [vmem:[%s7791_s1 + $0xd0] sm:$0xff] }
  0xdb   : > { %v5417_v59 = vpop.eup %5416  ;;  %v6244_v60 = vpop.permute.xlu1 %1851  ;;  %5442 = vpow2.f32 %v4306_v46 }
  0xdc   : > { %v5419_v63 = vpop.eup %5418  ;;  %v6246_v1 = vpop.permute.xlu0 %1846  ;;  %2351 = vperm.xlu1 %4887, %v5401_v25   ;;  %v1055_v2 = vadd.f32 1.0, %v5417_v59  ;;  %5444 = vpow2.f32 %v4289_v50  ;;  %v1553_v25 = vld [vmem:[%s7791_s1 + $0xf8] sm:$0xff]  ;;  %v1535_v50 = vld [vmem:[%s7791_s1 + $0x68] sm:$0xff] }
  0xdd   : > { %v5421_v4 = vpop.eup %5420  ;;  %2346 = vperm.xlu0 %4886, %v5403_v30   ;;  %v1054_v6 = vadd.f32 1.0, %v5419_v63  ;;  %5446 = vpow2.f32 %v4288_v56  ;;  %v6288_v63 = vmul.f32 -1.442695, %v280_v29 }
  0xde   : > { %v5423_v10 = vpop.eup %5422  ;;  %5448 = vrcp.f32 %v1055_v2  ;;  %v1037_v16 = vadd.f32 1.0, %v5421_v4  ;;  %v2688_v4 = vmul.f32 %v6155_v22, %v1536_v15 }
  0xdf   : > { %v5425_v20 = vpop.eup %5424  ;;  %v1862_v24 = vpop.permute.xlu1 %1861  ;;  %5450 = vrcp.f32 %v1054_v6  ;;  %v1036_v28 = vadd.f32 1.0, %v5423_v10 }
  0xe0   : > { %v5427_v30 = vpop.eup %5426  ;;  %v1857_v34 = vpop.permute.xlu0 %1856  ;;  %2271 = vperm.xlu1 %4887, %v5405_v36   ;;  %5452 = vrcp.f32 %v1037_v16  ;;  %v1069_v39 = vadd.f32 1.0, %v5425_v20  ;;  %v6286_v36 = vmul.f32 -1.442695, %v281_v17  ;;  %v1534_v16 = vld [vmem:[%s7791_s1 + $0x60] sm:$0xff]  ;;  %v1549_v17 = vld [vmem:[%s7791_s1 + $0xd8] sm:$0xff]  ;;  %v2703_v22 = vmul.f32 %v1862_v24, %v1551_v21  ;;  %v1532_v24 = vld [vmem:[%s7791_s1 + $0x50] sm:$0xff] }
  0xe1   : > { %v5429_v46 = vpop.eup %5428  ;;  %2266 = vperm.xlu0 %4886, %v5407_v40   ;;  %5454 = vrcp.f32 %v1036_v28  ;;  %v1068_v52 = vadd.f32 1.0, %v5427_v30  ;;  %v295_v40 = vld [vmem:[%s7790_s0 + $0x3a8] sm:$0xff]  ;;  %v2702_v28 = vmul.f32 %v1857_v34, %v1550_v33  ;;  %v294_v34 = vld [vmem:[%s7790_s0 + $0x3a0] sm:$0xff] }
  0xe2   : > { %v5431_v56 = vpop.eup %5430  ;;  %5456 = vrcp.f32 %v1069_v39  ;;  %v1053_v59 = vadd.f32 1.0, %v5429_v46  ;;  %v2687_v46 = vmul.f32 %v6149_v7, %v1535_v50  ;;  %v1547_v50 = vld [vmem:[%s7791_s1 + $0xc8] sm:$0xff] }
  0xe3   : > { %v5433_v2 = vpop.eup %5432  ;;  %v1872_v6 = vpop.permute.xlu1 %1871  ;;  %5458 = vrcp.f32 %v1068_v52  ;;  %v1052_v9 = vadd.f32 1.0, %v5431_v56  ;;  %v6307_v56 = vmul.f32 -1.442695, %v295_v40  ;;  %v279_v40 = vld [vmem:[%s7790_s0 + $0x328] sm:$0xff] }
  0xe4   : > { %v5435_v10 = vpop.eup %5434  ;;  %v2705_v14 = vmul.f32 %v1872_v6, %v1553_v25  ;;  %v1867_v15 = vpop.permute.xlu0 %1866  ;;  %2181 = vperm.xlu1 %4887, %v6231_v44   ;;  %5460 = vrcp.f32 %v1053_v59  ;;  %v1035_v18 = vadd.f32 1.0, %v5433_v2  ;;  %v1533_v44 = vld [vmem:[%s7791_s1 + $0x58] sm:$0xff]  ;;  %v1546_v59 = vld [vmem:[%s7791_s1 + $0xc0] sm:$0xff]  ;;  %v2873_v6 = vpack.c.bf16 %v2689_v3, %v2688_v4 }
  0xe5   : > { %v5437_v20 = vpop.eup %5436  ;;  %v2704_v29 = vmul.f32 %v1867_v15, %v1552_v38  ;;  %2176 = vperm.xlu0 %4886, %v6235_v47   ;;  %5462 = vrcp.f32 %v1052_v9  ;;  %v1034_v30 = vadd.f32 1.0, %v5435_v10  ;;  %v2686_v47 = vmul.f32 %v6151_v11, %v1534_v16  ;;  %v1531_v15 = vld [vmem:[%s7791_s1 + $0x48] sm:$0xff] }
  0xe6   : > { %v5439_v39 = vpop.eup %5438  ;;  %5464 = vrcp.f32 %v1035_v18  ;;  %v1067_v52 = vadd.f32 1.0, %v5437_v20  ;;  %v2701_v11 = vmul.f32 %v6244_v60, %v1549_v17  ;;  %v2700_v16 = vmul.f32 %v6246_v1, %v1548_v19  ;;  %v1530_v1 = vld [vmem:[%s7791_s1 + $0x40] sm:$0xff] }
  0xe7   : > { %v5441_v21 = vpop.eup %5440  ;;  %v6316_v25 = vpop.permute.xlu1 %1881  ;;  %v2881_v33 = vpack.c.bf16 %v2705_v14, %v2704_v29  ;;  %5466 = vrcp.f32 %v1034_v30  ;;  %v1066_v7 = vadd.f32 1.0, %v5439_v39  ;;  %v2880_v14 = vpack.c.bf16 %v2703_v22, %v2702_v28  ;;  %v278_v18 = vld [vmem:[%s7790_s0 + $0x320] sm:$0xff]  ;;  %v1545_v39 = vld [vmem:[%s7791_s1 + $0xb8] sm:$0xff] }
  0xe8   : > { %v5443_v38 = vpop.eup %5442  ;;  %v6328_v2 = vpop.permute.xlu0 %1876  ;;  %2341 = vperm.xlu1 %4887, %v6240_v53   ;;  %5468 = vrcp.f32 %v1067_v52  ;;  %v1051_v9 = vadd.f32 1.0, %v5441_v21  ;;  %v6336_v3 = vmul.f32 -1.442695, %v294_v34  ;;  %v6346_v22 = vmul.f32 -1.442695, %v279_v40  ;;  %v1544_v52 = vld [vmem:[%s7791_s1 + $0xb0] sm:$0xff] }
  0xe9   : > { %v5445_v10 = vpop.eup %5444  ;;  %2336 = vperm.xlu0 %4886, %v6242_v58   ;;  %4492 = vmatprep.subr.bf16.mxu0 %v2881_v33  ;;  %5470 = vrcp.f32 %v1066_v7  ;;  %v1050_v60 = vadd.f32 1.0, %v5443_v38  ;;  %v2685_v28 = vmul.f32 %v6145_v62, %v1533_v44  ;;  %v2684_v29 = vmul.f32 %v6147_v0, %v1532_v24  ;;  %v293_v33 = vld [vmem:[%s7790_s0 + $0x398] sm:$0xff]  ;;  %v292_v24 = vld [vmem:[%s7790_s0 + $0x390] sm:$0xff]  ;;  %v291_v40 = vld [vmem:[%s7790_s0 + $0x388] sm:$0xff] }
  0xea   : > { %v5447_v17 = vpop.eup %5446  ;;  %4493 = vmatpush3.bf16.msra.mxu0 %v2873_v6  ;;  %5472 = vrcp.f32 %v1051_v9  ;;  %v1033_v53 = vadd.f32 1.0, %v5445_v10  ;;  %v2872_v30 = vpack.c.bf16 %v2687_v46, %v2686_v47  ;;  %v2699_v0 = vmul.f32 %v6233_v45, %v1547_v50 }
  0xeb   : > { %v5449_v4 = vpop.eup %5448  ;;  %4494 = vmatprep.subr.bf16.mxu0 %v2880_v14  ;;  %v6344_v58 = vpop.permute.xlu1 %1891  ;;  %5474 = vrcp.f32 %v1050_v60  ;;  %v1032_v19 = vadd.f32 1.0, %v5447_v17  ;;  %v2698_v46 = vmul.f32 %v6237_v49, %v1546_v59  ;;  %v2879_v44 = vpack.c.bf16 %v2701_v11, %v2700_v16  ;;  %v277_v49 = vld [vmem:[%s7790_s0 + $0x318] sm:$0xff] }
  0xec   : > { %v5451_v20 = vpop.eup %5450  ;;  %v6359_v21 = vpop.permute.xlu0 %1886  ;;  %2261 = vperm.xlu1 %4887, %v5449_v4   ;;  %5476 = vrcp.f32 %v1033_v53  ;;  %v4302_v7 = vmul.f32 -1.442695, %v278_v18  ;;  %v4317_v45 = vmul.f32 -1.442695, %v293_v33  ;;  %v1529_v59 = vld [vmem:[%s7791_s1 + $0x38] sm:$0xff]  ;;  %v2683_v11 = vmul.f32 %v6141_v51, %v1531_v15  ;;  %v1528_v51 = vld [vmem:[%s7791_s1 + $0x30] sm:$0xff] }
  0xed   : > { %v5453_v62 = vpop.eup %5452  ;;  %2256 = vperm.xlu0 %4886, %v5451_v20   ;;  %5478 = vrcp.f32 %v1032_v19  ;;  %v2871_v6 = vpack.c.bf16 %v2685_v28, %v2684_v29  ;;  %v2697_v16 = vmul.f32 %v6209_v26, %v1545_v39  ;;  %v2696_v14 = vmul.f32 %v6214_v32, %v1544_v52  ;;  %v1526_v26 = vld [vmem:[%s7791_s1 + $0x20] sm:$0xff] }
  0xee   : > { %v5455_v47 = vpop.eup %5454  ;;  %4495 = vmatpush3.bf16.msra.mxu0 %v2872_v30  ;;  %5480 = vpow2.f32 %v6279_v42  ;;  %v2682_v42 = vmul.f32 %v6143_v54, %v1530_v1  ;;  %v1543_v54 = vld [vmem:[%s7791_s1 + $0xa8] sm:$0xff]  ;;  %v2878_v60 = vpack.c.bf16 %v2699_v0, %v2698_v46  ;;  %v4316_v53 = vmul.f32 -1.442695, %v292_v24  ;;  %v1541_v30 = vld [vmem:[%s7791_s1 + $0x98] sm:$0xff] }
  0xef   : > { %v5457_v34 = vpop.eup %5456  ;;  %4496 = vmatprep.subr.bf16.mxu0 %v2879_v44  ;;  %v6370_v38 = vpop.permute.xlu1 %1901  ;;  %5482 = vpow2.f32 %v6281_v43  ;;  %v276_v43 = vld [vmem:[%s7790_s0 + $0x310] sm:$0xff]  ;;  %v4301_v4 = vmul.f32 -1.442695, %v277_v49  ;;  %v1527_v1 = vld [vmem:[%s7791_s1 + $0x28] sm:$0xff]  ;;  %v4315_v19 = vmul.f32 -1.442695, %v291_v40  ;;  %v2681_v20 = vmul.f32 %v6125_v37, %v1529_v59 }
  0xf0   : > { %v5459_v50 = vpop.eup %5458  ;;  %v6381_v9 = vpop.permute.xlu0 %1896  ;;  %2171 = vperm.xlu1 %4887, %v5453_v62   ;;  %5484 = vpow2.f32 %v6286_v36  ;;  %v1542_v36 = vld [vmem:[%s7791_s1 + $0xa0] sm:$0xff]  ;;  %v2680_v28 = vmul.f32 %v6130_v41, %v1528_v51  ;;  %v2870_v29 = vpack.c.bf16 %v2683_v11, %v2682_v42  ;;  %v1540_v41 = vld [vmem:[%s7791_s1 + $0x90] sm:$0xff]  ;;  %v2695_v33 = vmul.f32 %v6189_v5, %v1543_v54  ;;  %v1525_v5 = vld [vmem:[%s7791_s1 + $0x18] sm:$0xff] }
  0xf1   : > { %v5461_v10 = vpop.eup %5460  ;;  %2166 = vperm.xlu0 %4886, %v5455_v47   ;;  %5486 = vpow2.f32 %v6288_v63  ;;  %v4300_v63 = vmul.f32 -1.442695, %v276_v43  ;;  %v274_v37 = vld [vmem:[%s7790_s0 + $0x300] sm:$0xff]  ;;  %v2694_v62 = vmul.f32 %v6196_v12, %v1542_v36  ;;  %v2877_v0 = vpack.c.bf16 %v2697_v16, %v2696_v14  ;;  %v1539_v11 = vld [vmem:[%s7791_s1 + $0x88] sm:$0xff] }
  0xf2   : > { %v5463_v17 = vpop.eup %5462  ;;  %4497 = vmatpush3.bf16.msra.mxu0 %v2871_v6  ;;  %5488 = vpow2.f32 %v6307_v56  ;;  %v290_v56 = vld [vmem:[%s7790_s0 + $0x380] sm:$0xff]  ;;  %v2679_v12 = vmul.f32 %v6109_v23, %v1527_v1  ;;  %v2693_v42 = vmul.f32 %v6173_v48, %v1541_v30  ;;  %v2692_v6 = vmul.f32 %v6178_v55, %v1540_v41 }
  0xf3   : > { %v6403_v15 = vpop.eup %5464  ;;  %4498 = vmatprep.subr.bf16.mxu0 %v2878_v60  ;;  %v6411_v32 = vpop.permute.xlu1 %1911  ;;  %5490 = vpow2.f32 %v6336_v3  ;;  %v275_v3 = vld [vmem:[%s7790_s0 + $0x308] sm:$0xff]  ;;  %v4314_v46 = vmul.f32 -1.442695, %v290_v56  ;;  %v2876_v43 = vpack.c.bf16 %v2695_v33, %v2694_v62  ;;  %v2677_v48 = vmul.f32 %v6093_v8, %v1525_v5 }
  0xf4   : > { %v6417_v18 = vpop.eup %5466  ;;  %v6424_v39 = vpop.permute.xlu0 %1906  ;;  %2331 = vperm.xlu1 %4887, %v5457_v34   ;;  %5492 = vpow2.f32 %v6346_v22  ;;  %v4299_v47 = vmul.f32 -1.442695, %v275_v3  ;;  %v4298_v34 = vmul.f32 -1.442695, %v274_v37  ;;  %v2691_v36 = vmul.f32 %v6157_v31, %v1539_v11 }
  0xf5   : > { %v6433_v52 = vpop.eup %5468  ;;  %2326 = vperm.xlu0 %4886, %v5459_v50   ;;  %5494 = vpow2.f32 %v4302_v7  ;;  %v2678_v7 = vmul.f32 %v6114_v27, %v1526_v26  ;;  %v1538_v27 = vld [vmem:[%s7791_s1 + $0x80] sm:$0xff] }
  0xf6   : > { %v6440_v22 = vpop.eup %5470  ;;  %4499 = vmatpush3.bf16.msra.mxu0 %v2870_v29  ;;  %5496 = vpow2.f32 %v4317_v45  ;;  %v2869_v45 = vpack.c.bf16 %v2681_v20, %v2680_v28  ;;  %v2690_v8 = vmul.f32 %v6162_v35, %v1538_v27 }
  0xf7   : > { %v6442_v44 = vpop.eup %5472  ;;  %4500 = vmatprep.subr.bf16.mxu0 %v2877_v0  ;;  %v6444_v24 = vpop.permute.xlu1 %1921  ;;  %5498 = vpow2.f32 %v4316_v53  ;;  %v2868_v54 = vpack.c.bf16 %v2679_v12, %v2678_v7  ;;  %v2875_v53 = vpack.c.bf16 %v2693_v42, %v2692_v6  ;;  %v4894_v7 = vld [vmem:[%s6229_s16 + $0x64] ss:$48 sps:$4 sm:$0xff]  }
  0xf8   : > { %v6446_v49 = vpop.eup %5474  ;;  %v6453_v50 = vpop.permute.xlu0 %1916  ;;  %2251 = vperm.xlu1 %4887, %v5461_v10   ;;  %5500 = vpow2.f32 %v4301_v4  ;;  %v1524_v10 = vld [vmem:[%s7791_s1 + $0x10] sm:$0xff]  ;;  %v2874_v30 = vpack.c.bf16 %v2691_v36, %v2690_v8 }
  0xf9   : > { %v6455_v59 = vpop.eup %5476  ;;  %2246 = vperm.xlu0 %4886, %v5463_v17   ;;  %5502 = vpow2.f32 %v4300_v63  ;;  %v1523_v17 = vld [vmem:[%s7791_s1 + $0x8] sm:$0xff]  ;;  %v2676_v31 = vmul.f32 %v6077_v57, %v1524_v10  ;;  %v1522_v63 = vld [vmem:[%s7791_s1] sm:$0xff]  ;;  %v321_v10 = vld [vmem:[%s7790_s0 + $0x478] sm:$0xff] }
  0xfa   : > { %v6462_v23 = vpop.eup %5478  ;;  %4501 = vmatpush3.bf16.msra.mxu0 %v2869_v45  ;;  %5504 = vpow2.f32 %v4315_v19  ;;  %v2675_v20 = vmul.f32 %v6098_v13, %v1523_v17  ;;  %v2674_v41 = vmul.f32 %v6082_v61, %v1522_v63  ;;  %v337_v61 = vld [vmem:[%s7790_s0 + $0x4f8] sm:$0xff]  ;;  %v352_v63 = vld [vmem:[%s7790_s0 + $0x570] sm:$0xff] }
  0xfb   : > { %v5481_v40 = vpop.eup %5480  ;;  %4502 = vmatprep.subr.bf16.mxu0 %v2876_v43  ;;  %v6471_v55 = vpop.permute.xlu1 %1931  ;;  %5506 = vpow2.f32 %v4314_v46  ;;  %v336_v43 = vld [vmem:[%s7790_s0 + $0x4f0] sm:$0xff]  ;;  %v369_v17 = vld [vmem:[%s7790_s0 + $0x5f8] sm:$0xff] }
  0xfc   : > { %v5483_v51 = vpop.eup %5482  ;;  %v6474_v16 = vpop.permute.xlu0 %1926  ;;  %2161 = vperm.xlu1 %4887, %v6403_v15   ;;  %v1065_v14 = vadd.f32 1.0, %v5481_v40  ;;  %5508 = vpow2.f32 %v4299_v47  ;;  %v2866_v46 = vpack.c.bf16 %v2675_v20, %v2674_v41  ;;  %v335_v41 = vld [vmem:[%s7790_s0 + $0x4e8] sm:$0xff] }
  0xfd   : > { %v5485_v60 = vpop.eup %5484  ;;  %2156 = vperm.xlu0 %4886, %v6417_v18   ;;  %v1064_v4 = vadd.f32 1.0, %v5483_v51  ;;  %5510 = vpow2.f32 %v4298_v34  ;;  %v2867_v18 = vpack.c.bf16 %v2677_v48, %v2676_v31  ;;  %v4888_v34 = vld [vmem:[%s6229_s16] ss:$48 sps:$4 sm:$0xff]   ;;  %v353_v31 = vld [vmem:[%s7790_s0 + $0x578] sm:$0xff] }
  0xfe   : > { %v5487_v1 = vpop.eup %5486  ;;  %4503 = vmatpush3.bf16.msra.mxu0 %v2868_v54  ;;  %5512 = vrcp.f32 %v1065_v14  ;;  %v1049_v15 = vadd.f32 1.0, %v5485_v60  ;;  %v4361_v54 = vmul.f32 -1.442695, %v337_v61  ;;  %v4360_v60 = vmul.f32 -1.442695, %v336_v43  ;;  %v319_v61 = vld [vmem:[%s7790_s0 + $0x468] sm:$0xff] }
  0xff   : > { %v5489_v26 = vpop.eup %5488  ;;  %4504 = vmatprep.subr.bf16.mxu0 %v2875_v53  ;;  %v6486_v19 = vpop.permute.xlu1 %1941  ;;  %5514 = vrcp.f32 %v1064_v4  ;;  %v1048_v35 = vadd.f32 1.0, %v5487_v1  ;;  %v4345_v4 = vmul.f32 -1.442695, %v321_v10  ;;  %v368_v1 = vld [vmem:[%s7790_s0 + $0x5f0] sm:$0xff]  ;;  %v351_v10 = vld [vmem:[%s7790_s0 + $0x568] sm:$0xff] }
 0x100   : > { %v5491_v56 = vpop.eup %5490  ;;  %v6489_v28 = vpop.permute.xlu0 %1936  ;;  %2321 = vperm.xlu1 %4887, %v6433_v52   ;;  %5516 = vrcp.f32 %v1049_v15  ;;  %v1063_v57 = vadd.f32 1.0, %v5489_v26 }
 0x101   : > { %v5493_v29 = vpop.eup %5492  ;;  %2316 = vperm.xlu0 %4886, %v6440_v22   ;;  %5518 = vrcp.f32 %v1048_v35  ;;  %v1062_v3 = vadd.f32 1.0, %v5491_v56  ;;  %v4896_v35 = vld [vmem:[%s6229_s16 + $0x60] ss:$48 sps:$4 sm:$0xff]   ;;  %v4900_v56 = vld [vmem:[%s6229_s16 + $0xc4] ss:$48 sps:$4 sm:$0xff]  }
 0x102   : > { %v5495_v37 = vpop.eup %5494  ;;  %4505 = vmatpush3.bf16.msra.mxu0 %v2867_v18  ;;  %5520 = vrcp.f32 %v1063_v57  ;;  %v1047_v33 = vadd.f32 1.0, %v5493_v29  ;;  %v4393_v29 = vmul.f32 -1.442695, %v369_v17 }
 0x103   : > { %v5497_v13 = vpop.eup %5496  ;;  %4506 = vmatprep.subr.bf16.mxu0 %v2874_v30  ;;  %v6494_v62 = vpop.permute.xlu1 %1951  ;;  %5522 = vrcp.f32 %v1062_v3  ;;  %v1046_v52 = vadd.f32 1.0, %v5495_v37  ;;  %v4392_v37 = vmul.f32 -1.442695, %v368_v1 }
 0x104   : > { %v5499_v0 = vpop.eup %5498  ;;  %v6496_v47 = vpop.permute.xlu0 %1946  ;;  %2241 = vperm.xlu1 %4887, %v6442_v44   ;;  %5524 = vrcp.f32 %v1047_v33  ;;  %v1061_v22 = vadd.f32 1.0, %v5497_v13 }
 0x105   : > { %v5501_v5 = vpop.eup %5500  ;;  %2236 = vperm.xlu0 %4886, %v6446_v49   ;;  %5526 = vrcp.f32 %v1046_v52  ;;  %v1060_v12 = vadd.f32 1.0, %v5499_v0  ;;  %v4377_v52 = vmul.f32 -1.442695, %v353_v31  ;;  %v334_v0 = vld [vmem:[%s7790_s0 + $0x4e0] sm:$0xff]  ;;  %v4375_v31 = vmul.f32 -1.442695, %v351_v10 }
 0x106   : > { %v5503_v45 = vpop.eup %5502  ;;  %4507 = vmatpush3.bf16.msra.mxu0 %v2866_v46  ;;  %5528 = vrcp.f32 %v1061_v22  ;;  %v1045_v11 = vadd.f32 1.0, %v5501_v5  ;;  %v4376_v22 = vmul.f32 -1.442695, %v352_v63  ;;  %v4359_v5 = vmul.f32 -1.442695, %v335_v41 }
 0x107   : > { %v5505_v42 = vpop.eup %5504  ;;  %v6505_v6 = vpop.permute.xlu1 %1961  ;;  %5530 = vrcp.f32 %v1060_v12  ;;  %v1044_v44 = vadd.f32 1.0, %v5503_v45  ;;  %v318_v12 = vld [vmem:[%s7790_s0 + $0x460] sm:$0xff] }
 0x108   : > { %v5507_v27 = vpop.eup %5506  ;;  %v6510_v40 = vpop.permute.xlu0 %1956  ;;  %2151 = vperm.xlu1 %4887, %v6455_v59   ;;  %5532 = vrcp.f32 %v1045_v11  ;;  %v1059_v49 = vadd.f32 1.0, %v5505_v42  ;;  %v320_v59 = vld [vmem:[%s7790_s0 + $0x470] sm:$0xff]  ;;  %v4358_v11 = vmul.f32 -1.442695, %v334_v0  ;;  %v367_v42 = vld [vmem:[%s7790_s0 + $0x5e8] sm:$0xff] }
 0x109   : > { %v5509_v48 = vpop.eup %5508  ;;  %2146 = vperm.xlu0 %4886, %v6462_v23   ;;  %5534 = vrcp.f32 %v1044_v44  ;;  %v1058_v51 = vadd.f32 1.0, %v5507_v27  ;;  %3571 = vmatmul.mubr.bf16.vlgmr.msra.gmra.mxu0 %v4888_v34  ;;  %v4344_v20 = vmul.f32 -1.442695, %v320_v59  ;;  %v366_v44 = vld [vmem:[%s7790_s0 + $0x5e0] sm:$0xff] }
 0x10a   : > { %v5511_v36 = vpop.eup %5510  ;;  %5536 = vrcp.f32 %v1059_v49  ;;  %v1043_v14 = vadd.f32 1.0, %v5509_v48  ;;  %3578 = vmatprep.mubr.bf16.mxu0 %v4894_v7  ;;  %v4343_v49 = vmul.f32 -1.442695, %v319_v61  ;;  %v4902_v48 = vld [vmem:[%s6229_s16 + $0xc0] ss:$48 sps:$4 sm:$0xff]  }
 0x10b   : > { %v5513_v23 = vpop.eup %5512  ;;  %v6523_v8 = vpop.permute.xlu1 %1971  ;;  %5538 = vrcp.f32 %v1058_v51  ;;  %v1042_v53 = vadd.f32 1.0, %v5511_v36  ;;  %v4906_v59 = vld [vmem:[%s6229_s16 + $0x124] ss:$48 sps:$4 sm:$0xff]   ;;  %v4908_v41 = vld [vmem:[%s6229_s16 + $0x120] ss:$48 sps:$4 sm:$0xff]  }
 0x10c   : > { %v5515_v15 = vpop.eup %5514  ;;  %v6531_v26 = vpop.permute.xlu0 %1966  ;;  %2311 = vperm.xlu1 %4887, %v5513_v23   ;;  %5540 = vrcp.f32 %v1043_v14  ;;  %v4391_v14 = vmul.f32 -1.442695, %v367_v42  ;;  %v4912_v0 = vld [vmem:[%s6229_s16 + $0x184] ss:$48 sps:$4 sm:$0xff]  }
 0x10d   : > { %v5517_v18 = vpop.eup %5516  ;;  %2306 = vperm.xlu0 %4886, %v5515_v15   ;;  %5542 = vrcp.f32 %v1042_v53  ;;  %v4390_v53 = vmul.f32 -1.442695, %v366_v44 }
 0x10e   : > { %v5519_v57 = vpop.eup %5518  ;;  %5544 = vpow2.f32 %v4361_v54  ;;  %v4342_v54 = vmul.f32 -1.442695, %v318_v12  ;;  %v1569_v12 = vld [vmem:[%s7791_s1 + $0x178] sm:$0xff] }
 0x10f   : > { %v5521_v30 = vpop.eup %5520  ;;  %v6538_v3 = vpop.permute.xlu1 %1981  ;;  %5546 = vpow2.f32 %v4360_v60  ;;  %v350_v60 = vld [vmem:[%s7790_s0 + $0x560] sm:$0xff] }
 0x110   : > { %v5523_v33 = vpop.eup %5522  ;;  %v6543_v13 = vpop.permute.xlu0 %1976  ;;  %2231 = vperm.xlu1 %4887, %v5517_v18   ;;  %5548 = vpow2.f32 %v4345_v4  ;;  %v4374_v63 = vmul.f32 -1.442695, %v350_v60 }
 0x111   : > { %v5525_v46 = vpop.eup %5524  ;;  %2226 = vperm.xlu0 %4886, %v5519_v57   ;;  %5550 = vpow2.f32 %v4344_v20  ;;  %3579 = vmatmul.mubr.bf16.gmra.mxu0 %v4896_v35 }
 0x112   : > { %v5527_v34 = vpop.eup %5526  ;;  %5552 = vpow2.f32 %v4393_v29  ;;  %3586 = vmatprep.mubr.bf16.mxu0 %v4900_v56 }
 0x113   : > { %v5529_v7 = vpop.eup %5528  ;;  %v6554_v45 = vpop.permute.xlu1 %1991  ;;  %5554 = vpow2.f32 %v4392_v37 }
 0x114   : > { %v5531_v43 = vpop.eup %5530  ;;  %v6562_v27 = vpop.permute.xlu0 %1986  ;;  %2301 = vperm.xlu1 %4887, %v5521_v30   ;;  %5556 = vpow2.f32 %v4377_v52 }
 0x115   : > { %v5533_v51 = vpop.eup %5532  ;;  %2296 = vperm.xlu0 %4886, %v5523_v33   ;;  %5558 = vpow2.f32 %v4376_v22 }
 0x116   : > { %v5535_v36 = vpop.eup %5534  ;;  %5560 = vpow2.f32 %v4359_v5 }
 0x117   : > { %v6572_v17 = vpop.eup %5536  ;;  %v6574_v23 = vpop.permute.xlu1 %2001  ;;  %5562 = vpow2.f32 %v4358_v11 }
 0x118   : > { %v6576_v4 = vpop.eup %5538  ;;  %v6578_v1 = vpop.permute.xlu0 %1996  ;;  %2221 = vperm.xlu1 %4887, %v5525_v46   ;;  %5564 = vpow2.f32 %v4343_v49  ;;  %v1585_v49 = vld [vmem:[%s7791_s1 + $0x1f8] sm:$0xff] }
 0x119   : > { %v6580_v15 = vpop.eup %5540  ;;  %2216 = vperm.xlu0 %4886, %v5527_v34   ;;  %5566 = vpow2.f32 %v4342_v54  ;;  %3587 = vmatmul.mubr.bf16.gmra.mxu0 %v4902_v48  ;;  %v333_v34 = vld [vmem:[%s7790_s0 + $0x4d8] sm:$0xff]  ;;  %v1584_v54 = vld [vmem:[%s7791_s1 + $0x1f0] sm:$0xff] }
 0x11a   : > { %v6582_v35 = vpop.eup %5542  ;;  %5568 = vpow2.f32 %v4391_v14  ;;  %3594 = vmatprep.mubr.bf16.mxu0 %v4906_v59  ;;  %v6611_v60 = vmul.f32 -1.442695, %v333_v34  ;;  %v1567_v59 = vld [vmem:[%s7791_s1 + $0x168] sm:$0xff] }
 0x11b   : > { %v5545_v56 = vpop.eup %5544  ;;  %v6584_v18 = vpop.permute.xlu1 %2011  ;;  %5570 = vpow2.f32 %v4390_v53  ;;  %v2721_v53 = vmul.f32 %v6494_v62, %v1569_v12  ;;  %v6630_v34 = vmul.f32 %v6486_v19, %v1567_v59  ;;  %v317_v19 = vld [vmem:[%s7790_s0 + $0x458] sm:$0xff] }
 0x11c   : > { %v5547_v20 = vpop.eup %5546  ;;  %v6586_v57 = vpop.permute.xlu0 %2006  ;;  %2291 = vperm.xlu1 %4887, %v5529_v7   ;;  %v1105_v29 = vadd.f32 1.0, %v5545_v56  ;;  %5572 = vpow2.f32 %v4375_v31  ;;  %v1568_v7 = vld [vmem:[%s7791_s1 + $0x170] sm:$0xff] }
 0x11d   : > { %v5549_v30 = vpop.eup %5548  ;;  %2286 = vperm.xlu0 %4886, %v5531_v43   ;;  %v1104_v37 = vadd.f32 1.0, %v5547_v20  ;;  %5574 = vpow2.f32 %v4374_v63  ;;  %v1583_v43 = vld [vmem:[%s7791_s1 + $0x1e8] sm:$0xff]  ;;  %v2720_v31 = vmul.f32 %v6496_v47, %v1568_v7  ;;  %v332_v20 = vld [vmem:[%s7790_s0 + $0x4d0] sm:$0xff] }
 0x11e   : > { %v5551_v33 = vpop.eup %5550  ;;  %5576 = vrcp.f32 %v1105_v29  ;;  %v1089_v52 = vadd.f32 1.0, %v5549_v30  ;;  %v1566_v30 = vld [vmem:[%s7791_s1 + $0x160] sm:$0xff]  ;;  %v6635_v12 = vmul.f32 -1.442695, %v332_v20 }
 0x11f   : > { %v5553_v46 = vpop.eup %5552  ;;  %v2022_v22 = vpop.permute.xlu1 %2021  ;;  %5578 = vrcp.f32 %v1104_v37  ;;  %v1088_v61 = vadd.f32 1.0, %v5551_v33  ;;  %v4914_v7 = vld [vmem:[%s6229_s16 + $0x180] ss:$48 sps:$4 sm:$0xff]  }
 0x120   : > { %v5555_v5 = vpop.eup %5554  ;;  %v2017_v11 = vpop.permute.xlu0 %2016  ;;  %2211 = vperm.xlu1 %4887, %v5533_v51   ;;  %5580 = vrcp.f32 %v1089_v52  ;;  %v1137_v42 = vadd.f32 1.0, %v5553_v46  ;;  %v1582_v51 = vld [vmem:[%s7791_s1 + $0x1e0] sm:$0xff]  ;;  %v2735_v37 = vmul.f32 %v2022_v22, %v1583_v43  ;;  %v1581_v52 = vld [vmem:[%s7791_s1 + $0x1d8] sm:$0xff] }
 0x121   : > { %v5557_v44 = vpop.eup %5556  ;;  %2206 = vperm.xlu0 %4886, %v5535_v36   ;;  %5582 = vrcp.f32 %v1088_v61  ;;  %v1136_v10 = vadd.f32 1.0, %v5555_v5  ;;  %3595 = vmatmul.mubr.bf16.gmra.mxu0 %v4908_v41 }
 0x122   : > { %v5559_v48 = vpop.eup %5558  ;;  %5584 = vrcp.f32 %v1137_v42  ;;  %v1121_v14 = vadd.f32 1.0, %v5557_v44  ;;  %3602 = vmatprep.mubr.bf16.mxu0 %v4912_v0  ;;  %v2734_v0 = vmul.f32 %v2017_v11, %v1582_v51  ;;  %v2718_v42 = vmul.f32 %v6489_v28, %v1566_v30 }
 0x123   : > { %v5561_v36 = vpop.eup %5560  ;;  %v2032_v63 = vpop.permute.xlu1 %2031  ;;  %5586 = vrcp.f32 %v1136_v10  ;;  %v1120_v56 = vadd.f32 1.0, %v5559_v48  ;;  %v4918_v10 = vld [vmem:[%s6229_s16 + $0x1e4] ss:$48 sps:$4 sm:$0xff]   ;;  %v2733_v51 = vmul.f32 %v6584_v18, %v1581_v52  ;;  %v2889_v28 = vpack.c.bf16 %v2721_v53, %v2720_v31  ;;  %v349_v52 = vld [vmem:[%s7790_s0 + $0x558] sm:$0xff] }
 0x124   : > { %v5563_v29 = vpop.eup %5562  ;;  %v2737_v41 = vmul.f32 %v2032_v63, %v1585_v49  ;;  %v2027_v33 = vpop.permute.xlu0 %2026  ;;  %2281 = vperm.xlu1 %4887, %v6572_v17   ;;  %5588 = vrcp.f32 %v1121_v14  ;;  %v1103_v62 = vadd.f32 1.0, %v5561_v36  ;;  %v1580_v17 = vld [vmem:[%s7791_s1 + $0x1d0] sm:$0xff]  ;;  %v365_v36 = vld [vmem:[%s7790_s0 + $0x5d8] sm:$0xff]  ;;  %v2896_v31 = vpack.c.bf16 %v2735_v37, %v2734_v0 }
 0x125   : > { %v5565_v47 = vpop.eup %5564  ;;  %v2736_v46 = vmul.f32 %v2027_v33, %v1584_v54  ;;  %2276 = vperm.xlu0 %4886, %v6576_v4   ;;  %5590 = vrcp.f32 %v1120_v56  ;;  %v1102_v61 = vadd.f32 1.0, %v5563_v29  ;;  %v316_v49 = vld [vmem:[%s7790_s0 + $0x450] sm:$0xff]  ;;  %v1565_v63 = vld [vmem:[%s7791_s1 + $0x158] sm:$0xff]  ;;  %v2732_v53 = vmul.f32 %v6586_v57, %v1580_v17  ;;  %v1578_v29 = vld [vmem:[%s7791_s1 + $0x1c0] sm:$0xff] }
 0x126   : > { %v5567_v22 = vpop.eup %5566  ;;  %5592 = vrcp.f32 %v1103_v62  ;;  %v1087_v5 = vadd.f32 1.0, %v5565_v47  ;;  %v1564_v18 = vld [vmem:[%s7791_s1 + $0x150] sm:$0xff]  ;;  %v4340_v33 = vmul.f32 -1.442695, %v316_v49  ;;  %v4389_v37 = vmul.f32 -1.442695, %v365_v36 }
 0x127   : > { %v5569_v11 = vpop.eup %5568  ;;  %v6639_v4 = vpop.permute.xlu1 %2041  ;;  %v2897_v44 = vpack.c.bf16 %v2737_v41, %v2736_v46  ;;  %5594 = vrcp.f32 %v1102_v61  ;;  %v1086_v43 = vadd.f32 1.0, %v5567_v22  ;;  %v4341_v41 = vmul.f32 -1.442695, %v317_v19  ;;  %v364_v47 = vld [vmem:[%s7790_s0 + $0x5d0] sm:$0xff]  ;;  %v1563_v46 = vld [vmem:[%s7791_s1 + $0x148] sm:$0xff] }
 0x128   : > { %v5571_v48 = vpop.eup %5570  ;;  %v6649_v54 = vpop.permute.xlu0 %2036  ;;  %2201 = vperm.xlu1 %4887, %v6580_v15   ;;  %5596 = vrcp.f32 %v1087_v5  ;;  %v1135_v14 = vadd.f32 1.0, %v5569_v11  ;;  %v1579_v15 = vld [vmem:[%s7791_s1 + $0x1c8] sm:$0xff]  ;;  %v2717_v61 = vmul.f32 %v6471_v55, %v1565_v63  ;;  %v2716_v22 = vmul.f32 %v6474_v16, %v1564_v18  ;;  %v1577_v55 = vld [vmem:[%s7791_s1 + $0x1b8] sm:$0xff]  ;;  %v1576_v16 = vld [vmem:[%s7791_s1 + $0x1b0] sm:$0xff] }
 0x129   : > { %v5573_v59 = vpop.eup %5572  ;;  %2196 = vperm.xlu0 %4886, %v6582_v35   ;;  %4556 = vmatprep.subr.bf16.mxu1 %v2897_v44  ;;  %5598 = vrcp.f32 %v1086_v43  ;;  %v1134_v56 = vadd.f32 1.0, %v5571_v48  ;;  %v2888_v17 = vpack.c.bf16 %v6630_v34, %v2718_v42  ;;  %v1562_v44 = vld [vmem:[%s7791_s1 + $0x140] sm:$0xff]  ;;  %v2731_v34 = vmul.f32 %v6574_v23, %v1579_v15 }
 0x12a   : > { %v5575_v20 = vpop.eup %5574  ;;  %4557 = vmatpush3.bf16.msra.mxu1 %v2889_v28  ;;  %5600 = vrcp.f32 %v1135_v14  ;;  %v1119_v30 = vadd.f32 1.0, %v5573_v59  ;;  %3603 = vmatmul.mubr.bf16.gmra.mxu0 %v4914_v7  ;;  %v348_v7 = vld [vmem:[%s7790_s0 + $0x550] sm:$0xff]  ;;  %v2730_v42 = vmul.f32 %v6578_v1, %v1578_v29  ;;  %v2895_v43 = vpack.c.bf16 %v2733_v51, %v2732_v53  ;;  %v331_v1 = vld [vmem:[%s7790_s0 + $0x4c8] sm:$0xff]  ;;  %v330_v51 = vld [vmem:[%s7790_s0 + $0x4c0] sm:$0xff] }
 0x12b   : > { %v5577_v62 = vpop.eup %5576  ;;  %4558 = vmatprep.subr.bf16.mxu1 %v2896_v31  ;;  %v6669_v57 = vpop.permute.xlu1 %2051  ;;  %5602 = vrcp.f32 %v1134_v56  ;;  %v1118_v35 = vadd.f32 1.0, %v5575_v20  ;;  %3610 = vmatprep.mubr.bf16.mxu0 %v4918_v10  ;;  %v4388_v49 = vmul.f32 -1.442695, %v364_v47  ;;  %v4373_v10 = vmul.f32 -1.442695, %v349_v52  ;;  %v314_v53 = vld [vmem:[%s7790_s0 + $0x440] sm:$0xff] }
 0x12c   : > { %v5579_v0 = vpop.eup %5578  ;;  %v6683_v5 = vpop.permute.xlu0 %2046  ;;  %2511 = vperm.xlu1 %4887, %v5577_v62   ;;  %5604 = vrcp.f32 %v1119_v30  ;;  %v4920_v48 = vld [vmem:[%s6229_s16 + $0x1e0] ss:$48 sps:$4 sm:$0xff]   ;;  %v4372_v23 = vmul.f32 -1.442695, %v348_v7  ;;  %v4924_v36 = vld [vmem:[%s6229_s16 + $0x244] ss:$48 sps:$4 sm:$0xff]   ;;  %v2715_v59 = vmul.f32 %v6444_v24, %v1563_v46  ;;  %v2714_v63 = vmul.f32 %v6453_v50, %v1562_v44 }
 0x12d   : > { %v5581_v11 = vpop.eup %5580  ;;  %2506 = vperm.xlu0 %4886, %v5579_v0   ;;  %5606 = vrcp.f32 %v1118_v35  ;;  %v2887_v18 = vpack.c.bf16 %v2717_v61, %v2716_v22  ;;  %v1561_v24 = vld [vmem:[%s7791_s1 + $0x138] sm:$0xff]  ;;  %v1560_v50 = vld [vmem:[%s7791_s1 + $0x130] sm:$0xff]  ;;  %v2729_v56 = vmul.f32 %v6554_v45, %v1577_v55  ;;  %v2728_v20 = vmul.f32 %v6562_v27, %v1576_v16  ;;  %v1574_v62 = vld [vmem:[%s7791_s1 + $0x1a0] sm:$0xff] }
 0x12e   : > { %v5583_v19 = vpop.eup %5582  ;;  %4559 = vmatpush3.bf16.msra.mxu1 %v2888_v17  ;;  %5608 = vpow2.f32 %v6611_v60  ;;  %v2894_v29 = vpack.c.bf16 %v2731_v34, %v2730_v42  ;;  %v4355_v35 = vmul.f32 -1.442695, %v331_v1  ;;  %v4354_v47 = vmul.f32 -1.442695, %v330_v51  ;;  %v363_v0 = vld [vmem:[%s7790_s0 + $0x5c8] sm:$0xff]  ;;  %v362_v46 = vld [vmem:[%s7790_s0 + $0x5c0] sm:$0xff] }
 0x12f   : > { %v5585_v28 = vpop.eup %5584  ;;  %4560 = vmatprep.subr.bf16.mxu1 %v2895_v43  ;;  %v6701_v14 = vpop.permute.xlu1 %2061  ;;  %5610 = vpow2.f32 %v6635_v12  ;;  %v315_v12 = vld [vmem:[%s7790_s0 + $0x448] sm:$0xff]  ;;  %v4338_v52 = vmul.f32 -1.442695, %v314_v53  ;;  %v2713_v22 = vmul.f32 %v6411_v32, %v1561_v24  ;;  %v2712_v17 = vmul.f32 %v6424_v39, %v1560_v50  ;;  %v346_v55 = vld [vmem:[%s7790_s0 + $0x540] sm:$0xff]  ;;  %v1573_v39 = vld [vmem:[%s7791_s1 + $0x198] sm:$0xff] }
 0x130   : > { %v5587_v60 = vpop.eup %5586  ;;  %v6713_v15 = vpop.permute.xlu0 %2056  ;;  %2431 = vperm.xlu1 %4887, %v5581_v11   ;;  %5612 = vpow2.f32 %v4341_v41  ;;  %v1575_v41 = vld [vmem:[%s7791_s1 + $0x1a8] sm:$0xff]  ;;  %v2886_v7 = vpack.c.bf16 %v2715_v59, %v2714_v63  ;;  %v1558_v32 = vld [vmem:[%s7791_s1 + $0x120] sm:$0xff]  ;;  %v1572_v34 = vld [vmem:[%s7791_s1 + $0x190] sm:$0xff]  ;;  %v2726_v43 = vmul.f32 %v6543_v13, %v1574_v62 }
 0x131   : > { %v6721_v31 = vpop.eup %5588  ;;  %2426 = vperm.xlu0 %4886, %v5583_v19   ;;  %5614 = vpow2.f32 %v4340_v33  ;;  %v4339_v33 = vmul.f32 -1.442695, %v315_v12  ;;  %v1559_v61 = vld [vmem:[%s7791_s1 + $0x128] sm:$0xff]  ;;  %v2727_v42 = vmul.f32 %v6538_v3, %v1575_v41  ;;  %v2893_v19 = vpack.c.bf16 %v2729_v56, %v2728_v20  ;;  %v4930_v13 = vld [vmem:[%s6229_s16 + $0x2a4] ss:$48 sps:$4 sm:$0xff]  }
 0x132   : > { %v6731_v30 = vpop.eup %5590  ;;  %4561 = vmatpush3.bf16.msra.mxu1 %v2887_v18  ;;  %5616 = vpow2.f32 %v4389_v37  ;;  %3611 = vmatmul.mubr.bf16.gmra.mxu0 %v4920_v48  ;;  %v347_v44 = vld [vmem:[%s7790_s0 + $0x548] sm:$0xff]  ;;  %v4386_v48 = vmul.f32 -1.442695, %v362_v46  ;;  %v2711_v63 = vmul.f32 %v6370_v38, %v1559_v61  ;;  %v2710_v18 = vmul.f32 %v6381_v9, %v1558_v32  ;;  %v1570_v9 = vld [vmem:[%s7791_s1 + $0x180] sm:$0xff] }
 0x133   : > { %v6739_v45 = vpop.eup %5592  ;;  %4562 = vmatprep.subr.bf16.mxu1 %v2894_v29  ;;  %v6741_v27 = vpop.permute.xlu1 %2071  ;;  %5618 = vpow2.f32 %v4388_v49  ;;  %3618 = vmatprep.mubr.bf16.mxu0 %v4924_v36  ;;  %v4371_v3 = vmul.f32 -1.442695, %v347_v44  ;;  %v4370_v36 = vmul.f32 -1.442695, %v346_v55  ;;  %v2885_v12 = vpack.c.bf16 %v2713_v22, %v2712_v17  ;;  %v1571_v50 = vld [vmem:[%s7791_s1 + $0x188] sm:$0xff] }
 0x134   : > { %v6749_v37 = vpop.eup %5594  ;;  %v6756_v11 = vpop.permute.xlu0 %2066  ;;  %2671 = vperm.xlu1 %4887, %v5585_v28   ;;  %5620 = vpow2.f32 %v4373_v10  ;;  %v4387_v10 = vmul.f32 -1.442695, %v363_v0  ;;  %v4926_v28 = vld [vmem:[%s6229_s16 + $0x240] ss:$48 sps:$4 sm:$0xff]   ;;  %v2725_v56 = vmul.f32 %v6523_v8, %v1573_v39  ;;  %v2724_v20 = vmul.f32 %v6531_v26, %v1572_v34  ;;  %v1555_v62 = vld [vmem:[%s7791_s1 + $0x108] sm:$0xff] }
 0x135   : > { %v6764_v16 = vpop.eup %5596  ;;  %2666 = vperm.xlu0 %4886, %v5587_v60   ;;  %5622 = vpow2.f32 %v4372_v23  ;;  %v1557_v23 = vld [vmem:[%s7791_s1 + $0x118] sm:$0xff]  ;;  %v1556_v60 = vld [vmem:[%s7791_s1 + $0x110] sm:$0xff]  ;;  %v2892_v29 = vpack.c.bf16 %v2727_v42, %v2726_v43  ;;  %v2722_v0 = vmul.f32 %v6510_v40, %v1570_v9 }
 0x136   : > { %v6777_v49 = vpop.eup %5598  ;;  %4563 = vmatpush3.bf16.msra.mxu1 %v2886_v7  ;;  %5624 = vpow2.f32 %v4355_v35  ;;  %v2709_v41 = vmul.f32 %v6344_v58, %v1557_v23  ;;  %v2708_v8 = vmul.f32 %v6359_v21, %v1556_v60  ;;  %v2884_v35 = vpack.c.bf16 %v2711_v63, %v2710_v18  ;;  %v4938_v40 = vld [vmem:[%s6229_s16 + $0x14] ss:$48 sps:$4 sm:$0xff]   ;;  %v4891_v63 = vld [vmem:[%s6229_s16 + $0x8] ss:$48 sps:$4 sm:$0xff]  }
 0x137   : > { %v6780_v1 = vpop.eup %5600  ;;  %4564 = vmatprep.subr.bf16.mxu1 %v2893_v19  ;;  %v6782_v51 = vpop.permute.xlu1 %2081  ;;  %5626 = vpow2.f32 %v4354_v47  ;;  %v2723_v47 = vmul.f32 %v6505_v6, %v1571_v50  ;;  %v2891_v46 = vpack.c.bf16 %v2725_v56, %v2724_v20  ;;  %v2707_v7 = vmul.f32 %v6316_v25, %v1555_v62  ;;  %v4897_v50 = vld [vmem:[%s6229_s16 + $0x6c] ss:$48 sps:$4 sm:$0xff]  }
 0x138   : > { %v6785_v59 = vpop.eup %5602  ;;  %v6795_v53 = vpop.permute.xlu0 %2076  ;;  %2591 = vperm.xlu1 %4887, %v6721_v31   ;;  %5628 = vpow2.f32 %v4339_v33  ;;  %v313_v62 = vld [vmem:[%s7790_s0 + $0x438] sm:$0xff] }
 0x139   : > { %v6798_v24 = vpop.eup %5604  ;;  %2586 = vperm.xlu0 %4886, %v6731_v30   ;;  %5630 = vpow2.f32 %v4338_v52  ;;  %v1554_v52 = vld [vmem:[%s7791_s1 + $0x100] sm:$0xff]  ;;  %v2890_v19 = vpack.c.bf16 %v2723_v47, %v2722_v0 }
 0x13a   : > { %v6806_v38 = vpop.eup %5606  ;;  %4565 = vmatpush3.bf16.msra.mxu1 %v2885_v12  ;;  %5632 = vpow2.f32 %v4387_v10  ;;  %3619 = vmatmul.mubr.bf16.gmra.mxu0 %v4926_v28  ;;  %v2706_v39 = vmul.f32 %v6328_v2, %v1554_v52 }
 0x13b   : > { %v5609_v31 = vpop.eup %5608  ;;  %4566 = vmatprep.subr.bf16.mxu1 %v2892_v29  ;;  %v6813_v26 = vpop.permute.xlu1 %2091  ;;  %5634 = vpow2.f32 %v4386_v48  ;;  %3626 = vmatprep.mubr.bf16.mxu0 %v4930_v13 }
 0x13c   : > { %v5611_v30 = vpop.eup %5610  ;;  %v6819_v33 = vpop.permute.xlu0 %2086  ;;  %2501 = vperm.xlu1 %4887, %v6739_v45   ;;  %v1101_v58 = vadd.f32 1.0, %v5609_v31  ;;  %5636 = vpow2.f32 %v4371_v3  ;;  %v4932_v45 = vld [vmem:[%s6229_s16 + $0x2a0] ss:$48 sps:$4 sm:$0xff]  }
 0x13d   : > { %v5613_v21 = vpop.eup %5612  ;;  %2496 = vperm.xlu0 %4886, %v6749_v37   ;;  %v1100_v61 = vadd.f32 1.0, %v5611_v30  ;;  %5638 = vpow2.f32 %v4370_v36  ;;  %v2883_v37 = vpack.c.bf16 %v2709_v41, %v2708_v8  ;;  %v2882_v36 = vpack.c.bf16 %v2707_v7, %v2706_v39  ;;  %v328_v41 = vld [vmem:[%s7790_s0 + $0x4b0] sm:$0xff] }
 0x13e   : > { %v5615_v6 = vpop.eup %5614  ;;  %4567 = vmatpush3.bf16.msra.mxu1 %v2884_v35  ;;  %5640 = vrcp.f32 %v1101_v58  ;;  %v1085_v22 = vadd.f32 1.0, %v5613_v21  ;;  %v312_v58 = vld [vmem:[%s7790_s0 + $0x430] sm:$0xff]  ;;  %v4352_v0 = vmul.f32 -1.442695, %v328_v41 }
 0x13f   : > { %v5617_v17 = vpop.eup %5616  ;;  %4568 = vmatprep.subr.bf16.mxu1 %v2891_v46  ;;  %v6829_v44 = vpop.permute.xlu1 %2101  ;;  %5642 = vrcp.f32 %v1100_v61  ;;  %v1084_v55 = vadd.f32 1.0, %v5615_v6  ;;  %v361_v46 = vld [vmem:[%s7790_s0 + $0x5b8] sm:$0xff]  ;;  %v4336_v7 = vmul.f32 -1.442695, %v312_v58  ;;  %v358_v58 = vld [vmem:[%s7790_s0 + $0x5a0] sm:$0xff] }
 0x140   : > { %v5619_v32 = vpop.eup %5618  ;;  %v6833_v34 = vpop.permute.xlu0 %2096  ;;  %2421 = vperm.xlu1 %4887, %v6764_v16   ;;  %5644 = vrcp.f32 %v1085_v22  ;;  %v1133_v42 = vadd.f32 1.0, %v5617_v17  ;;  %v4337_v22 = vmul.f32 -1.442695, %v313_v62  ;;  %v4385_v39 = vmul.f32 -1.442695, %v361_v46  ;;  %v1648_v46 = vld [vmem:[%s7791_s1 + $0x3f0] sm:$0xff] }
 0x141   : > { %v5621_v43 = vpop.eup %5620  ;;  %2416 = vperm.xlu0 %4886, %v6777_v49   ;;  %5646 = vrcp.f32 %v1084_v55  ;;  %v1132_v25 = vadd.f32 1.0, %v5619_v32  ;;  %v4899_v55 = vld [vmem:[%s6229_s16 + $0x68] ss:$48 sps:$4 sm:$0xff]  }
 0x142   : > { %v5623_v10 = vpop.eup %5622  ;;  %4569 = vmatpush3.bf16.msra.mxu1 %v2883_v37  ;;  %5648 = vrcp.f32 %v1133_v42  ;;  %v1117_v48 = vadd.f32 1.0, %v5621_v43  ;;  %3627 = vmatmul.mubr.bf16.gmra.mxu0 %v4932_v45  ;;  %v360_v45 = vld [vmem:[%s7790_s0 + $0x5b0] sm:$0xff]  ;;  %v4903_v42 = vld [vmem:[%s6229_s16 + $0xcc] ss:$48 sps:$4 sm:$0xff]  }
 0x143   : > { %v5625_v28 = vpop.eup %5624  ;;  %4570 = vmatprep.subr.bf16.mxu1 %v2890_v19  ;;  %v6837_v2 = vpop.permute.xlu1 %2111  ;;  %5650 = vrcp.f32 %v1132_v25  ;;  %v1116_v16 = vadd.f32 1.0, %v5623_v10  ;;  %3764 = vmatprep.mubr.bf16.mxu0 %v4938_v40  ;;  %v345_v40 = vld [vmem:[%s7790_s0 + $0x538] sm:$0xff]  ;;  %v344_v37 = vld [vmem:[%s7790_s0 + $0x530] sm:$0xff]  ;;  %v4384_v25 = vmul.f32 -1.442695, %v360_v45  ;;  %v327_v10 = vld [vmem:[%s7790_s0 + $0x4a8] sm:$0xff] }
 0x144   : > { %v5627_v3 = vpop.eup %5626  ;;  %v6839_v13 = vpop.permute.xlu0 %2106  ;;  %2661 = vperm.xlu1 %4887, %v6780_v1   ;;  %5652 = vrcp.f32 %v1117_v48  ;;  %v1099_v49 = vadd.f32 1.0, %v5625_v28  ;;  %v329_v1 = vld [vmem:[%s7790_s0 + $0x4b8] sm:$0xff] }
 0x145   : > { %v5629_v23 = vpop.eup %5628  ;;  %2656 = vperm.xlu0 %4886, %v6785_v59   ;;  %5654 = vrcp.f32 %v1116_v16  ;;  %v1098_v60 = vadd.f32 1.0, %v5627_v3  ;;  %v4369_v16 = vmul.f32 -1.442695, %v345_v40  ;;  %v326_v3 = vld [vmem:[%s7790_s0 + $0x4a0] sm:$0xff]  ;;  %v4382_v40 = vmul.f32 -1.442695, %v358_v58 }
 0x146   : > { %v5631_v18 = vpop.eup %5630  ;;  %4571 = vmatpush3.bf16.msra.mxu1 %v2882_v36  ;;  %5656 = vrcp.f32 %v1099_v49  ;;  %v1083_v12 = vadd.f32 1.0, %v5629_v23  ;;  %v311_v36 = vld [vmem:[%s7790_s0 + $0x428] sm:$0xff]  ;;  %v1601_v23 = vld [vmem:[%s7791_s1 + $0x278] sm:$0xff] }
 0x147   : > { %v5633_v56 = vpop.eup %5632  ;;  %v6845_v20 = vpop.permute.xlu1 %2121  ;;  %5658 = vrcp.f32 %v1098_v60  ;;  %v1082_v29 = vadd.f32 1.0, %v5631_v18  ;;  %v1600_v60 = vld [vmem:[%s7791_s1 + $0x270] sm:$0xff]  ;;  %v4368_v18 = vmul.f32 -1.442695, %v344_v37  ;;  %v4335_v41 = vmul.f32 -1.442695, %v311_v36 }
 0x148   : > { %v5635_v9 = vpop.eup %5634  ;;  %v6850_v31 = vpop.permute.xlu0 %2116  ;;  %2581 = vperm.xlu1 %4887, %v6798_v24   ;;  %5660 = vrcp.f32 %v1083_v12  ;;  %v1131_v59 = vadd.f32 1.0, %v5633_v56  ;;  %v4353_v24 = vmul.f32 -1.442695, %v329_v1  ;;  %v4351_v56 = vmul.f32 -1.442695, %v327_v10  ;;  %v1633_v10 = vld [vmem:[%s7791_s1 + $0x378] sm:$0xff] }
 0x149   : > { %v5637_v8 = vpop.eup %5636  ;;  %2576 = vperm.xlu0 %4886, %v6806_v38   ;;  %5662 = vrcp.f32 %v1082_v29  ;;  %3668 = vmatmul.mubr.bf16.vlgmr.msra.gmra.mxu1 %v4891_v63  ;;  %v1130_v30 = vadd.f32 1.0, %v5635_v9  ;;  %v1617_v63 = vld [vmem:[%s7791_s1 + $0x2f8] sm:$0xff]  ;;  %v310_v29 = vld [vmem:[%s7790_s0 + $0x420] sm:$0xff]  ;;  %v2753_v62 = vmul.f32 %v6837_v2, %v1601_v23 }
 0x14a   : > { %v5639_v35 = vpop.eup %5638  ;;  %5664 = vrcp.f32 %v1131_v59  ;;  %v1115_v47 = vadd.f32 1.0, %v5637_v8  ;;  %3675 = vmatprep.mubr.bf16.mxu1 %v4897_v50  ;;  %v1616_v50 = vld [vmem:[%s7791_s1 + $0x2f0] sm:$0xff]  ;;  %v4350_v59 = vmul.f32 -1.442695, %v326_v3  ;;  %v359_v8 = vld [vmem:[%s7790_s0 + $0x5a8] sm:$0xff]  ;;  %v1649_v2 = vld [vmem:[%s7791_s1 + $0x3f8] sm:$0xff] }
 0x14b   : > { %v5641_v21 = vpop.eup %5640  ;;  %v6863_v52 = vpop.permute.xlu1 %2131  ;;  %5666 = vrcp.f32 %v1130_v30  ;;  %v1114_v38 = vadd.f32 1.0, %v5639_v35  ;;  %v2752_v35 = vmul.f32 %v6839_v13, %v1600_v60  ;;  %v343_v3 = vld [vmem:[%s7790_s0 + $0x528] sm:$0xff]  ;;  %v342_v60 = vld [vmem:[%s7790_s0 + $0x520] sm:$0xff] }
 0x14c   : > { %v5643_v61 = vpop.eup %5642  ;;  %v6868_v6 = vpop.permute.xlu0 %2126  ;;  %2491 = vperm.xlu1 %4887, %v5641_v21   ;;  %5668 = vrcp.f32 %v1115_v47  ;;  %v4366_v58 = vmul.f32 -1.442695, %v342_v60 }
 0x14d   : > { %v5645_v17 = vpop.eup %5644  ;;  %2486 = vperm.xlu0 %4886, %v5643_v61   ;;  %5670 = vrcp.f32 %v1114_v38  ;;  %v4905_v61 = vld [vmem:[%s6229_s16 + $0xc8] ss:$48 sps:$4 sm:$0xff]  }
 0x14e   : > { %v5647_v32 = vpop.eup %5646  ;;  %5672 = vpow2.f32 %v4353_v24 }
 0x14f   : > { %v5649_v43 = vpop.eup %5648  ;;  %v6881_v19 = vpop.permute.xlu1 %2141  ;;  %5674 = vpow2.f32 %v4352_v0  ;;  %v4334_v0 = vmul.f32 -1.442695, %v310_v29 }
 0x150   : > { %v5651_v48 = vpop.eup %5650  ;;  %v6886_v28 = vpop.permute.xlu0 %2136  ;;  %2411 = vperm.xlu1 %4887, %v5645_v17   ;;  %5676 = vpow2.f32 %v4337_v22  ;;  %v4383_v22 = vmul.f32 -1.442695, %v359_v8 }
 0x151   : > { %v5653_v49 = vpop.eup %5652  ;;  %2406 = vperm.xlu0 %4886, %v5647_v32   ;;  %5678 = vpow2.f32 %v4336_v7  ;;  %3676 = vmatmul.mubr.bf16.gmra.mxu1 %v4899_v55  ;;  %v4909_v55 = vld [vmem:[%s6229_s16 + $0x12c] ss:$48 sps:$4 sm:$0xff]  }
 0x152   : > { %v5655_v12 = vpop.eup %5654  ;;  %5680 = vpow2.f32 %v4385_v39  ;;  %3683 = vmatprep.mubr.bf16.mxu1 %v4903_v42  ;;  %v2905_v39 = vpack.c.bf16 %v2753_v62, %v2752_v35  ;;  %v4367_v62 = vmul.f32 -1.442695, %v343_v3 }
 0x153   : > { %v5657_v1 = vpop.eup %5656  ;;  %v2192_v9 = vpop.permute.xlu1 %2191  ;;  %5682 = vpow2.f32 %v4384_v25 }
 0x154   : > { %v5659_v30 = vpop.eup %5658  ;;  %v2769_v47 = vmul.f32 %v2192_v9, %v1617_v63  ;;  %v2187_v24 = vpop.permute.xlu0 %2186  ;;  %2651 = vperm.xlu1 %4887, %v5649_v43   ;;  %5684 = vpow2.f32 %v4369_v16  ;;  %v1632_v16 = vld [vmem:[%s7791_s1 + $0x370] sm:$0xff]  ;;  %v1598_v9 = vld [vmem:[%s7791_s1 + $0x260] sm:$0xff] }
 0x155   : > { %v6917_v21 = vpop.eup %5660  ;;  %v2768_v38 = vmul.f32 %v2187_v24, %v1616_v50  ;;  %2646 = vperm.xlu0 %4886, %v5651_v48   ;;  %5686 = vpow2.f32 %v4368_v18  ;;  %v1599_v18 = vld [vmem:[%s7791_s1 + $0x268] sm:$0xff] }
 0x156   : > { %v6922_v13 = vpop.eup %5662  ;;  %5688 = vpow2.f32 %v4351_v56  ;;  %v4911_v24 = vld [vmem:[%s6229_s16 + $0x128] ss:$48 sps:$4 sm:$0xff]  }
 0x157   : > { %v6928_v45 = vpop.eup %5664  ;;  %v2913_v17 = vpack.c.bf16 %v2769_v47, %v2768_v38  ;;  %v2352_v7 = vpop.permute.xlu1 %2351  ;;  %5690 = vpow2.f32 %v4350_v59 }
 0x158   : > { %v6931_v32 = vpop.eup %5666  ;;  %v2801_v37 = vmul.f32 %v2352_v7, %v1649_v2  ;;  %v2347_v42 = vpop.permute.xlu0 %2346  ;;  %2571 = vperm.xlu1 %4887, %v5653_v49   ;;  %5692 = vpow2.f32 %v4335_v41  ;;  %v1615_v41 = vld [vmem:[%s7791_s1 + $0x2e8] sm:$0xff] }
 0x159   : > { %v6933_v43 = vpop.eup %5668  ;;  %v2800_v25 = vmul.f32 %v2347_v42, %v1648_v46  ;;  %2566 = vperm.xlu0 %4886, %v5655_v12   ;;  %4620 = vmatprep.subr.bf16.mxu0 %v2913_v17  ;;  %5694 = vpow2.f32 %v4334_v0  ;;  %v2750_v17 = vmul.f32 %v6833_v34, %v1598_v9  ;;  %v1646_v34 = vld [vmem:[%s7791_s1 + $0x3e0] sm:$0xff] }
 0x15a   : > { %v6938_v48 = vpop.eup %5670  ;;  %4621 = vmatpush3.bf16.msra.mxu0 %v2905_v39  ;;  %3684 = vmatmul.mubr.bf16.gmra.mxu1 %v4905_v61  ;;  %5696 = vpow2.f32 %v4383_v22  ;;  %v4915_v61 = vld [vmem:[%s6229_s16 + $0x18c] ss:$48 sps:$4 sm:$0xff]  }
 0x15b   : > { %v5673_v36 = vpop.eup %5672  ;;  %v2929_v49 = vpack.c.bf16 %v2801_v37, %v2800_v25  ;;  %v2272_v23 = vpop.permute.xlu1 %2271  ;;  %3691 = vmatprep.mubr.bf16.mxu1 %v4909_v55  ;;  %5698 = vpow2.f32 %v4382_v40 }
 0x15c   : > { %v5675_v63 = vpop.eup %5674  ;;  %v2785_v12 = vmul.f32 %v2272_v23, %v1633_v10  ;;  %v2267_v50 = vpop.permute.xlu0 %2266  ;;  %2481 = vperm.xlu1 %4887, %v5657_v1   ;;  %v1097_v56 = vadd.f32 1.0, %v5673_v36  ;;  %v1614_v1 = vld [vmem:[%s7791_s1 + $0x2e0] sm:$0xff] }
 0x15d   : > { %v5677_v29 = vpop.eup %5676  ;;  %v2784_v59 = vmul.f32 %v2267_v50, %v1632_v16  ;;  %2476 = vperm.xlu0 %4886, %v5659_v30   ;;  %4684 = vmatprep.subr.bf16.mxu1 %v2929_v49  ;;  %v1096_v8 = vadd.f32 1.0, %v5675_v63  ;;  %v2751_v30 = vmul.f32 %v6829_v44, %v1599_v18  ;;  %v1647_v44 = vld [vmem:[%s7791_s1 + $0x3e8] sm:$0xff] }
 0x15e   : > { %v5679_v35 = vpop.eup %5678  ;;  %5700 = vrcp.f32 %v1097_v56  ;;  %v1081_v47 = vadd.f32 1.0, %v5677_v29  ;;  %v1631_v50 = vld [vmem:[%s7791_s1 + $0x368] sm:$0xff] }
 0x15f   : > { %v5681_v38 = vpop.eup %5680  ;;  %v2921_v2 = vpack.c.bf16 %v2785_v12, %v2784_v59  ;;  %v2182_v0 = vpop.permute.xlu1 %2181  ;;  %5702 = vrcp.f32 %v1096_v8  ;;  %v1080_v46 = vadd.f32 1.0, %v5679_v35  ;;  %v2904_v49 = vpack.c.bf16 %v2751_v30, %v2750_v17  ;;  %v4917_v59 = vld [vmem:[%s6229_s16 + $0x188] ss:$48 sps:$4 sm:$0xff]   ;;  %v324_v30 = vld [vmem:[%s7790_s0 + $0x490] sm:$0xff] }
 0x160   : > { %v5683_v22 = vpop.eup %5682  ;;  %v2767_v7 = vmul.f32 %v2182_v0, %v1615_v41  ;;  %v2177_v55 = vpop.permute.xlu0 %2176  ;;  %2401 = vperm.xlu1 %4887, %v6917_v21   ;;  %5704 = vrcp.f32 %v1081_v47  ;;  %v1129_v40 = vadd.f32 1.0, %v5681_v38  ;;  %v325_v35 = vld [vmem:[%s7790_s0 + $0x498] sm:$0xff]  ;;  %v1612_v17 = vld [vmem:[%s7791_s1 + $0x2d0] sm:$0xff] }
 0x161   : > { %v5685_v39 = vpop.eup %5684  ;;  %v2766_v37 = vmul.f32 %v2177_v55, %v1614_v1  ;;  %2396 = vperm.xlu0 %4886, %v6922_v13   ;;  %4685 = vmatpush3.bf16.msra.mxu1 %v2921_v2  ;;  %5706 = vrcp.f32 %v1080_v46  ;;  %v1128_v42 = vadd.f32 1.0, %v5683_v22  ;;  %v4921_v1 = vld [vmem:[%s6229_s16 + $0x1ec] ss:$48 sps:$4 sm:$0xff]   ;;  %v1596_v46 = vld [vmem:[%s7791_s1 + $0x250] sm:$0xff] }
 0x162   : > { %v5687_v25 = vpop.eup %5686  ;;  %v1113_v10 = vadd.f32 1.0, %v5685_v39  ;;  %3692 = vmatmul.mubr.bf16.gmra.mxu1 %v4911_v24  ;;  %5708 = vpow2.f32 %v4367_v62  ;;  %v309_v2 = vld [vmem:[%s7790_s0 + $0x418] sm:$0xff]  ;;  %v308_v55 = vld [vmem:[%s7790_s0 + $0x410] sm:$0xff] }
 0x163   : > { %v5689_v21 = vpop.eup %5688  ;;  %v2912_v16 = vpack.c.bf16 %v2767_v7, %v2766_v37  ;;  %v2342_v3 = vpop.permute.xlu1 %2341  ;;  %v1112_v36 = vadd.f32 1.0, %v5687_v25  ;;  %5710 = vpow2.f32 %v4366_v58  ;;  %3699 = vmatprep.mubr.bf16.mxu1 %v4915_v61  ;;  %v1597_v0 = vld [vmem:[%s7791_s1 + $0x258] sm:$0xff]  ;;  %v4349_v7 = vmul.f32 -1.442695, %v325_v35 }
 0x164   : > { %v5691_v13 = vpop.eup %5690  ;;  %v2799_v23 = vmul.f32 %v2342_v3, %v1647_v44  ;;  %v2337_v60 = vpop.permute.xlu0 %2336  ;;  %2641 = vperm.xlu1 %4887, %v6928_v45   ;;  %5712 = vrcp.f32 %v1129_v40  ;;  %v1095_v63 = vadd.f32 1.0, %v5689_v21  ;;  %v1630_v45 = vld [vmem:[%s7791_s1 + $0x360] sm:$0xff]  ;;  %v4348_v37 = vmul.f32 -1.442695, %v324_v30  ;;  %v356_v3 = vld [vmem:[%s7790_s0 + $0x590] sm:$0xff] }
 0x165   : > { %v5693_v18 = vpop.eup %5692  ;;  %v2798_v12 = vmul.f32 %v2337_v60, %v1646_v34  ;;  %2636 = vperm.xlu0 %4886, %v6931_v32   ;;  %4622 = vmatprep.subr.bf16.mxu0 %v2912_v16  ;;  %5714 = vrcp.f32 %v1128_v42  ;;  %v1094_v56 = vadd.f32 1.0, %v5691_v13  ;;  %v4333_v44 = vmul.f32 -1.442695, %v309_v2  ;;  %v357_v42 = vld [vmem:[%s7790_s0 + $0x598] sm:$0xff]  ;;  %v1644_v60 = vld [vmem:[%s7791_s1 + $0x3d0] sm:$0xff] }
 0x166   : > { %v5695_v29 = vpop.eup %5694  ;;  %4623 = vmatpush3.bf16.msra.mxu0 %v2904_v49  ;;  %5716 = vrcp.f32 %v1113_v10  ;;  %v1079_v9 = vadd.f32 1.0, %v5693_v18  ;;  %v2749_v34 = vmul.f32 %v6813_v26, %v1597_v0  ;;  %v2748_v10 = vmul.f32 %v6819_v33, %v1596_v46  ;;  %v1645_v26 = vld [vmem:[%s7791_s1 + $0x3d8] sm:$0xff]  ;;  %v1628_v30 = vld [vmem:[%s7791_s1 + $0x350] sm:$0xff]  ;;  %v322_v0 = vld [vmem:[%s7790_s0 + $0x480] sm:$0xff] }
 0x167   : > { %v5697_v41 = vpop.eup %5696  ;;  %v2928_v8 = vpack.c.bf16 %v2799_v23, %v2798_v12  ;;  %v2262_v32 = vpop.permute.xlu1 %2261  ;;  %5718 = vrcp.f32 %v1112_v36  ;;  %v1078_v62 = vadd.f32 1.0, %v5695_v29  ;;  %v4332_v33 = vmul.f32 -1.442695, %v308_v55  ;;  %v341_v49 = vld [vmem:[%s7790_s0 + $0x518] sm:$0xff]  ;;  %v340_v12 = vld [vmem:[%s7790_s0 + $0x510] sm:$0xff] }
 0x168   : > { %v5699_v47 = vpop.eup %5698  ;;  %v2783_v24 = vmul.f32 %v2262_v32, %v1631_v50  ;;  %v2257_v58 = vpop.permute.xlu0 %2256  ;;  %2561 = vperm.xlu1 %4887, %v6933_v43   ;;  %5720 = vrcp.f32 %v1095_v63  ;;  %v1127_v38 = vadd.f32 1.0, %v5697_v41  ;;  %v1613_v43 = vld [vmem:[%s7791_s1 + $0x2d8] sm:$0xff]  ;;  %v4381_v63 = vmul.f32 -1.442695, %v357_v42  ;;  %v1595_v42 = vld [vmem:[%s7791_s1 + $0x248] sm:$0xff] }
 0x169   : > { %v2782_v61 = vmul.f32 %v2257_v58, %v1630_v45  ;;  %2556 = vperm.xlu0 %4886, %v6938_v48   ;;  %4686 = vmatprep.subr.bf16.mxu1 %v2928_v8  ;;  %5722 = vrcp.f32 %v1094_v56  ;;  %v1126_v22 = vadd.f32 1.0, %v5699_v47  ;;  %v4923_v18 = vld [vmem:[%s6229_s16 + $0x1e8] ss:$48 sps:$4 sm:$0xff]   ;;  %v4380_v45 = vmul.f32 -1.442695, %v356_v3  ;;  %v1610_v3 = vld [vmem:[%s7791_s1 + $0x2c0] sm:$0xff] }
 0x16a   : > { %5724 = vrcp.f32 %v1079_v9  ;;  %3700 = vmatmul.mubr.bf16.gmra.mxu1 %v4917_v59  ;;  %v4927_v9 = vld [vmem:[%s6229_s16 + $0x24c] ss:$48 sps:$4 sm:$0xff]   ;;  %v2903_v41 = vpack.c.bf16 %v2749_v34, %v2748_v10 }
 0x16b   : > { %v5701_v40 = vpop.eup %5700  ;;  %v2920_v48 = vpack.c.bf16 %v2783_v24, %v2782_v61  ;;  %v2172_v39 = vpop.permute.xlu1 %2171  ;;  %5726 = vrcp.f32 %v1078_v62  ;;  %3707 = vmatprep.mubr.bf16.mxu1 %v4921_v1  ;;  %v4365_v62 = vmul.f32 -1.442695, %v341_v49  ;;  %v1629_v47 = vld [vmem:[%s7791_s1 + $0x358] sm:$0xff]  ;;  %v4364_v24 = vmul.f32 -1.442695, %v340_v12  ;;  %v323_v58 = vld [vmem:[%s7790_s0 + $0x488] sm:$0xff] }
 0x16c   : > { %v5703_v25 = vpop.eup %5702  ;;  %v2765_v21 = vmul.f32 %v2172_v39, %v1613_v43  ;;  %v2167_v16 = vpop.permute.xlu0 %2166  ;;  %2471 = vperm.xlu1 %4887, %v5701_v40   ;;  %5728 = vrcp.f32 %v1127_v38  ;;  %v306_v39 = vld [vmem:[%s7790_s0 + $0x400] sm:$0xff]  ;;  %v1611_v10 = vld [vmem:[%s7791_s1 + $0x2c8] sm:$0xff] }
 0x16d   : > { %v5705_v36 = vpop.eup %5704  ;;  %v2764_v13 = vmul.f32 %v2167_v16, %v1612_v17  ;;  %2466 = vperm.xlu0 %4886, %v5703_v25   ;;  %4687 = vmatpush3.bf16.msra.mxu1 %v2920_v48  ;;  %5730 = vrcp.f32 %v1126_v22  ;;  %v307_v17 = vld [vmem:[%s7790_s0 + $0x408] sm:$0xff]  ;;  %v4347_v48 = vmul.f32 -1.442695, %v323_v58  ;;  %v1594_v25 = vld [vmem:[%s7791_s1 + $0x240] sm:$0xff] }
 0x16e   : > { %v5707_v23 = vpop.eup %5706  ;;  %5732 = vpow2.f32 %v4349_v7 }
 0x16f   : > { %v5709_v50 = vpop.eup %5708  ;;  %v2911_v56 = vpack.c.bf16 %v2765_v21, %v2764_v13  ;;  %v2332_v29 = vpop.permute.xlu1 %2331  ;;  %5734 = vpow2.f32 %v4348_v37  ;;  %v355_v37 = vld [vmem:[%s7790_s0 + $0x588] sm:$0xff]  ;;  %v4346_v21 = vmul.f32 -1.442695, %v322_v0  ;;  %v4331_v13 = vmul.f32 -1.442695, %v307_v17  ;;  %v1626_v17 = vld [vmem:[%s7791_s1 + $0x340] sm:$0xff] }
 0x170   : > { %v5711_v59 = vpop.eup %5710  ;;  %v2797_v8 = vmul.f32 %v2332_v29, %v1645_v26  ;;  %v2327_v32 = vpop.permute.xlu0 %2326  ;;  %2391 = vperm.xlu1 %4887, %v5705_v36   ;;  %5736 = vpow2.f32 %v4333_v44  ;;  %v1111_v2 = vadd.f32 1.0, %v5709_v50  ;;  %v4929_v36 = vld [vmem:[%s6229_s16 + $0x248] ss:$48 sps:$4 sm:$0xff]   ;;  %v354_v26 = vld [vmem:[%s7790_s0 + $0x580] sm:$0xff]  ;;  %v2747_v50 = vmul.f32 %v6782_v51, %v1595_v42 }
 0x171   : > { %v5713_v35 = vpop.eup %5712  ;;  %v2796_v1 = vmul.f32 %v2327_v32, %v1644_v60  ;;  %2386 = vperm.xlu0 %4886, %v5707_v23   ;;  %4624 = vmatprep.subr.bf16.mxu0 %v2911_v56  ;;  %5738 = vpow2.f32 %v4332_v33  ;;  %v1110_v22 = vadd.f32 1.0, %v5711_v59  ;;  %v4330_v60 = vmul.f32 -1.442695, %v306_v39  ;;  %v1642_v51 = vld [vmem:[%s7791_s1 + $0x3c0] sm:$0xff] }
 0x172   : > { %v5715_v38 = vpop.eup %5714  ;;  %4625 = vmatpush3.bf16.msra.mxu0 %v2903_v41  ;;  %5740 = vpow2.f32 %v4381_v63  ;;  %3708 = vmatmul.mubr.bf16.gmra.mxu1 %v4923_v18  ;;  %v4933_v63 = vld [vmem:[%s6229_s16 + $0x2ac] ss:$48 sps:$4 sm:$0xff]   ;;  %v4379_v18 = vmul.f32 -1.442695, %v355_v37  ;;  %v2746_v56 = vmul.f32 %v6795_v53, %v1594_v25 }
 0x173   : > { %v5717_v46 = vpop.eup %5716  ;;  %v2927_v61 = vpack.c.bf16 %v2797_v8, %v2796_v1  ;;  %v2252_v43 = vpop.permute.xlu1 %2251  ;;  %5742 = vpow2.f32 %v4380_v45  ;;  %3715 = vmatprep.mubr.bf16.mxu1 %v4927_v9  ;;  %v1643_v41 = vld [vmem:[%s7791_s1 + $0x3c8] sm:$0xff]  ;;  %v4378_v8 = vmul.f32 -1.442695, %v354_v26 }
 0x174   : > { %v5719_v7 = vpop.eup %5718  ;;  %v2781_v55 = vmul.f32 %v2252_v43, %v1629_v47  ;;  %v2247_v40 = vpop.permute.xlu0 %2246  ;;  %2631 = vperm.xlu1 %4887, %v5713_v35   ;;  %5744 = vpow2.f32 %v4365_v62  ;;  %v339_v1 = vld [vmem:[%s7790_s0 + $0x508] sm:$0xff] }
 0x175   : > { %v5721_v44 = vpop.eup %5720  ;;  %v2780_v34 = vmul.f32 %v2247_v40, %v1628_v30  ;;  %2626 = vperm.xlu0 %4886, %v5715_v38   ;;  %4688 = vmatprep.subr.bf16.mxu1 %v2927_v61  ;;  %5746 = vpow2.f32 %v4364_v24  ;;  %v2902_v24 = vpack.c.bf16 %v2747_v50, %v2746_v56  ;;  %v1627_v61 = vld [vmem:[%s7791_s1 + $0x348] sm:$0xff]  ;;  %v4363_v40 = vmul.f32 -1.442695, %v339_v1  ;;  %v1604_v1 = vld [vmem:[%s7791_s1 + $0x290] sm:$0xff] }
 0x176   : > { %v5723_v16 = vpop.eup %5722  ;;  %5748 = vrcp.f32 %v1111_v2  ;;  %v338_v2 = vld [vmem:[%s7790_s0 + $0x500] sm:$0xff]  ;;  %v4941_v25 = vld [vmem:[%s6229_s16 + $0x1c] ss:$48 sps:$4 sm:$0xff]  }
 0x177   : > { %v7068_v33 = vpop.eup %5724  ;;  %v2919_v49 = vpack.c.bf16 %v2781_v55, %v2780_v34  ;;  %v2162_v23 = vpop.permute.xlu1 %2161  ;;  %5750 = vrcp.f32 %v1110_v22  ;;  %v4935_v55 = vld [vmem:[%s6229_s16 + $0x2a8] ss:$48 sps:$4 sm:$0xff]   ;;  %v4362_v42 = vmul.f32 -1.442695, %v338_v2 }
 0x178   : > { %v7071_v12 = vpop.eup %5726  ;;  %v2763_v29 = vmul.f32 %v2162_v23, %v1611_v10  ;;  %v2157_v45 = vpop.permute.xlu0 %2156  ;;  %2551 = vperm.xlu1 %4887, %v5717_v46   ;;  %5752 = vpow2.f32 %v4347_v48  ;;  %v1593_v10 = vld [vmem:[%s7791_s1 + $0x238] sm:$0xff]  ;;  %v1607_v26 = vld [vmem:[%s7791_s1 + $0x2a8] sm:$0xff] }
 0x179   : > { %v7075_v9 = vpop.eup %5728  ;;  %v2762_v59 = vmul.f32 %v2157_v45, %v1610_v3  ;;  %2546 = vperm.xlu0 %4886, %v5719_v7   ;;  %4689 = vmatpush3.bf16.msra.mxu1 %v2919_v49  ;;  %5754 = vpow2.f32 %v4346_v21  ;;  %v1592_v21 = vld [vmem:[%s7791_s1 + $0x230] sm:$0xff]  ;;  %v1609_v23 = vld [vmem:[%s7791_s1 + $0x2b8] sm:$0xff]  ;;  %v2745_v56 = vmul.f32 %v6741_v27, %v1593_v10 }
 0x17a   : > { %v7080_v32 = vpop.eup %5730  ;;  %3716 = vmatmul.mubr.bf16.gmra.mxu1 %v4929_v36  ;;  %5756 = vpow2.f32 %v4331_v13 }
 0x17b   : > { %v5733_v53 = vpop.eup %5732  ;;  %v2910_v62 = vpack.c.bf16 %v2763_v29, %v2762_v59  ;;  %v2322_v35 = vpop.permute.xlu1 %2321  ;;  %5758 = vpow2.f32 %v4330_v60  ;;  %3723 = vmatprep.mubr.bf16.mxu1 %v4933_v63  ;;  %v2744_v29 = vmul.f32 %v6756_v11, %v1592_v21 }
 0x17c   : > { %v5735_v47 = vpop.eup %5734  ;;  %v2795_v58 = vmul.f32 %v2322_v35, %v1643_v41  ;;  %v2317_v38 = vpop.permute.xlu0 %2316  ;;  %2461 = vperm.xlu1 %4887, %v5721_v44   ;;  %v1093_v30 = vadd.f32 1.0, %v5733_v53  ;;  %5760 = vpow2.f32 %v4379_v18  ;;  %v1608_v18 = vld [vmem:[%s7791_s1 + $0x2b0] sm:$0xff]  ;;  %v2759_v53 = vmul.f32 %v6881_v19, %v1607_v26  ;;  %v1641_v19 = vld [vmem:[%s7791_s1 + $0x3b8] sm:$0xff] }
 0x17d   : > { %v5737_v0 = vpop.eup %5736  ;;  %v2794_v46 = vmul.f32 %v2317_v38, %v1642_v51  ;;  %2456 = vperm.xlu0 %4886, %v5723_v16   ;;  %4626 = vmatprep.subr.bf16.mxu0 %v2910_v62  ;;  %v1092_v43 = vadd.f32 1.0, %v5735_v47  ;;  %5762 = vpow2.f32 %v4378_v8  ;;  %v1590_v8 = vld [vmem:[%s7791_s1 + $0x220] sm:$0xff]  ;;  %v1605_v51 = vld [vmem:[%s7791_s1 + $0x298] sm:$0xff] }
 0x17e   : > { %v5739_v22 = vpop.eup %5738  ;;  %4627 = vmatpush3.bf16.msra.mxu0 %v2902_v24  ;;  %5764 = vrcp.f32 %v1093_v30  ;;  %v1077_v7 = vadd.f32 1.0, %v5737_v0  ;;  %v1640_v30 = vld [vmem:[%s7791_s1 + $0x3b0] sm:$0xff]  ;;  %v2901_v0 = vpack.c.bf16 %v2745_v56, %v2744_v29 }
 0x17f   : > { %v5741_v48 = vpop.eup %5740  ;;  %v2926_v39 = vpack.c.bf16 %v2795_v58, %v2794_v46  ;;  %v2242_v37 = vpop.permute.xlu1 %2241  ;;  %5766 = vrcp.f32 %v1092_v43  ;;  %v1076_v44 = vadd.f32 1.0, %v5739_v22  ;;  %v2757_v46 = vmul.f32 %v6863_v52, %v1605_v51  ;;  %v1602_v52 = vld [vmem:[%s7791_s1 + $0x280] sm:$0xff] }
 0x180   : > { %v5743_v34 = vpop.eup %5742  ;;  %v2779_v16 = vmul.f32 %v2242_v37, %v1627_v61  ;;  %v2237_v3 = vpop.permute.xlu0 %2236  ;;  %2381 = vperm.xlu1 %4887, %v7068_v33   ;;  %5768 = vrcp.f32 %v1077_v7  ;;  %v1125_v36 = vadd.f32 1.0, %v5741_v48  ;;  %v1606_v33 = vld [vmem:[%s7791_s1 + $0x2a0] sm:$0xff]  ;;  %v2756_v7 = vmul.f32 %v6868_v6, %v1604_v1 }
 0x181   : > { %v5745_v13 = vpop.eup %5744  ;;  %v2778_v49 = vmul.f32 %v2237_v3, %v1626_v17  ;;  %2376 = vperm.xlu0 %4886, %v7071_v12   ;;  %4690 = vmatprep.subr.bf16.mxu1 %v2926_v39  ;;  %5770 = vrcp.f32 %v1076_v44  ;;  %v1124_v60 = vadd.f32 1.0, %v5743_v34  ;;  %v1591_v12 = vld [vmem:[%s7791_s1 + $0x228] sm:$0xff]  ;;  %v2758_v47 = vmul.f32 %v6886_v28, %v1606_v33  ;;  %v1589_v28 = vld [vmem:[%s7791_s1 + $0x218] sm:$0xff]  ;;  %v1624_v34 = vld [vmem:[%s7791_s1 + $0x330] sm:$0xff] }
 0x182   : > { %v5747_v63 = vpop.eup %5746  ;;  %3724 = vmatmul.mubr.bf16.gmra.mxu1 %v4935_v55  ;;  %5772 = vpow2.f32 %v4363_v40  ;;  %v1109_v27 = vadd.f32 1.0, %v5745_v13  ;;  %v2743_v38 = vmul.f32 %v6701_v14, %v1591_v12  ;;  %v1588_v14 = vld [vmem:[%s7791_s1 + $0x210] sm:$0xff]  ;;  %v1603_v17 = vld [vmem:[%s7791_s1 + $0x288] sm:$0xff]  ;;  %v1625_v44 = vld [vmem:[%s7791_s1 + $0x338] sm:$0xff]  ;;  %v2907_v33 = vpack.c.bf16 %v2757_v46, %v2756_v7 }
 0x183   : > { %v5749_v50 = vpop.eup %5748  ;;  %v2918_v45 = vpack.c.bf16 %v2779_v16, %v2778_v49  ;;  %v2152_v59 = vpop.permute.xlu1 %2151  ;;  %5774 = vpow2.f32 %v4362_v42  ;;  %3861 = vmatprep.mubr.bf16.mxu1 %v4941_v25  ;;  %v1108_v58 = vadd.f32 1.0, %v5747_v63  ;;  %v2908_v39 = vpack.c.bf16 %v2759_v53, %v2758_v47  ;;  %v1587_v49 = vld [vmem:[%s7791_s1 + $0x208] sm:$0xff]  ;;  %v1637_v46 = vld [vmem:[%s7791_s1 + $0x398] sm:$0xff] }
 0x184   : > { %v5751_v41 = vpop.eup %5750  ;;  %v2761_v62 = vmul.f32 %v2152_v59, %v1609_v23  ;;  %v2147_v35 = vpop.permute.xlu0 %2146  ;;  %2621 = vperm.xlu1 %4887, %v7075_v9   ;;  %5776 = vrcp.f32 %v1125_v36  ;;  %v2741_v25 = vmul.f32 %v6669_v57, %v1589_v28  ;;  %v2740_v21 = vmul.f32 %v6683_v5, %v1588_v14  ;;  %v1586_v57 = vld [vmem:[%s7791_s1 + $0x200] sm:$0xff] }
 0x185   : > { %v5753_v11 = vpop.eup %5752  ;;  %v2760_v24 = vmul.f32 %v2147_v35, %v1608_v18  ;;  %2616 = vperm.xlu0 %4886, %v7080_v32   ;;  %4691 = vmatpush3.bf16.msra.mxu1 %v2918_v45  ;;  %5778 = vrcp.f32 %v1124_v60  ;;  %v2742_v32 = vmul.f32 %v6713_v15, %v1590_v8  ;;  %v2755_v3 = vmul.f32 %v6845_v20, %v1603_v17  ;;  %v4936_v14 = vld [vmem:[%s6229_s16 + $0x10] ss:$48 sps:$4 sm:$0xff]  }
 0x186   : > { %v5755_v9 = vpop.eup %5754  ;;  %5780 = vrcp.f32 %v1109_v27  ;;  %v1091_v15 = vadd.f32 1.0, %v5753_v11  ;;  %v2754_v23 = vmul.f32 %v6850_v31, %v1602_v52  ;;  %v1638_v31 = vld [vmem:[%s7791_s1 + $0x3a0] sm:$0xff]  ;;  %v2739_v45 = vmul.f32 %v6639_v4, %v1587_v49  ;;  %v1623_v4 = vld [vmem:[%s7791_s1 + $0x328] sm:$0xff] }
 0x187   : > { %v5757_v2 = vpop.eup %5756  ;;  %v2909_v61 = vpack.c.bf16 %v2761_v62, %v2760_v24  ;;  %v2312_v43 = vpop.permute.xlu1 %2311  ;;  %5782 = vrcp.f32 %v1108_v58  ;;  %v1090_v6 = vadd.f32 1.0, %v5755_v9  ;;  %v2900_v16 = vpack.c.bf16 %v2743_v38, %v2742_v32 }
 0x188   : > { %v5759_v22 = vpop.eup %5758  ;;  %v2793_v55 = vmul.f32 %v2312_v43, %v1641_v19  ;;  %v2307_v40 = vpop.permute.xlu0 %2306  ;;  %2541 = vperm.xlu1 %4887, %v5749_v50   ;;  %5784 = vrcp.f32 %v1091_v15  ;;  %v1075_v5 = vadd.f32 1.0, %v5757_v2  ;;  %v1639_v50 = vld [vmem:[%s7791_s1 + $0x3a8] sm:$0xff]  ;;  %v2738_v59 = vmul.f32 %v6649_v54, %v1586_v57  ;;  %v1622_v19 = vld [vmem:[%s7791_s1 + $0x320] sm:$0xff] }
 0x189   : > { %v5761_v48 = vpop.eup %5760  ;;  %v2792_v37 = vmul.f32 %v2307_v40, %v1640_v30  ;;  %2536 = vperm.xlu0 %4886, %v5751_v41   ;;  %4628 = vmatprep.subr.bf16.mxu0 %v2909_v61  ;;  %5786 = vrcp.f32 %v1090_v6  ;;  %v1074_v12 = vadd.f32 1.0, %v5759_v22  ;;  %v2899_v53 = vpack.c.bf16 %v2741_v25, %v2740_v21  ;;  %v1636_v22 = vld [vmem:[%s7791_s1 + $0x390] sm:$0xff] }
 0x18a   : > { %v5763_v42 = vpop.eup %5762  ;;  %4629 = vmatpush3.bf16.msra.mxu0 %v2901_v0  ;;  %5788 = vrcp.f32 %v1075_v5  ;;  %v1123_v27 = vadd.f32 1.0, %v5761_v48  ;;  %v2906_v1 = vpack.c.bf16 %v2755_v3, %v2754_v23  ;;  %v2898_v38 = vpack.c.bf16 %v2739_v45, %v2738_v59  ;;  %v4948_v57 = vld [vmem:[%s6229_s16 + $0xd4] ss:$48 sps:$4 sm:$0xff]   ;;  %v1681_v59 = vld [vmem:[%s7791_s1 + $0x4f8] sm:$0xff] }
 0x18b   : > { %v5765_v10 = vpop.eup %5764  ;;  %v2925_v36 = vpack.c.bf16 %v2793_v55, %v2792_v37  ;;  %4630 = vmatprep.subr.bf16.mxu0 %v2908_v39  ;;  %v2232_v13 = vpop.permute.xlu1 %2231  ;;  %5790 = vrcp.f32 %v1074_v12  ;;  %v1122_v54 = vadd.f32 1.0, %v5763_v42  ;;  %v4942_v55 = vld [vmem:[%s6229_s16 + $0x74] ss:$48 sps:$4 sm:$0xff]   ;;  %v1621_v39 = vld [vmem:[%s7791_s1 + $0x318] sm:$0xff] }
 0x18c   : > { %v5767_v26 = vpop.eup %5766  ;;  %v2777_v60 = vmul.f32 %v2232_v13, %v1625_v44  ;;  %v2227_v63 = vpop.permute.xlu0 %2226  ;;  %2451 = vperm.xlu1 %4887, %v5765_v10   ;;  %5792 = vrcp.f32 %v1123_v27  ;;  %v1620_v44 = vld [vmem:[%s7791_s1 + $0x310] sm:$0xff] }
 0x18d   : > { %v5769_v20 = vpop.eup %5768  ;;  %v2776_v18 = vmul.f32 %v2227_v63, %v1624_v34  ;;  %2446 = vperm.xlu0 %4886, %v5767_v26   ;;  %4692 = vmatprep.subr.bf16.mxu1 %v2925_v36  ;;  %5794 = vrcp.f32 %v1122_v54  ;;  %v1634_v36 = vld [vmem:[%s7791_s1 + $0x380] sm:$0xff]  ;;  %v4945_v54 = vld [vmem:[%s6229_s16 + $0x7c] ss:$48 sps:$4 sm:$0xff]  }
 0x18e   : > { %v5771_v56 = vpop.eup %5770  ;;  %4631 = vmatpush3.bf16.msra.mxu0 %v2900_v16  ;;  %v1635_v16 = vld [vmem:[%s7791_s1 + $0x388] sm:$0xff]  ;;  %v4944_v13 = vld [vmem:[%s6229_s16 + $0x70] ss:$48 sps:$4 sm:$0xff]  }
 0x18f   : > { %v5773_v29 = vpop.eup %5772  ;;  %v2917_v41 = vpack.c.bf16 %v2777_v60, %v2776_v18  ;;  %4632 = vmatprep.subr.bf16.mxu0 %v2907_v33  ;;  %v2302_v8 = vpop.permute.xlu1 %2301  ;;  %v1618_v18 = vld [vmem:[%s7791_s1 + $0x300] sm:$0xff] }
 0x190   : > { %v5775_v51 = vpop.eup %5774  ;;  %v2791_v62 = vmul.f32 %v2302_v8, %v1639_v50  ;;  %v2297_v35 = vpop.permute.xlu0 %2296  ;;  %2371 = vperm.xlu1 %4887, %v5769_v20   ;;  %v1107_v28 = vadd.f32 1.0, %v5773_v29  ;;  %v1619_v20 = vld [vmem:[%s7791_s1 + $0x308] sm:$0xff]  ;;  %v1680_v8 = vld [vmem:[%s7791_s1 + $0x4f0] sm:$0xff] }
 0x191   : > { %v5777_v11 = vpop.eup %5776  ;;  %v2790_v47 = vmul.f32 %v2297_v35, %v1638_v31  ;;  %2366 = vperm.xlu0 %4886, %v5771_v56   ;;  %4693 = vmatpush3.bf16.msra.mxu1 %v2917_v41  ;;  %v1106_v61 = vadd.f32 1.0, %v5775_v51  ;;  %v4950_v51 = vld [vmem:[%s6229_s16 + $0xd0] ss:$48 sps:$4 sm:$0xff]   ;;  %v4954_v35 = vld [vmem:[%s6229_s16 + $0x134] ss:$48 sps:$4 sm:$0xff]  }
 0x192   : > { %v5779_v24 = vpop.eup %5778  ;;  %4633 = vmatpush3.bf16.msra.mxu0 %v2899_v53  ;;  %5796 = vrcp.f32 %v1107_v28  ;;  %v1712_v28 = vld [vmem:[%s7791_s1 + $0x5f0] sm:$0xff] }
 0x193   : > { %v2924_v58 = vpack.c.bf16 %v2791_v62, %v2790_v47  ;;  %4634 = vmatprep.subr.bf16.mxu0 %v2906_v1  ;;  %v2222_v9 = vpop.permute.xlu1 %2221  ;;  %v5781_v32 = vpop.eup %5780  ;;  %5798 = vrcp.f32 %v1106_v61  ;;  %v4939_v1 = vld [vmem:[%s6229_s16 + $0x18] ss:$48 sps:$4 sm:$0xff]   ;;  %v4960_v61 = vld [vmem:[%s6229_s16 + $0x194] ss:$48 sps:$4 sm:$0xff]  }
 0x194   : > { %v2775_v30 = vmul.f32 %v2222_v9, %v1623_v4  ;;  %v2217_v2 = vpop.permute.xlu0 %2216  ;;  %2611 = vperm.xlu1 %4887, %v5777_v11   ;;  %v5783_v43 = vpop.eup %5782  ;;  %v1665_v4 = vld [vmem:[%s7791_s1 + $0x478] sm:$0xff] }
 0x195   : > { %v2774_v0 = vmul.f32 %v2217_v2, %v1622_v19  ;;  %2606 = vperm.xlu0 %4886, %v5779_v24   ;;  %4694 = vmatprep.subr.bf16.mxu1 %v2924_v58  ;;  %v5785_v48 = vpop.eup %5784  ;;  %v1664_v24 = vld [vmem:[%s7791_s1 + $0x470] sm:$0xff]  ;;  %v1713_v2 = vld [vmem:[%s7791_s1 + $0x5f8] sm:$0xff] }
 0x196   : > { %4635 = vmatpush3.bf16.msra.mxu0 %v2898_v38  ;;  %v5787_v37 = vpop.eup %5786 }
 0x197   : > { %v2916_v17 = vpack.c.bf16 %v2775_v30, %v2774_v0  ;;  %v2292_v7 = vpop.permute.xlu1 %2291  ;;  %v5789_v10 = vpop.eup %5788 }
 0x198   : > { %v2789_v40 = vmul.f32 %v2292_v7, %v1637_v46  ;;  %v2287_v15 = vpop.permute.xlu0 %2286  ;;  %2531 = vperm.xlu1 %4887, %v5781_v32   ;;  %v5791_v3 = vpop.eup %5790  ;;  %v4956_v32 = vld [vmem:[%s6229_s16 + $0x130] ss:$48 sps:$4 sm:$0xff]   ;;  %v1697_v7 = vld [vmem:[%s7791_s1 + $0x578] sm:$0xff] }
 0x199   : > { %v2788_v52 = vmul.f32 %v2287_v15, %v1636_v22  ;;  %2526 = vperm.xlu0 %4886, %v5783_v43   ;;  %4695 = vmatpush3.bf16.msra.mxu1 %v2916_v17  ;;  %v5793_v63 = vpop.eup %5792 }
 0x19a   : > { %3765 = vmatmul.mubr.bf16.vlgmr.msra.gmra.mxu0 %v4936_v14  ;;  %v5795_v33 = vpop.eup %5794  ;;  %v4947_v14 = vld [vmem:[%s6229_s16 + $0x78] ss:$48 sps:$4 sm:$0xff]  }
 0x19b   : > { %v2923_v6 = vpack.c.bf16 %v2789_v40, %v2788_v52  ;;  %v2212_v42 = vpop.permute.xlu1 %2211  ;;  %3772 = vmatprep.mubr.bf16.mxu0 %v4942_v55  ;;  %v4951_v55 = vld [vmem:[%s6229_s16 + $0xdc] ss:$48 sps:$4 sm:$0xff]   ;;  %v1696_v40 = vld [vmem:[%s7791_s1 + $0x570] sm:$0xff] }
 0x19c   : > { %v2773_v25 = vmul.f32 %v2212_v42, %v1621_v39  ;;  %v2207_v34 = vpop.permute.xlu0 %2206  ;;  %2441 = vperm.xlu1 %4887, %v5785_v48   ;;  %v4962_v42 = vld [vmem:[%s6229_s16 + $0x190] ss:$48 sps:$4 sm:$0xff]  }
 0x19d   : > { %v2772_v21 = vmul.f32 %v2207_v34, %v1620_v44  ;;  %2436 = vperm.xlu0 %4886, %v5787_v37   ;;  %4696 = vmatprep.subr.bf16.mxu1 %v2923_v6  ;;  %v1679_v44 = vld [vmem:[%s7791_s1 + $0x4e8] sm:$0xff]  ;;  %v1678_v6 = vld [vmem:[%s7791_s1 + $0x4e0] sm:$0xff] }
 0x19f   : > { %v2915_v26 = vpack.c.bf16 %v2773_v25, %v2772_v21  ;;  %v2282_v49 = vpop.permute.xlu1 %2281  ;;  %v5797_v29 = vpop.eup %5796 }
 0x1a0   : > { %v2787_v23 = vmul.f32 %v2282_v49, %v1635_v16  ;;  %v2277_v60 = vpop.permute.xlu0 %2276  ;;  %2361 = vperm.xlu1 %4887, %v5789_v10   ;;  %v5799_v41 = vpop.eup %5798  ;;  %v4966_v10 = vld [vmem:[%s6229_s16 + $0x1f4] ss:$48 sps:$4 sm:$0xff]  }
 0x1a1   : > { %v2786_v5 = vmul.f32 %v2277_v60, %v1634_v36  ;;  %2356 = vperm.xlu0 %4886, %v5791_v3   ;;  %4697 = vmatpush3.bf16.msra.mxu1 %v2915_v26  ;;  %v4953_v3 = vld [vmem:[%s6229_s16 + $0xd8] ss:$48 sps:$4 sm:$0xff]   ;;  %v4957_v26 = vld [vmem:[%s6229_s16 + $0x13c] ss:$48 sps:$4 sm:$0xff]   ;;  %v1662_v49 = vld [vmem:[%s7791_s1 + $0x460] sm:$0xff] }
 0x1a2   : > { %3773 = vmatmul.mubr.bf16.gmra.mxu0 %v4944_v13  ;;  %v1663_v13 = vld [vmem:[%s7791_s1 + $0x468] sm:$0xff] }
 0x1a3   : > { %v2922_v50 = vpack.c.bf16 %v2787_v23, %v2786_v5  ;;  %v2202_v12 = vpop.permute.xlu1 %2201  ;;  %3780 = vmatprep.mubr.bf16.mxu0 %v4948_v57 }
 0x1a4   : > { %v2771_v56 = vmul.f32 %v2202_v12, %v1619_v20  ;;  %v2197_v31 = vpop.permute.xlu0 %2196  ;;  %2601 = vperm.xlu1 %4887, %v5793_v63   ;;  %v1711_v20 = vld [vmem:[%s7791_s1 + $0x5e8] sm:$0xff] }
 0x1a5   : > { %v2770_v45 = vmul.f32 %v2197_v31, %v1618_v18  ;;  %2596 = vperm.xlu0 %4886, %v5795_v33   ;;  %4698 = vmatprep.subr.bf16.mxu1 %v2922_v50  ;;  %v1710_v33 = vld [vmem:[%s7791_s1 + $0x5e0] sm:$0xff] }
 0x1a6   : > { %v4968_v18 = vld [vmem:[%s6229_s16 + $0x1f0] ss:$48 sps:$4 sm:$0xff]  }
 0x1a7   : > { %v2914_v53 = vpack.c.bf16 %v2771_v56, %v2770_v45  ;;  %v2512_v62 = vpop.permute.xlu1 %2511  ;;  %v4972_v56 = vld [vmem:[%s6229_s16 + $0x254] ss:$48 sps:$4 sm:$0xff]   ;;  %v4959_v45 = vld [vmem:[%s6229_s16 + $0x138] ss:$48 sps:$4 sm:$0xff]  }
 0x1a8   : > { %v2833_v27 = vmul.f32 %v2512_v62, %v1681_v59  ;;  %v2507_v11 = vpop.permute.xlu0 %2506  ;;  %2521 = vperm.xlu1 %4887, %v5797_v29  }
 0x1a9   : > { %v2832_v47 = vmul.f32 %v2507_v11, %v1680_v8  ;;  %2516 = vperm.xlu0 %4886, %v5799_v41   ;;  %4699 = vmatpush3.bf16.msra.mxu1 %v2914_v53  ;;  %v1695_v41 = vld [vmem:[%s7791_s1 + $0x568] sm:$0xff] }
 0x1aa   : > { %3781 = vmatmul.mubr.bf16.gmra.mxu0 %v4950_v51  ;;  %v4963_v8 = vld [vmem:[%s6229_s16 + $0x19c] ss:$48 sps:$4 sm:$0xff]   ;;  %v1694_v51 = vld [vmem:[%s7791_s1 + $0x560] sm:$0xff] }
 0x1ab   : > { %v2945_v19 = vpack.c.bf16 %v2833_v27, %v2832_v47  ;;  %v2432_v58 = vpop.permute.xlu1 %2431  ;;  %3788 = vmatprep.mubr.bf16.mxu0 %v4954_v35  ;;  %v1676_v47 = vld [vmem:[%s7791_s1 + $0x4d0] sm:$0xff] }
 0x1ac   : > { %v2817_v9 = vmul.f32 %v2432_v58, %v1665_v4  ;;  %v2427_v38 = vpop.permute.xlu0 %2426  ;;  %3862 = vmatmul.mubr.bf16.vlgmr.msra.gmra.mxu1 %v4939_v1  ;;  %v1677_v1 = vld [vmem:[%s7791_s1 + $0x4d8] sm:$0xff]  ;;  %v4974_v4 = vld [vmem:[%s6229_s16 + $0x250] ss:$48 sps:$4 sm:$0xff]  }
 0x1ad   : > { %v2816_v30 = vmul.f32 %v2427_v38, %v1664_v24  ;;  %4748 = vmatprep.subr.bf16.mxu0 %v2945_v19  ;;  %3869 = vmatprep.mubr.bf16.mxu1 %v4945_v54  ;;  %v4978_v19 = vld [vmem:[%s6229_s16 + $0x2b4] ss:$48 sps:$4 sm:$0xff]   ;;  %v4965_v38 = vld [vmem:[%s6229_s16 + $0x198] ss:$48 sps:$4 sm:$0xff]  }
 0x1af   : > { %v2937_v0 = vpack.c.bf16 %v2817_v9, %v2816_v30  ;;  %v2672_v46 = vpop.permute.xlu1 %2671 }
 0x1b0   : > { %v2865_v43 = vmul.f32 %v2672_v46, %v1713_v2  ;;  %v2667_v22 = vpop.permute.xlu0 %2666  ;;  %v1661_v2 = vld [vmem:[%s7791_s1 + $0x458] sm:$0xff] }
 0x1b1   : > { %v2864_v17 = vmul.f32 %v2667_v22, %v1712_v28  ;;  %4749 = vmatpush3.bf16.msra.mxu0 %v2937_v0  ;;  %v4969_v28 = vld [vmem:[%s6229_s16 + $0x1fc] ss:$48 sps:$4 sm:$0xff]   ;;  %v1660_v0 = vld [vmem:[%s7791_s1 + $0x450] sm:$0xff] }
 0x1b2   : > { %3789 = vmatmul.mubr.bf16.gmra.mxu0 %v4956_v32 }
 0x1b3   : > { %v2961_v15 = vpack.c.bf16 %v2865_v43, %v2864_v17  ;;  %v2592_v48 = vpop.permute.xlu1 %2591  ;;  %3796 = vmatprep.mubr.bf16.mxu0 %v4960_v61 }
 0x1b4   : > { %v2849_v52 = vmul.f32 %v2592_v48, %v1697_v7  ;;  %v2587_v39 = vpop.permute.xlu0 %2586  ;;  %3870 = vmatmul.mubr.bf16.gmra.mxu1 %v4947_v14  ;;  %v4980_v48 = vld [vmem:[%s6229_s16 + $0x2b0] ss:$48 sps:$4 sm:$0xff]  }
 0x1b5   : > { %v2848_v37 = vmul.f32 %v2587_v39, %v1696_v40  ;;  %4812 = vmatprep.subr.bf16.mxu1 %v2961_v15  ;;  %3877 = vmatprep.mubr.bf16.mxu1 %v4951_v55  ;;  %v1709_v55 = vld [vmem:[%s7791_s1 + $0x5d8] sm:$0xff]  ;;  %v1708_v15 = vld [vmem:[%s7791_s1 + $0x5d0] sm:$0xff] }
 0x1b7   : > { %v2953_v25 = vpack.c.bf16 %v2849_v52, %v2848_v37  ;;  %v2502_v34 = vpop.permute.xlu1 %2501  ;;  %v4986_v37 = vld [vmem:[%s6229_s16 + $0x24] ss:$48 sps:$4 sm:$0xff]  }
 0x1b8   : > { %v2831_v21 = vmul.f32 %v2502_v34, %v1679_v44  ;;  %v2497_v16 = vpop.permute.xlu0 %2496 }
 0x1b9   : > { %v2830_v36 = vmul.f32 %v2497_v16, %v1678_v6  ;;  %4813 = vmatpush3.bf16.msra.mxu1 %v2953_v25  ;;  %v4971_v25 = vld [vmem:[%s6229_s16 + $0x1f8] ss:$48 sps:$4 sm:$0xff]   ;;  %v4975_v16 = vld [vmem:[%s6229_s16 + $0x25c] ss:$48 sps:$4 sm:$0xff]  }
 0x1ba   : > { %3797 = vmatmul.mubr.bf16.gmra.mxu0 %v4962_v42 }
 0x1bb   : > { %v2944_v57 = vpack.c.bf16 %v2831_v21, %v2830_v36  ;;  %v2422_v23 = vpop.permute.xlu1 %2421  ;;  %3804 = vmatprep.mubr.bf16.mxu0 %v4966_v10  ;;  %v1693_v21 = vld [vmem:[%s7791_s1 + $0x558] sm:$0xff]  ;;  %v1692_v36 = vld [vmem:[%s7791_s1 + $0x550] sm:$0xff] }
 0x1bc   : > { %v2815_v60 = vmul.f32 %v2422_v23, %v1663_v13  ;;  %v2417_v63 = vpop.permute.xlu0 %2416  ;;  %3878 = vmatmul.mubr.bf16.gmra.mxu1 %v4953_v3 }
 0x1bd   : > { %v2814_v5 = vmul.f32 %v2417_v63, %v1662_v49  ;;  %4750 = vmatprep.subr.bf16.mxu0 %v2944_v57  ;;  %3885 = vmatprep.mubr.bf16.mxu1 %v4957_v26 }
 0x1bf   : > { %v2936_v50 = vpack.c.bf16 %v2815_v60, %v2814_v5  ;;  %v2662_v12 = vpop.permute.xlu1 %2661  ;;  %v1675_v5 = vld [vmem:[%s7791_s1 + $0x4c8] sm:$0xff] }
 0x1c0   : > { %v2863_v31 = vmul.f32 %v2662_v12, %v1711_v20  ;;  %v2657_v29 = vpop.permute.xlu0 %2656 }
 0x1c1   : > { %v2862_v59 = vmul.f32 %v2657_v29, %v1710_v33  ;;  %4751 = vmatpush3.bf16.msra.mxu0 %v2936_v50  ;;  %v1674_v33 = vld [vmem:[%s7791_s1 + $0x4c0] sm:$0xff]  ;;  %v4977_v29 = vld [vmem:[%s6229_s16 + $0x258] ss:$48 sps:$4 sm:$0xff]  }
 0x1c2   : > { %3805 = vmatmul.mubr.bf16.gmra.mxu0 %v4968_v18 }
 0x1c3   : > { %v2960_v53 = vpack.c.bf16 %v2863_v31, %v2862_v59  ;;  %v2582_v62 = vpop.permute.xlu1 %2581  ;;  %3812 = vmatprep.mubr.bf16.mxu0 %v4972_v56 }
 0x1c4   : > { %v2847_v35 = vmul.f32 %v2582_v62, %v1695_v41  ;;  %v2577_v27 = vpop.permute.xlu0 %2576  ;;  %3886 = vmatmul.mubr.bf16.gmra.mxu1 %v4959_v45  ;;  %v1659_v41 = vld [vmem:[%s7791_s1 + $0x448] sm:$0xff] }
 0x1c5   : > { %v2846_v11 = vmul.f32 %v2577_v27, %v1694_v51  ;;  %4814 = vmatprep.subr.bf16.mxu1 %v2960_v53  ;;  %3893 = vmatprep.mubr.bf16.mxu1 %v4963_v8  ;;  %v4981_v8 = vld [vmem:[%s6229_s16 + $0x2bc] ss:$48 sps:$4 sm:$0xff]   ;;  %v1658_v53 = vld [vmem:[%s7791_s1 + $0x440] sm:$0xff] }
 0x1c7   : > { %v2952_v54 = vpack.c.bf16 %v2847_v35, %v2846_v11  ;;  %v2492_v24 = vpop.permute.xlu1 %2491 }
 0x1c8   : > { %v2829_v58 = vmul.f32 %v2492_v24, %v1677_v1  ;;  %v2487_v9 = vpop.permute.xlu0 %2486 }
 0x1c9   : > { %v2828_v30 = vmul.f32 %v2487_v9, %v1676_v47  ;;  %4815 = vmatpush3.bf16.msra.mxu1 %v2952_v54  ;;  %v4508_v32 = vpop.f32.mrf.mxu0  ;;  %v1707_v54 = vld [vmem:[%s7791_s1 + $0x5c8] sm:$0xff] }
 0x1ca   : > { %3813 = vmatmul.mubr.bf16.gmra.mxu0 %v4974_v4 }
 0x1cb   : > { %v2943_v46 = vpack.c.bf16 %v2829_v58, %v2828_v30  ;;  %v2412_v61 = vpop.permute.xlu1 %2411  ;;  %3820 = vmatprep.mubr.bf16.mxu0 %v4978_v19  ;;  %v4509_v43 = vpop.f32.mrf.mxu0  ;;  %v1706_v19 = vld [vmem:[%s7791_s1 + $0x5c0] sm:$0xff] }
 0x1cc   : > { %v2813_v22 = vmul.f32 %v2412_v61, %v1661_v2  ;;  %v2407_v14 = vpop.permute.xlu0 %2406  ;;  %3894 = vmatmul.mubr.bf16.gmra.mxu1 %v4965_v38  ;;  %v7297_v17 = vadd.f32 %v4509_v43, %v4508_v32  ;;  %v4991_v61 = vld [vmem:[%s6229_s16 + $0x2c] ss:$48 sps:$4 sm:$0xff]  }
 0x1cd   : > { %v2812_v7 = vmul.f32 %v2407_v14, %v1660_v0  ;;  %4752 = vmatprep.subr.bf16.mxu0 %v2943_v46  ;;  %3901 = vmatprep.mubr.bf16.mxu1 %v4969_v28  ;;  %v4511_v40 = vpop.f32.mrf.mxu0  ;;  %v4983_v28 = vld [vmem:[%s6229_s16 + $0x2b8] ss:$48 sps:$4 sm:$0xff]  }
 0x1ce   : > { %v1691_v46 = vld [vmem:[%s7791_s1 + $0x548] sm:$0xff] }
 0x1cf   : > { %v2935_v52 = vpack.c.bf16 %v2813_v22, %v2812_v7  ;;  %v2652_v39 = vpop.permute.xlu1 %2651  ;;  %v4512_v44 = vpop.f32.mrf.mxu0  ;;  %v1690_v22 = vld [vmem:[%s7791_s1 + $0x540] sm:$0xff] }
 0x1d0   : > { %v2861_v6 = vmul.f32 %v2652_v39, %v1709_v55  ;;  %v2647_v42 = vpop.permute.xlu0 %2646  ;;  %v7308_v34 = vadd.f32 %v4512_v44, %v4511_v40  ;;  %v1673_v39 = vld [vmem:[%s7791_s1 + $0x4b8] sm:$0xff]  ;;  %v1672_v44 = vld [vmem:[%s7791_s1 + $0x4b0] sm:$0xff] }
 0x1d1   : > { %v2860_v10 = vmul.f32 %v2647_v42, %v1708_v15  ;;  %4753 = vmatpush3.bf16.msra.mxu0 %v2935_v52  ;;  %v4514_v3 = vpop.f32.mrf.mxu0 }
 0x1d2   : > { %3821 = vmatmul.mubr.bf16.gmra.mxu0 %v4980_v48 }
 0x1d3   : > { %v2959_v13 = vpack.c.bf16 %v2861_v6, %v2860_v10  ;;  %v2572_v26 = vpop.permute.xlu1 %2571  ;;  %3958 = vmatprep.mubr.bf16.mxu0 %v4986_v37  ;;  %v4515_v49 = vpop.f32.mrf.mxu0 }
 0x1d4   : > { %v2845_v57 = vmul.f32 %v2572_v26, %v1693_v21  ;;  %v2567_v23 = vpop.permute.xlu0 %2566  ;;  %3902 = vmatmul.mubr.bf16.gmra.mxu1 %v4971_v25  ;;  %v7317_v60 = vadd.f32 %v4515_v49, %v4514_v3 }
 0x1d5   : > { %v2844_v63 = vmul.f32 %v2567_v23, %v1692_v36  ;;  %4816 = vmatprep.subr.bf16.mxu1 %v2959_v13  ;;  %3909 = vmatprep.mubr.bf16.mxu1 %v4975_v16  ;;  %v4517_v20 = vpop.f32.mrf.mxu0  ;;  %v1657_v36 = vld [vmem:[%s7791_s1 + $0x438] sm:$0xff]  ;;  %v1656_v13 = vld [vmem:[%s7791_s1 + $0x430] sm:$0xff] }
 0x1d7   : > { %v2951_v18 = vpack.c.bf16 %v2845_v57, %v2844_v63  ;;  %v2482_v50 = vpop.permute.xlu1 %2481  ;;  %v4518_v12 = vpop.f32.mrf.mxu0 }
 0x1d8   : > { %v2827_v56 = vmul.f32 %v2482_v50, %v1675_v5  ;;  %v2477_v31 = vpop.permute.xlu0 %2476  ;;  %v7326_v45 = vadd.f32 %v4518_v12, %v4517_v20  ;;  %v1704_v50 = vld [vmem:[%s7791_s1 + $0x5b0] sm:$0xff] }
 0x1d9   : > { %v2826_v59 = vmul.f32 %v2477_v31, %v1674_v33  ;;  %4817 = vmatpush3.bf16.msra.mxu1 %v2951_v18  ;;  %v4520_v51 = vpop.f32.mrf.mxu0  ;;  %v1705_v33 = vld [vmem:[%s7791_s1 + $0x5b8] sm:$0xff] }
 0x1db   : > { %v2942_v62 = vpack.c.bf16 %v2827_v56, %v2826_v59  ;;  %v2402_v35 = vpop.permute.xlu1 %2401  ;;  %v4521_v27 = vpop.f32.mrf.mxu0 }
 0x1dc   : > { %v2811_v11 = vmul.f32 %v2402_v35, %v1659_v41  ;;  %v2397_v1 = vpop.permute.xlu0 %2396  ;;  %3910 = vmatmul.mubr.bf16.gmra.mxu1 %v4977_v29  ;;  %v7335_v47 = vadd.f32 %v4521_v27, %v4520_v51  ;;  %v1689_v51 = vld [vmem:[%s7791_s1 + $0x538] sm:$0xff] }
 0x1dd   : > { %v2810_v4 = vmul.f32 %v2397_v1, %v1658_v53  ;;  %4754 = vmatprep.subr.bf16.mxu0 %v2942_v62  ;;  %3917 = vmatprep.mubr.bf16.mxu1 %v4981_v8  ;;  %v4523_v24 = vpop.f32.mrf.mxu0  ;;  %v1688_v62 = vld [vmem:[%s7791_s1 + $0x530] sm:$0xff] }
 0x1df   : > { %v2934_v58 = vpack.c.bf16 %v2811_v11, %v2810_v4  ;;  %v2642_v9 = vpop.permute.xlu1 %2641  ;;  %v4524_v38 = vpop.f32.mrf.mxu0 }
 0x1e0   : > { %v2859_v30 = vmul.f32 %v2642_v9, %v1707_v54  ;;  %v2637_v2 = vpop.permute.xlu0 %2636  ;;  %v7344_v32 = vadd.f32 %v4524_v38, %v4523_v24  ;;  %v1670_v9 = vld [vmem:[%s7791_s1 + $0x4a0] sm:$0xff] }
 0x1e1   : > { %v2858_v0 = vmul.f32 %v2637_v2, %v1706_v19  ;;  %4755 = vmatpush3.bf16.msra.mxu0 %v2934_v58  ;;  %v4526_v43 = vpop.f32.mrf.mxu0  ;;  %v1671_v19 = vld [vmem:[%s7791_s1 + $0x4a8] sm:$0xff] }
 0x1e3   : > { %v2958_v14 = vpack.c.bf16 %v2859_v30, %v2858_v0  ;;  %v2562_v7 = vpop.permute.xlu1 %2561  ;;  %v4527_v55 = vpop.f32.mrf.mxu0 }
 0x1e4   : > { %v2843_v40 = vmul.f32 %v2562_v7, %v1691_v46  ;;  %v2557_v15 = vpop.permute.xlu0 %2556  ;;  %3918 = vmatmul.mubr.bf16.gmra.mxu1 %v4983_v28  ;;  %v7353_v48 = vadd.f32 %v4527_v55, %v4526_v43  ;;  %v1655_v43 = vld [vmem:[%s7791_s1 + $0x428] sm:$0xff] }
 0x1e5   : > { %v2842_v52 = vmul.f32 %v2557_v15, %v1690_v22  ;;  %4818 = vmatprep.subr.bf16.mxu1 %v2958_v14  ;;  %4055 = vmatprep.mubr.bf16.mxu1 %v4991_v61  ;;  %v4529_v37 = vpop.f32.mrf.mxu0  ;;  %v1654_v14 = vld [vmem:[%s7791_s1 + $0x420] sm:$0xff] }
 0x1e7   : > { %v2950_v6 = vpack.c.bf16 %v2843_v40, %v2842_v52  ;;  %v2472_v42 = vpop.permute.xlu1 %2471  ;;  %v4530_v25 = vpop.f32.mrf.mxu0 }
 0x1e8   : > { %v2825_v10 = vmul.f32 %v2472_v42, %v1673_v39  ;;  %v2467_v21 = vpop.permute.xlu0 %2466  ;;  %v7361_v16 = vadd.f32 %v4530_v25, %v4529_v37  ;;  %v1702_v42 = vld [vmem:[%s7791_s1 + $0x5a0] sm:$0xff] }
 0x1e9   : > { %v2824_v3 = vmul.f32 %v2467_v21, %v1672_v44  ;;  %4819 = vmatpush3.bf16.msra.mxu1 %v2950_v6  ;;  %v1703_v44 = vld [vmem:[%s7791_s1 + $0x5a8] sm:$0xff] }
 0x1ea   : > { %v4532_v26 = vpop.f32.mrf.mxu0 }
 0x1eb   : > { %v2941_v49 = vpack.c.bf16 %v2825_v10, %v2824_v3  ;;  %v2392_v57 = vpop.permute.xlu1 %2391 }
 0x1ec   : > { %v2809_v23 = vmul.f32 %v2392_v57, %v1657_v36  ;;  %v2387_v63 = vpop.permute.xlu0 %2386  ;;  %v4533_v5 = vpop.f32.mrf.mxu0 }
 0x1ed   : > { %v2808_v20 = vmul.f32 %v2387_v63, %v1656_v13  ;;  %4756 = vmatprep.subr.bf16.mxu0 %v2941_v49  ;;  %v7372_v18 = vadd.f32 %v4533_v5, %v4532_v26  ;;  %v1687_v49 = vld [vmem:[%s7791_s1 + $0x528] sm:$0xff] }
 0x1ee   : > { %v4535_v12 = vpop.f32.mrf.mxu0 }
 0x1ef   : > { %v2933_v56 = vpack.c.bf16 %v2809_v23, %v2808_v20  ;;  %v2632_v31 = vpop.permute.xlu1 %2631  ;;  %v1686_v23 = vld [vmem:[%s7791_s1 + $0x520] sm:$0xff] }
 0x1f0   : > { %v2857_v29 = vmul.f32 %v2632_v31, %v1705_v33  ;;  %v2627_v59 = vpop.permute.xlu0 %2626  ;;  %v4536_v41 = vpop.f32.mrf.mxu0  ;;  %v1669_v31 = vld [vmem:[%s7791_s1 + $0x498] sm:$0xff] }
 0x1f1   : > { %v2856_v8 = vmul.f32 %v2627_v59, %v1704_v50  ;;  %4757 = vmatpush3.bf16.msra.mxu0 %v2933_v56  ;;  %v7380_v53 = vadd.f32 %v4536_v41, %v4535_v12  ;;  %v1668_v59 = vld [vmem:[%s7791_s1 + $0x490] sm:$0xff] }
 0x1f2   : > { %v4538_v35 = vpop.f32.mrf.mxu0 }
 0x1f3   : > { %v2957_v27 = vpack.c.bf16 %v2857_v29, %v2856_v8  ;;  %v2552_v11 = vpop.permute.xlu1 %2551 }
 0x1f4   : > { %v2841_v1 = vmul.f32 %v2552_v11, %v1689_v51  ;;  %v2547_v4 = vpop.permute.xlu0 %2546  ;;  %v4539_v54 = vpop.f32.mrf.mxu0 }
 0x1f5   : > { %v2840_v24 = vmul.f32 %v2547_v4, %v1688_v62  ;;  %4820 = vmatprep.subr.bf16.mxu1 %v2957_v27  ;;  %v7388_v58 = vadd.f32 %v4539_v54, %v4538_v35  ;;  %v1653_v27 = vld [vmem:[%s7791_s1 + $0x418] sm:$0xff] }
 0x1f6   : > { %v4541_v38 = vpop.f32.mrf.mxu0 }
 0x1f7   : > { %v2949_v30 = vpack.c.bf16 %v2841_v1, %v2840_v24  ;;  %v2462_v2 = vpop.permute.xlu1 %2461  ;;  %v1652_v1 = vld [vmem:[%s7791_s1 + $0x410] sm:$0xff] }
 0x1f8   : > { %v2823_v28 = vmul.f32 %v2462_v2, %v1671_v19  ;;  %v2457_v0 = vpop.permute.xlu0 %2456  ;;  %v4542_v46 = vpop.f32.mrf.mxu0  ;;  %v1701_v2 = vld [vmem:[%s7791_s1 + $0x598] sm:$0xff] }
 0x1f9   : > { %v2822_v61 = vmul.f32 %v2457_v0, %v1670_v9  ;;  %4821 = vmatpush3.bf16.msra.mxu1 %v2949_v30  ;;  %v7396_v22 = vadd.f32 %v4542_v46, %v4541_v38  ;;  %v1700_v0 = vld [vmem:[%s7791_s1 + $0x590] sm:$0xff] }
 0x1fa   : > { %v4544_v7 = vpop.f32.mrf.mxu0 }
 0x1fb   : > { %v2940_v55 = vpack.c.bf16 %v2823_v28, %v2822_v61  ;;  %v2382_v40 = vpop.permute.xlu1 %2381 }
 0x1fc   : > { %v2807_v15 = vmul.f32 %v2382_v40, %v1655_v43  ;;  %v2377_v52 = vpop.permute.xlu0 %2376  ;;  %v4545_v39 = vpop.f32.mrf.mxu0 }
 0x1fd   : > { %v2806_v37 = vmul.f32 %v2377_v52, %v1654_v14  ;;  %4758 = vmatprep.subr.bf16.mxu0 %v2940_v55  ;;  %v7404_v6 = vadd.f32 %v4545_v39, %v4544_v7  ;;  %v1685_v52 = vld [vmem:[%s7791_s1 + $0x518] sm:$0xff] }
 0x1fe   : > { %v4547_v25 = vpop.f32.mrf.mxu0 }
 0x1ff   : > { %v2932_v10 = vpack.c.bf16 %v2807_v15, %v2806_v37  ;;  %v2622_v21 = vpop.permute.xlu1 %2621  ;;  %v1684_v37 = vld [vmem:[%s7791_s1 + $0x510] sm:$0xff] }
 0x200   : > { %v2855_v3 = vmul.f32 %v2622_v21, %v1703_v44  ;;  %v2617_v36 = vpop.permute.xlu0 %2616  ;;  %v4548_v13 = vpop.f32.mrf.mxu0 }
 0x201   : > { %v2854_v26 = vmul.f32 %v2617_v36, %v1702_v42  ;;  %4759 = vmatpush3.bf16.msra.mxu0 %v2932_v10  ;;  %v7412_v57 = vadd.f32 %v4548_v13, %v4547_v25  ;;  %v1667_v13 = vld [vmem:[%s7791_s1 + $0x488] sm:$0xff] }
 0x202   : > { %v4550_v63 = vpop.f32.mrf.mxu0 }
 0x203   : > { %v2956_v5 = vpack.c.bf16 %v2855_v3, %v2854_v26  ;;  %v2542_v20 = vpop.permute.xlu1 %2541 }
 0x204   : > { %v2839_v33 = vmul.f32 %v2542_v20, %v1687_v49  ;;  %v2537_v50 = vpop.permute.xlu0 %2536  ;;  %v4551_v12 = vpop.f32.mrf.mxu0  ;;  %v1666_v49 = vld [vmem:[%s7791_s1 + $0x480] sm:$0xff] }
 0x205   : > { %v2838_v56 = vmul.f32 %v2537_v50, %v1686_v23  ;;  %4822 = vmatprep.subr.bf16.mxu1 %v2956_v5  ;;  %v7420_v29 = vadd.f32 %v4551_v12, %v4550_v63 }
 0x207   : > { %v2948_v41 = vpack.c.bf16 %v2839_v33, %v2838_v56  ;;  %v2452_v8 = vpop.permute.xlu1 %2451  ;;  %v1651_v56 = vld [vmem:[%s7791_s1 + $0x408] sm:$0xff] }
 0x208   : > { %v2821_v51 = vmul.f32 %v2452_v8, %v1669_v31  ;;  %v2447_v62 = vpop.permute.xlu0 %2446  ;;  %v1650_v31 = vld [vmem:[%s7791_s1 + $0x400] sm:$0xff] }
 0x209   : > { %v2820_v35 = vmul.f32 %v2447_v62, %v1668_v59  ;;  %4823 = vmatpush3.bf16.msra.mxu1 %v2948_v41  ;;  %v4572_v11 = vpop.f32.mrf.mxu1 }
 0x20b   : > { %v2939_v4 = vpack.c.bf16 %v2821_v51, %v2820_v35  ;;  %v2372_v54 = vpop.permute.xlu1 %2371  ;;  %v4573_v24 = vpop.f32.mrf.mxu1 }
 0x20c   : > { %v2805_v19 = vmul.f32 %v2372_v54, %v1653_v27  ;;  %v2367_v9 = vpop.permute.xlu0 %2366  ;;  %v4574_v38 = vadd.f32 %v4573_v24, %v4572_v11  ;;  %v1699_v11 = vld [vmem:[%s7791_s1 + $0x588] sm:$0xff] }
 0x20d   : > { %v2804_v30 = vmul.f32 %v2367_v9, %v1652_v1  ;;  %4760 = vmatprep.subr.bf16.mxu0 %v2939_v4  ;;  %v4575_v28 = vpop.f32.mrf.mxu1 }
 0x20e   : > { %v7438_v46 = vadd.f32 %v4574_v38, %v7297_v17 }
 0x20f   : > { %v2931_v61 = vpack.c.bf16 %v2805_v19, %v2804_v30  ;;  %v2612_v43 = vpop.permute.xlu1 %2611  ;;  %v4576_v14 = vpop.f32.mrf.mxu1  ;;  %v4984_v30 = vld [vmem:[%s6229_s16 + $0x20] ss:$48 sps:$4 sm:$0xff]  }
 0x210   : > { %v2853_v7 = vmul.f32 %v2612_v43, %v1701_v2  ;;  %v2607_v55 = vpop.permute.xlu0 %2606  ;;  %v4577_v40 = vadd.f32 %v4576_v14, %v4575_v28  ;;  %v1682_v14 = vld [vmem:[%s7791_s1 + $0x500] sm:$0xff] }
 0x211   : > { %v2852_v15 = vmul.f32 %v2607_v55, %v1700_v0  ;;  %4761 = vmatpush3.bf16.msra.mxu0 %v2931_v61  ;;  %v4578_v39 = vpop.f32.mrf.mxu1  ;;  %v1683_v0 = vld [vmem:[%s7791_s1 + $0x508] sm:$0xff]  ;;  %v4987_v61 = vld [vmem:[%s6229_s16 + $0x84] ss:$48 sps:$4 sm:$0xff]  }
 0x212   : > { %v7447_v17 = vadd.f32 %v4577_v40, %v7308_v34 }
 0x213   : > { %v2955_v44 = vpack.c.bf16 %v2853_v7, %v2852_v15  ;;  %v2532_v42 = vpop.permute.xlu1 %2531  ;;  %v4579_v25 = vpop.f32.mrf.mxu1 }
 0x214   : > { %v2837_v10 = vmul.f32 %v2532_v42, %v1685_v52  ;;  %v2527_v21 = vpop.permute.xlu0 %2526  ;;  %v4580_v3 = vadd.f32 %v4579_v25, %v4578_v39 }
 0x215   : > { %v2836_v36 = vmul.f32 %v2527_v21, %v1684_v37  ;;  %4824 = vmatprep.subr.bf16.mxu1 %v2955_v44  ;;  %v4581_v26 = vpop.f32.mrf.mxu1  ;;  %v4989_v21 = vld [vmem:[%s6229_s16 + $0x28] ss:$48 sps:$4 sm:$0xff]  }
 0x216   : > { %v7456_v34 = vadd.f32 %v4580_v3, %v7317_v60  ;;  %v4992_v3 = vld [vmem:[%s6229_s16 + $0x80] ss:$48 sps:$4 sm:$0xff]  }
 0x217   : > { %v2947_v23 = vpack.c.bf16 %v2837_v10, %v2836_v36  ;;  %v2442_v63 = vpop.permute.xlu1 %2441  ;;  %v4582_v5 = vpop.f32.mrf.mxu1  ;;  %v4993_v36 = vld [vmem:[%s6229_s16 + $0xe4] ss:$48 sps:$4 sm:$0xff]  }
 0x218   : > { %v2819_v20 = vmul.f32 %v2442_v63, %v1667_v13  ;;  %v2437_v33 = vpop.permute.xlu0 %2436  ;;  %v4583_v50 = vadd.f32 %v4582_v5, %v4581_v26  ;;  %v4995_v13 = vld [vmem:[%s6229_s16 + $0x8c] ss:$48 sps:$4 sm:$0xff]  }
 0x219   : > { %v2818_v12 = vmul.f32 %v2437_v33, %v1666_v49  ;;  %4825 = vmatpush3.bf16.msra.mxu1 %v2947_v23  ;;  %v4997_v33 = vld [vmem:[%s6229_s16 + $0xe0] ss:$48 sps:$4 sm:$0xff]  }
 0x21a   : > { %v7465_v59 = vadd.f32 %v4583_v50, %v7326_v45  ;;  %v4584_v60 = vpop.f32.mrf.mxu1  ;;  %v1698_v45 = vld [vmem:[%s7791_s1 + $0x580] sm:$0xff]  ;;  %v4998_v50 = vld [vmem:[%s6229_s16 + $0x88] ss:$48 sps:$4 sm:$0xff]  }
 0x21b   : > { %v2938_v41 = vpack.c.bf16 %v2819_v20, %v2818_v12  ;;  %v2362_v8 = vpop.permute.xlu1 %2361 }
 0x21c   : > { %v2803_v51 = vmul.f32 %v2362_v8, %v1651_v56  ;;  %v2357_v62 = vpop.permute.xlu0 %2356  ;;  %v4585_v35 = vpop.f32.mrf.mxu1  ;;  %v4999_v56 = vld [vmem:[%s6229_s16 + $0x144] ss:$48 sps:$4 sm:$0xff]  }
 0x21d   : > { %v2802_v27 = vmul.f32 %v2357_v62, %v1650_v31  ;;  %4762 = vmatprep.subr.bf16.mxu0 %v2938_v41  ;;  %v4586_v1 = vadd.f32 %v4585_v35, %v4584_v60  ;;  %v5001_v31 = vld [vmem:[%s6229_s16 + $0xec] ss:$48 sps:$4 sm:$0xff]   ;;  %v5003_v35 = vld [vmem:[%s6229_s16 + $0x140] ss:$48 sps:$4 sm:$0xff]  }
 0x21e   : > { %v4587_v4 = vpop.f32.mrf.mxu1 }
 0x21f   : > { %v2930_v54 = vpack.c.bf16 %v2803_v51, %v2802_v27  ;;  %v2602_v24 = vpop.permute.xlu1 %2601  ;;  %v7474_v19 = vadd.f32 %v4586_v1, %v7335_v47  ;;  %v5004_v27 = vld [vmem:[%s6229_s16 + $0xe8] ss:$48 sps:$4 sm:$0xff]   ;;  %v5005_v1 = vld [vmem:[%s6229_s16 + $0x1a4] ss:$48 sps:$4 sm:$0xff]  }
 0x220   : > { %v2851_v9 = vmul.f32 %v2602_v24, %v1699_v11  ;;  %v2597_v38 = vpop.permute.xlu0 %2596  ;;  %v4588_v2 = vpop.f32.mrf.mxu1 }
 0x221   : > { %v2850_v28 = vmul.f32 %v2597_v38, %v1698_v45  ;;  %4763 = vmatpush3.bf16.msra.mxu0 %v2930_v54  ;;  %v4589_v43 = vadd.f32 %v4588_v2, %v4587_v4  ;;  %v5007_v45 = vld [vmem:[%s6229_s16 + $0x14c] ss:$48 sps:$4 sm:$0xff]   ;;  %v5010_v2 = vld [vmem:[%s6229_s16 + $0x148] ss:$48 sps:$4 sm:$0xff]  }
 0x222   : > { %v4590_v7 = vpop.f32.mrf.mxu1 }
 0x223   : > { %v2954_v47 = vpack.c.bf16 %v2851_v9, %v2850_v28  ;;  %v2522_v55 = vpop.permute.xlu1 %2521  ;;  %v7485_v40 = vadd.f32 %v4589_v43, %v7344_v32 }
 0x224   : > { %v2835_v15 = vmul.f32 %v2522_v55, %v1683_v0  ;;  %v2517_v52 = vpop.permute.xlu0 %2516  ;;  %3959 = vmatmul.mubr.bf16.vlgmr.msra.gmra.mxu0 %v4984_v30  ;;  %v4591_v39 = vpop.f32.mrf.mxu1  ;;  %v5009_v30 = vld [vmem:[%s6229_s16 + $0x1a0] ss:$48 sps:$4 sm:$0xff]   ;;  %v5011_v0 = vld [vmem:[%s6229_s16 + $0x204] ss:$48 sps:$4 sm:$0xff]  }
 0x225   : > { %v2834_v37 = vmul.f32 %v2517_v52, %v1682_v14  ;;  %4826 = vmatprep.subr.bf16.mxu1 %v2954_v47  ;;  %3966 = vmatprep.mubr.bf16.mxu0 %v4987_v61  ;;  %v4592_v44 = vadd.f32 %v4591_v39, %v4590_v7  ;;  %v5013_v61 = vld [vmem:[%s6229_s16 + $0x1ac] ss:$48 sps:$4 sm:$0xff]   ;;  %v4553_v14 = vpop.f32.mrf.mxu0 }
 0x226   : > { %v4593_v42 = vpop.f32.mrf.mxu1 }
 0x227   : > { %v2946_v25 = vpack.c.bf16 %v2835_v15, %v2834_v37  ;;  %v7488_v10 = vadd.f32 %v4592_v44, %v7353_v48  ;;  %v4554_v55 = vpop.f32.mrf.mxu0  ;;  %v5015_v37 = vld [vmem:[%s6229_s16 + $0x200] ss:$48 sps:$4 sm:$0xff]   ;;  %v5016_v44 = vld [vmem:[%s6229_s16 + $0x1a8] ss:$48 sps:$4 sm:$0xff]  }
 0x228   : > { %v4594_v32 = vpop.f32.mrf.mxu1  ;;  %v4555_v39 = vadd.f32 %v4554_v55, %v4553_v14 }
 0x229   : > { %4827 = vmatpush3.bf16.msra.mxu1 %v2946_v25  ;;  %v4595_v26 = vadd.f32 %v4594_v32, %v4593_v42  ;;  %v5017_v42 = vld [vmem:[%s6229_s16 + $0x264] ss:$48 sps:$4 sm:$0xff]   ;;  %v5019_v25 = vld [vmem:[%s6229_s16 + $0x20c] ss:$48 sps:$4 sm:$0xff]   ;;  %v5022_v32 = vld [vmem:[%s6229_s16 + $0x208] ss:$48 sps:$4 sm:$0xff]  }
 0x22a   : > { %v4596_v49 = vpop.f32.mrf.mxu1 }
 0x22b   : > { %v7495_v23 = vadd.f32 %v4595_v26, %v7361_v16  ;;  %v5027_v26 = vld [vmem:[%s6229_s16 + $0x2c0] ss:$48 sps:$4 sm:$0xff]  }
 0x22c   : > { %3967 = vmatmul.mubr.bf16.gmra.mxu0 %v4992_v3  ;;  %4056 = vmatmul.mubr.bf16.vlgmr.msra.gmra.mxu1 %v4989_v21  ;;  %v4597_v63 = vpop.f32.mrf.mxu1 }
 0x22d   : > { %3974 = vmatprep.mubr.bf16.mxu0 %v4993_v36  ;;  %4063 = vmatprep.mubr.bf16.mxu1 %v4995_v13  ;;  %v4598_v48 = vadd.f32 %v4597_v63, %v4596_v49  ;;  %v5023_v36 = vld [vmem:[%s6229_s16 + $0x2c4] ss:$48 sps:$4 sm:$0xff]   ;;  %v5025_v13 = vld [vmem:[%s6229_s16 + $0x26c] ss:$48 sps:$4 sm:$0xff]   ;;  %v5028_v49 = vld [vmem:[%s6229_s16 + $0x268] ss:$48 sps:$4 sm:$0xff]  }
 0x22e   : > { %v4599_v5 = vpop.f32.mrf.mxu1  ;;  %v5029_v63 = vld [vmem:[%s6229_s16 + $0x2cc] ss:$48 sps:$4 sm:$0xff]  }
 0x22f   : > { %v7498_v20 = vadd.f32 %v4598_v48, %v7372_v18  ;;  %v5031_v48 = vld [vmem:[%s6229_s16 + $0x2c8] ss:$48 sps:$4 sm:$0xff]  }
 0x230   : > { %v4600_v12 = vpop.f32.mrf.mxu1 }
 0x231   : > { %v4601_v16 = vadd.f32 %v4600_v12, %v4599_v5 }
 0x232   : > { %v4602_v60 = vpop.f32.mrf.mxu1 }
 0x233   : > { %v7505_v41 = vadd.f32 %v4601_v16, %v7380_v53 }
 0x234   : > { %3975 = vmatmul.mubr.bf16.gmra.mxu0 %v4997_v33  ;;  %4064 = vmatmul.mubr.bf16.gmra.mxu1 %v4998_v50  ;;  %v4603_v8 = vpop.f32.mrf.mxu1 }
 0x235   : > { %7794 = vst [vmem:[#allocation2_spill] sm:$0xff] %v7505_v41  ;;  %3982 = vmatprep.mubr.bf16.mxu0 %v4999_v56  ;;  %4071 = vmatprep.mubr.bf16.mxu1 %v5001_v31  ;;  %v4604_v18 = vadd.f32 %v4603_v8, %v4602_v60 }
 0x236   : > { %v4605_v51 = vpop.f32.mrf.mxu1 }
 0x237   : > { %v7508_v62 = vadd.f32 %v4604_v18, %v7388_v58 }
 0x238   : > { %v4606_v11 = vpop.f32.mrf.mxu1 }
 0x239   : > { %7795 = vst [vmem:[#allocation3_spill] sm:$0xff] %v7508_v62  ;;  %v4607_v53 = vadd.f32 %v4606_v11, %v4605_v51 }
 0x23a   : > { %v4608_v4 = vpop.f32.mrf.mxu1 }
 0x23b   : > { %v7515_v54 = vadd.f32 %v4607_v53, %v7396_v22 }
 0x23c   : > { %3983 = vmatmul.mubr.bf16.gmra.mxu0 %v5003_v35  ;;  %4072 = vmatmul.mubr.bf16.gmra.mxu1 %v5004_v27  ;;  %v4609_v24 = vpop.f32.mrf.mxu1 }
 0x23d   : > { %7796 = vst [vmem:[#allocation4_spill] sm:$0xff] %v7515_v54  ;;  %3990 = vmatprep.mubr.bf16.mxu0 %v5005_v1  ;;  %4079 = vmatprep.mubr.bf16.mxu1 %v5007_v45  ;;  %v4610_v58 = vadd.f32 %v4609_v24, %v4608_v4 }
 0x23e   : > { %v4611_v9 = vpop.f32.mrf.mxu1 }
 0x23f   : > { %v7518_v38 = vadd.f32 %v4610_v58, %v7404_v6 }
 0x240   : > { %v4612_v28 = vpop.f32.mrf.mxu1 }
 0x241   : > { %7797 = vst [vmem:[#allocation5_spill] sm:$0xff] %v7518_v38  ;;  %v4613_v43 = vadd.f32 %v4612_v28, %v4611_v9 }
 0x242   : > { %v4614_v22 = vpop.f32.mrf.mxu1 }
 0x243   : > { %v7525_v7 = vadd.f32 %v4613_v43, %v7412_v57 }
 0x244   : > { %3991 = vmatmul.mubr.bf16.gmra.mxu0 %v5009_v30  ;;  %4080 = vmatmul.mubr.bf16.gmra.mxu1 %v5010_v2  ;;  %v4615_v47 = vpop.f32.mrf.mxu1 }
 0x245   : > { %7798 = vst [vmem:[#allocation6_spill] sm:$0xff] %v7525_v7  ;;  %3998 = vmatprep.mubr.bf16.mxu0 %v5011_v0  ;;  %4087 = vmatprep.mubr.bf16.mxu1 %v5013_v61  ;;  %v4616_v6 = vadd.f32 %v4615_v47, %v4614_v22 }
 0x246   : > { %v4617_v15 = vpop.f32.mrf.mxu1 }
 0x247   : > { %v7528_v52 = vadd.f32 %v4616_v6, %v7420_v29  ;;  %v5021_v29 = vld [vmem:[%s6229_s16 + $0x260] ss:$48 sps:$4 sm:$0xff]   ;;  %s4201_s16 = sshll.u32 %s7855_s24, 3 }
 0x248   : > { %v4618_v57 = vpop.f32.mrf.mxu1  ;;  %s7685_s8 = scalar_lea.vmem %s7793_s3, %s4201_s16 }
 0x249   : > { %7799 = vst [vmem:[#allocation7_spill] sm:$0xff] %v7528_v52  ;;  %v4619_v21 = vadd.f32 %v4618_v57, %v4617_v15 }
 0x24b   : > { %v7534_v3 = vadd.f32 %v4619_v21, %v4555_v39 }
 0x24c   : > { %3999 = vmatmul.mubr.bf16.gmra.mxu0 %v5015_v37  ;;  %4088 = vmatmul.mubr.bf16.gmra.mxu1 %v5016_v44 }
 0x24d   : > { %7800 = vst [vmem:[#allocation8_spill] sm:$0xff] %v7534_v3  ;;  %4006 = vmatprep.mubr.bf16.mxu0 %v5017_v42  ;;  %4095 = vmatprep.mubr.bf16.mxu1 %v5019_v25 }
 0x254   : > { %4007 = vmatmul.mubr.bf16.gmra.mxu0 %v5021_v29  ;;  %4096 = vmatmul.mubr.bf16.gmra.mxu1 %v5022_v32 }
 0x255   : > { %4014 = vmatprep.mubr.bf16.mxu0 %v5023_v36  ;;  %4103 = vmatprep.mubr.bf16.mxu1 %v5025_v13 }
 0x25a   : > { %v7544_v5 = vpop.f32.mrf.mxu0 }
 0x25c   : > { %4015 = vmatmul.mubr.bf16.gmra.mxu0 %v5027_v26  ;;  %4104 = vmatmul.mubr.bf16.gmra.mxu1 %v5028_v49  ;;  %v4637_v33 = vpop.f32.mrf.mxu0 }
 0x25d   : > { %4111 = vmatprep.mubr.bf16.mxu1 %v5029_v63 }
 0x25e   : > { %v7548_v12 = vpop.f32.mrf.mxu0 }
 0x260   : > { %v7552_v31 = vpop.f32.mrf.mxu0 }
 0x262   : > { %v7556_v60 = vpop.f32.mrf.mxu0 }
 0x264   : > { %4112 = vmatmul.mubr.bf16.gmra.mxu1 %v5031_v48  ;;  %v7560_v18 = vpop.f32.mrf.mxu0 }
 0x266   : > { %v7564_v35 = vpop.f32.mrf.mxu0 }
 0x268   : > { %v7568_v11 = vpop.f32.mrf.mxu0 }
 0x26a   : > { %v7572_v45 = vpop.f32.mrf.mxu0 }
 0x26c   : > { %v7546_v50 = vpop.f32.mrf.mxu1  ;;  %v7576_v4 = vpop.f32.mrf.mxu0 }
 0x26e   : > { %v7550_v56 = vpop.f32.mrf.mxu1  ;;  %v7580_v58 = vpop.f32.mrf.mxu0 }
 0x270   : > { %v7554_v16 = vpop.f32.mrf.mxu1  ;;  %v7584_v30 = vpop.f32.mrf.mxu0 }
 0x272   : > { %v7558_v8 = vpop.f32.mrf.mxu1  ;;  %v7588_v28 = vpop.f32.mrf.mxu0 }
 0x274   : > { %v7562_v51 = vpop.f32.mrf.mxu1  ;;  %v7592_v61 = vpop.f32.mrf.mxu0 }
 0x276   : > { %v7566_v27 = vpop.f32.mrf.mxu1  ;;  %v7596_v22 = vpop.f32.mrf.mxu0 }
 0x278   : > { %v7570_v1 = vpop.f32.mrf.mxu1  ;;  %v7600_v47 = vpop.f32.mrf.mxu0 }
 0x27a   : > { %v7574_v53 = vpop.f32.mrf.mxu1  ;;  %v7604_v55 = vpop.f32.mrf.mxu0 }
 0x27c   : > { %v7578_v24 = vpop.f32.mrf.mxu1  ;;  %v7608_v39 = vpop.f32.mrf.mxu0 }
 0x27e   : > { %v7582_v9 = vpop.f32.mrf.mxu1  ;;  %v7612_v44 = vpop.f32.mrf.mxu0 }
 0x280   : > { %v7586_v2 = vpop.f32.mrf.mxu1  ;;  %v7616_v42 = vpop.f32.mrf.mxu0 }
 0x282   : > { %v7590_v0 = vpop.f32.mrf.mxu1  ;;  %v7620_v21 = vpop.f32.mrf.mxu0 }
 0x284   : > { %v7594_v43 = vpop.f32.mrf.mxu1  ;;  %v7624_v32 = vpop.f32.mrf.mxu0 }
 0x285   : > { %7801 = vst [vmem:[#allocation9_spill] sm:$0xff] %v7624_v32 }
 0x286   : > { %v7598_v14 = vpop.f32.mrf.mxu1  ;;  %v7628_v13 = vpop.f32.mrf.mxu0 }
 0x287   : > { %7803 = vst [vmem:[#allocation11_spill] sm:$0xff] %v7628_v13 }
 0x288   : > { %v7602_v6 = vpop.f32.mrf.mxu1  ;;  %v7632_v49 = vpop.f32.mrf.mxu0 }
 0x289   : > { %7805 = vst [vmem:[#allocation13_spill] sm:$0xff] %v7632_v49 }
 0x28a   : > { %v7606_v15 = vpop.f32.mrf.mxu1  ;;  %v7636_v48 = vpop.f32.mrf.mxu0 }
 0x28b   : > { %7807 = vst [vmem:[#allocation15_spill] sm:$0xff] %v7636_v48 }
 0x28c   : > { %v7610_v37 = vpop.f32.mrf.mxu1  ;;  %v7640_v52 = vpop.f32.mrf.mxu0 }
 0x28d   : > { %7809 = vst [vmem:[#allocation17_spill] sm:$0xff] %v7640_v52 }
 0x28e   : > { %v7614_v57 = vpop.f32.mrf.mxu1  ;;  %v7644_v38 = vpop.f32.mrf.mxu0 }
 0x28f   : > { %7811 = vst [vmem:[#allocation19_spill] sm:$0xff] %v7644_v38 }
 0x290   : > { %v7618_v25 = vpop.f32.mrf.mxu1 }
 0x292   : > { %v7622_v29 = vpop.f32.mrf.mxu1 }
 0x294   : > { %v7626_v36 = vpop.f32.mrf.mxu1 }
 0x295   : > { %7802 = vst [vmem:[#allocation10_spill] sm:$0xff] %v7626_v36  ;;  %v7648_v36 = vpop.f32.mrf.mxu0 }
 0x296   : > { %v7630_v26 = vpop.f32.mrf.mxu1  ;;  %7813 = vst [vmem:[#allocation21_spill] sm:$0xff] %v7648_v36  ;;  %v4638_v36 = vadd.f32 %v4637_v33, %v7544_v5  ;;  %v4705_v5 = vadd.f32 %v7558_v8, %v7554_v16  ;;  %v4644_v33 = vadd.f32 %v7560_v18, %v7556_v60  ;;  %v4708_v60 = vadd.f32 %v7566_v27, %v7562_v51 }
 0x297   : > { %7804 = vst [vmem:[#allocation12_spill] sm:$0xff] %v7630_v26  ;;  %v7652_v26 = vpop.f32.mrf.mxu0 }
 0x298   : > { %v7634_v63 = vpop.f32.mrf.mxu1  ;;  %7815 = vst [vmem:[#allocation23_spill] sm:$0xff] %v7652_v26  ;;  %v3775_v16 = vadd.f32 %v4644_v33, %v7456_v34  ;;  %v4711_v34 = vadd.f32 %v7574_v53, %v7570_v1  ;;  %v4714_v1 = vadd.f32 %v7582_v9, %v7578_v24  ;;  %v4656_v24 = vadd.f32 %v7592_v61, %v7588_v28 }
 0x299   : > { %7806 = vst [vmem:[#allocation14_spill] sm:$0xff] %v7634_v63  ;;  %v7656_v63 = vpop.f32.mrf.mxu0 }
 0x29a   : > { %v7638_v3 = vpop.f32.mrf.mxu1  ;;  %7817 = vst [vmem:[#allocation25_spill] sm:$0xff] %v7656_v63  ;;  %v4702_v63 = vadd.f32 %v7550_v56, %v7546_v50 }
 0x29b   : > { %7808 = vst [vmem:[#allocation16_spill] sm:$0xff] %v7638_v3  ;;  %v7660_v3 = vpop.f32.mrf.mxu0 }
 0x29c   : > { %v7642_v7 = vpop.f32.mrf.mxu1  ;;  %7819 = vst [vmem:[#allocation27_spill] sm:$0xff] %v7660_v3 }
 0x29d   : > { %7810 = vst [vmem:[#allocation18_spill] sm:$0xff] %v7642_v7  ;;  %v7664_v7 = vpop.f32.mrf.mxu0 }
 0x29e   : > { %v7646_v54 = vpop.f32.mrf.mxu1  ;;  %7821 = vst [vmem:[#allocation29_spill] sm:$0xff] %v7664_v7 }
 0x29f   : > { %7812 = vst [vmem:[#allocation20_spill] sm:$0xff] %v7646_v54 }
 0x2a0   : > { %v7650_v13 = vpop.f32.mrf.mxu1 }
 0x2a1   : > { %7814 = vst [vmem:[#allocation22_spill] sm:$0xff] %v7650_v13 }
 0x2a2   : > { %v7654_v49 = vpop.f32.mrf.mxu1 }
 0x2a3   : > { %7816 = vst [vmem:[#allocation24_spill] sm:$0xff] %v7654_v49  ;;  %v3767_v49 = vadd.f32 %v4638_v36, %v7438_v46 }
 0x2a4   : > { %v7658_v48 = vpop.f32.mrf.mxu1 }
 0x2a5   : > { %7818 = vst [vmem:[#allocation26_spill] sm:$0xff] %v7658_v48  ;;  %v3864_v32 = vadd.f32 %v4702_v63, %v3767_v49 }
 0x2a6   : > { %v7662_v52 = vpop.f32.mrf.mxu1 }
 0x2a7   : > { %7820 = vst [vmem:[#allocation28_spill] sm:$0xff] %v7662_v52  ;;  %v4641_v52 = vadd.f32 %v7552_v31, %v7548_v12 }
 0x2a8   : > { %v7667_v54 = vpop.f32.mrf.mxu1 }
 0x2a9   : > { %7822 = vst [vmem:[#allocation30_spill] sm:$0xff] %v7667_v54  ;;  %v3770_v50 = vadd.f32 %v4641_v52, %v7447_v17 }
 0x2aa   : > { %v7672_v48 = vpop.f32.mrf.mxu1 }
 0x2ab   : > { %7823 = vst [vmem:[#allocation31_spill] sm:$0xff] %v7672_v48  ;;  %v3867_v31 = vadd.f32 %v4705_v5, %v3770_v50 }
 0x2e4   : > { %v4764_v38 = vpop.f32.mrf.mxu0 }
 0x2e6   : > { %v4765_v13 = vpop.f32.mrf.mxu0 }
 0x2e7   : > { %v4766_v7 = vadd.f32 %v4765_v13, %v4764_v38 }
 0x2e8   : > { %v4767_v26 = vpop.f32.mrf.mxu0 }
 0x2e9   : > { %v3961_v56 = vadd.f32 %v4766_v7, %v3864_v32 }
 0x2ea   : > { %v4768_v3 = vpop.f32.mrf.mxu0 }
 0x2eb   : > { %v4769_v48 = vadd.f32 %v4768_v3, %v4767_v26  ;;  %v3872_v26 = vadd.f32 %v4708_v60, %v3775_v16 }
 0x2ec   : > { %v4770_v62 = vpop.f32.mrf.mxu0  ;;  %v4828_v41 = vpop.f32.mrf.mxu1 }
 0x2ed   : > { %v3964_v52 = vadd.f32 %v4769_v48, %v3867_v31 }
 0x2ee   : > { %v4771_v46 = vpop.f32.mrf.mxu0  ;;  %v4829_v36 = vpop.f32.mrf.mxu1 }
 0x2ef   : > { %v4830_v54 = vadd.f32 %v4829_v36, %v4828_v41  ;;  %v4647_v41 = vadd.f32 %v7568_v11, %v7564_v35  ;;  %v4772_v3 = vadd.f32 %v4771_v46, %v4770_v62 }
 0x2f0   : > { %v4773_v38 = vpop.f32.mrf.mxu0  ;;  %v4831_v12 = vpop.f32.mrf.mxu1 }
 0x2f1   : > { %v4058_v8 = vadd.f32 %v4830_v54, %v3961_v56  ;;  %v4650_v54 = vadd.f32 %v7576_v4, %v7572_v45  ;;  %v3778_v35 = vadd.f32 %v4647_v41, %v7465_v59  ;;  %v3969_v11 = vadd.f32 %v4772_v3, %v3872_v26 }
 0x2f2   : > { %v4774_v17 = vpop.f32.mrf.mxu0  ;;  %v4832_v7 = vpop.f32.mrf.mxu1  ;;  %v4653_v59 = vadd.f32 %v7584_v30, %v7580_v58  ;;  %v3791_v3 = vadd.f32 %v4656_v24, %v7488_v10  ;;  %v4723_v10 = vadd.f32 %v7606_v15, %v7602_v6  ;;  %v4726_v6 = vadd.f32 %v7614_v57, %v7610_v37  ;;  %v7824_v37 = vld [vmem:[#allocation9_spill] sm:$0xff]  ;;  %v7826_v24 = vld [vmem:[#allocation3_spill] sm:$0xff] }
 0x2f3   : > { %4121 = vst.msk [vmem:[%s7685_s8] sm:$0xff] %vm4120_vm0, %v4058_v8  ;;  %v4833_v18 = vadd.f32 %v4832_v7, %v4831_v12  ;;  %v4775_v62 = vadd.f32 %v4774_v17, %v4773_v38  ;;  %v3875_v33 = vadd.f32 %v4711_v34, %v3778_v35  ;;  %v3783_v46 = vadd.f32 %v4650_v54, %v7474_v19 }
 0x2f4   : > { %v4776_v32 = vpop.f32.mrf.mxu0  ;;  %v4834_v13 = vpop.f32.mrf.mxu1  ;;  %v4717_v19 = vadd.f32 %v7590_v0, %v7586_v2  ;;  %v3786_v58 = vadd.f32 %v4653_v59, %v7485_v40  ;;  %v4720_v2 = vadd.f32 %v7598_v14, %v7594_v43  ;;  %v4659_v40 = vadd.f32 %v7600_v47, %v7596_v22 }
 0x2f5   : > { %v4061_v51 = vadd.f32 %v4833_v18, %v3964_v52  ;;  %v3972_v36 = vadd.f32 %v4775_v62, %v3875_v33  ;;  %v3880_v31 = vadd.f32 %v4714_v1, %v3783_v46  ;;  %v4662_v43 = vadd.f32 %v7608_v39, %v7604_v55 }
 0x2f6   : > { %v4777_v27 = vpop.f32.mrf.mxu0  ;;  %v4835_v49 = vpop.f32.mrf.mxu1  ;;  %v3883_v52 = vadd.f32 %v4717_v19, %v3786_v58  ;;  %v3888_v54 = vadd.f32 %v4720_v2, %v3791_v3  ;;  %v3794_v22 = vadd.f32 %v4659_v40, %v7495_v23  ;;  %v4665_v23 = vadd.f32 %v7616_v42, %v7612_v44 }
 0x2f7   : > { %4122 = vst.msk [vmem:[%s7685_s8 + $0x8] sm:$0xff] %vm4120_vm0, %v4061_v51  ;;  %v4836_v63 = vadd.f32 %v4835_v49, %v4834_v13  ;;  %v4778_v50 = vadd.f32 %v4777_v27, %v4776_v32  ;;  %v4668_v57 = vadd.f32 %v7824_v37, %v7620_v21  ;;  %v7841_v37 = vld [vmem:[#allocation22_spill] sm:$0xff] }
 0x2f8   : > { %v4779_v48 = vpop.f32.mrf.mxu0  ;;  %v4837_v5 = vpop.f32.mrf.mxu1 }
 0x2f9   : > { %v4066_v45 = vadd.f32 %v4836_v63, %v3969_v11  ;;  %v3977_v30 = vadd.f32 %v4778_v50, %v3880_v31  ;;  %v3891_v63 = vadd.f32 %v4723_v10, %v3794_v22  ;;  %v7825_v50 = vld [vmem:[#allocation2_spill] sm:$0xff]  ;;  %v7835_v10 = vld [vmem:[#allocation4_spill] sm:$0xff] }
 0x2fa   : > { %v4780_v53 = vpop.f32.mrf.mxu0  ;;  %v4838_v4 = vpop.f32.mrf.mxu1  ;;  %v3802_v44 = vadd.f32 %v4665_v23, %v7825_v50  ;;  %v7840_v23 = vld [vmem:[#allocation21_spill] sm:$0xff] }
 0x2fb   : > { %4123 = vst.msk [vmem:[%s7685_s8 + $0x10] sm:$0xff] %vm4120_vm0, %v4066_v45  ;;  %v4839_v56 = vadd.f32 %v4838_v4, %v4837_v5  ;;  %v4781_v8 = vadd.f32 %v4780_v53, %v4779_v48  ;;  %v3799_v48 = vadd.f32 %v4662_v43, %v7498_v20  ;;  %v4729_v20 = vadd.f32 %v7622_v29, %v7618_v25  ;;  %v7827_v25 = vld [vmem:[#allocation10_spill] sm:$0xff]  ;;  %v7828_v29 = vld [vmem:[#allocation12_spill] sm:$0xff] }
 0x2fc   : > { %v4782_v38 = vpop.f32.mrf.mxu0  ;;  %v4840_v12 = vpop.f32.mrf.mxu1 }
 0x2fd   : > { %v4069_v9 = vadd.f32 %v4839_v56, %v3972_v36  ;;  %v3980_v18 = vadd.f32 %v4781_v8, %v3883_v52  ;;  %v3896_v53 = vadd.f32 %v4726_v6, %v3799_v48  ;;  %v3899_v19 = vadd.f32 %v4729_v20, %v3802_v44  ;;  %v7830_v8 = vld [vmem:[#allocation13_spill] sm:$0xff] }
 0x2fe   : > { %v4783_v16 = vpop.f32.mrf.mxu0  ;;  %v4841_v60 = vpop.f32.mrf.mxu1 }
 0x2ff   : > { %4124 = vst.msk [vmem:[%s7685_s8 + $0x18] sm:$0xff] %vm4120_vm0, %v4069_v9  ;;  %v4842_v17 = vadd.f32 %v4841_v60, %v4840_v12  ;;  %v4784_v32 = vadd.f32 %v4783_v16, %v4782_v38  ;;  %v3807_v9 = vadd.f32 %v4668_v57, %v7826_v24  ;;  %v4732_v16 = vadd.f32 %v7828_v29, %v7827_v25  ;;  %v7842_v57 = vld [vmem:[#allocation24_spill] sm:$0xff] }
 0x300   : > { %v4785_v7 = vpop.f32.mrf.mxu0  ;;  %v4843_v41 = vpop.f32.mrf.mxu1 }
 0x301   : > { %v4074_v28 = vadd.f32 %v4842_v17, %v3977_v30  ;;  %v3985_v47 = vadd.f32 %v4784_v32, %v3888_v54  ;;  %v7829_v30 = vld [vmem:[#allocation11_spill] sm:$0xff]  ;;  %v7834_v32 = vld [vmem:[#allocation17_spill] sm:$0xff] }
 0x302   : > { %v4786_v0 = vpop.f32.mrf.mxu0  ;;  %v4844_v61 = vpop.f32.mrf.mxu1  ;;  %v4671_v17 = vadd.f32 %v7830_v8, %v7829_v30 }
 0x303   : > { %4125 = vst.msk [vmem:[%s7685_s8 + $0x20] sm:$0xff] %vm4120_vm0, %v4074_v28  ;;  %v4845_v13 = vadd.f32 %v4844_v61, %v4843_v41  ;;  %v4787_v49 = vadd.f32 %v4786_v0, %v4785_v7  ;;  %v3904_v28 = vadd.f32 %v4732_v16, %v3807_v9  ;;  %v7831_v0 = vld [vmem:[#allocation14_spill] sm:$0xff]  ;;  %v7832_v61 = vld [vmem:[#allocation16_spill] sm:$0xff]  ;;  %v7846_v16 = vld [vmem:[#allocation7_spill] sm:$0xff] }
 0x304   : > { %v4788_v26 = vpop.f32.mrf.mxu0  ;;  %v4846_v34 = vpop.f32.mrf.mxu1  ;;  %v4735_v40 = vadd.f32 %v7832_v61, %v7831_v0  ;;  %v3810_v43 = vadd.f32 %v4671_v17, %v7835_v10 }
 0x305   : > { %v4077_v14 = vadd.f32 %v4845_v13, %v3980_v18  ;;  %v3988_v5 = vadd.f32 %v4787_v49, %v3891_v63  ;;  %v7833_v18 = vld [vmem:[#allocation15_spill] sm:$0xff]  ;;  %v7838_v63 = vld [vmem:[#allocation20_spill] sm:$0xff] }
 0x306   : > { %v4789_v51 = vpop.f32.mrf.mxu0  ;;  %v4847_v27 = vpop.f32.mrf.mxu1  ;;  %v4674_v13 = vadd.f32 %v7834_v32, %v7833_v18  ;;  %v3907_v49 = vadd.f32 %v4735_v40, %v3810_v43  ;;  %v7851_v18 = vld [vmem:[#allocation30_spill] sm:$0xff]  ;;  %v7852_v32 = vld [vmem:[#allocation31_spill] sm:$0xff] }
 0x307   : > { %4126 = vst.msk [vmem:[%s7685_s8 + $0x28] sm:$0xff] %vm4120_vm0, %v4077_v14  ;;  %v4848_v35 = vadd.f32 %v4847_v27, %v4846_v34  ;;  %v4790_v33 = vadd.f32 %v4789_v51, %v4788_v26 }
 0x308   : > { %v4791_v11 = vpop.f32.mrf.mxu0  ;;  %v4849_v62 = vpop.f32.mrf.mxu1 }
 0x309   : > { %v4082_v55 = vadd.f32 %v4848_v35, %v3985_v47  ;;  %v3993_v42 = vadd.f32 %v4790_v33, %v3896_v53  ;;  %v7836_v35 = vld [vmem:[#allocation5_spill] sm:$0xff] }
 0x30a   : > { %v4792_v15 = vpop.f32.mrf.mxu0  ;;  %v4850_v39 = vpop.f32.mrf.mxu1 }
 0x30b   : > { %4127 = vst.msk [vmem:[%s7685_s8 + $0x30] sm:$0xff] %vm4120_vm0, %v4082_v55  ;;  %v4851_v46 = vadd.f32 %v4850_v39, %v4849_v62  ;;  %v4793_v56 = vadd.f32 %v4792_v15, %v4791_v11  ;;  %v3815_v11 = vadd.f32 %v4674_v13, %v7836_v35  ;;  %v7837_v62 = vld [vmem:[#allocation18_spill] sm:$0xff]  ;;  %v7839_v39 = vld [vmem:[#allocation19_spill] sm:$0xff]  ;;  %v4747_v13 = vadd.f32 %v7852_v32, %v7851_v18 }
 0x30c   : > { %v4794_v1 = vpop.f32.mrf.mxu0  ;;  %v4852_v45 = vpop.f32.mrf.mxu1  ;;  %v4738_v48 = vadd.f32 %v7838_v63, %v7837_v62 }
 0x30d   : > { %v4085_v4 = vadd.f32 %v4851_v46, %v3988_v5  ;;  %v3996_v7 = vadd.f32 %v4793_v56, %v3899_v19  ;;  %v4677_v5 = vadd.f32 %v7840_v23, %v7839_v39 }
 0x30e   : > { %v4795_v59 = vpop.f32.mrf.mxu0  ;;  %v4853_v36 = vpop.f32.mrf.mxu1  ;;  %v3912_v20 = vadd.f32 %v4738_v48, %v3815_v11 }
 0x30f   : > { %4128 = vst.msk [vmem:[%s7685_s8 + $0x38] sm:$0xff] %vm4120_vm0, %v4085_v4  ;;  %v4854_v38 = vadd.f32 %v4853_v36, %v4852_v45  ;;  %v4796_v41 = vadd.f32 %v4795_v59, %v4794_v1  ;;  %v4741_v4 = vadd.f32 %v7842_v57, %v7841_v37  ;;  %v7843_v59 = vld [vmem:[#allocation23_spill] sm:$0xff]  ;;  %v7844_v36 = vld [vmem:[#allocation25_spill] sm:$0xff] }
 0x310   : > { %v4797_v12 = vpop.f32.mrf.mxu0  ;;  %v4855_v31 = vpop.f32.mrf.mxu1  ;;  %v4680_v50 = vadd.f32 %v7844_v36, %v7843_v59 }
 0x311   : > { %v4090_v21 = vadd.f32 %v4854_v38, %v3993_v42  ;;  %v4001_v14 = vadd.f32 %v4796_v41, %v3904_v28  ;;  %v7845_v38 = vld [vmem:[#allocation6_spill] sm:$0xff]  ;;  %v7850_v41 = vld [vmem:[#allocation29_spill] sm:$0xff] }
 0x312   : > { %v4798_v60 = vpop.f32.mrf.mxu0  ;;  %v4856_v58 = vpop.f32.mrf.mxu1 }
 0x313   : > { %4129 = vst.msk [vmem:[%s7685_s8 + $0x40] sm:$0xff] %vm4120_vm0, %v4090_v21  ;;  %v4857_v52 = vadd.f32 %v4856_v58, %v4855_v31  ;;  %v4799_v51 = vadd.f32 %v4798_v60, %v4797_v12  ;;  %v3818_v12 = vadd.f32 %v4677_v5, %v7845_v38  ;;  %v3823_v21 = vadd.f32 %v4680_v50, %v7846_v16  ;;  %v7847_v60 = vld [vmem:[#allocation26_spill] sm:$0xff]  ;;  %v7848_v58 = vld [vmem:[#allocation28_spill] sm:$0xff] }
 0x314   : > { %v4800_v3 = vpop.f32.mrf.mxu0  ;;  %v4858_v2 = vpop.f32.mrf.mxu1  ;;  %v4744_v30 = vadd.f32 %v7848_v58, %v7847_v60 }
 0x315   : > { %v4093_v26 = vadd.f32 %v4857_v52, %v3996_v7  ;;  %v4004_v33 = vadd.f32 %v4799_v51, %v3907_v49  ;;  %v3915_v29 = vadd.f32 %v4741_v4, %v3818_v12  ;;  %v7849_v7 = vld [vmem:[#allocation27_spill] sm:$0xff] }
 0x316   : > { %v4801_v34 = vpop.f32.mrf.mxu0  ;;  %v4859_v54 = vpop.f32.mrf.mxu1  ;;  %v4683_v52 = vadd.f32 %v7850_v41, %v7849_v7  ;;  %v3920_v40 = vadd.f32 %v4744_v30, %v3823_v21 }
 0x317   : > { %4130 = vst.msk [vmem:[%s7685_s8 + $0x48] sm:$0xff] %vm4120_vm0, %v4093_v26  ;;  %v4860_v27 = vadd.f32 %v4859_v54, %v4858_v2  ;;  %v4802_v46 = vadd.f32 %v4801_v34, %v4800_v3  ;;  %v7853_v54 = vld [vmem:[#allocation8_spill] sm:$0xff] }
 0x318   : > { %v4803_v22 = vpop.f32.mrf.mxu0  ;;  %v4861_v47 = vpop.f32.mrf.mxu1  ;;  %v3826_v10 = vadd.f32 %v4683_v52, %v7853_v54 }
 0x319   : > { %v4098_v6 = vadd.f32 %v4860_v27, %v4001_v14  ;;  %v4009_v31 = vadd.f32 %v4802_v46, %v3912_v20 }
 0x31a   : > { %v4804_v55 = vpop.f32.mrf.mxu0  ;;  %v4862_v15 = vpop.f32.mrf.mxu1 }
 0x31b   : > { %4131 = vst.msk [vmem:[%s7685_s8 + $0x50] sm:$0xff] %vm4120_vm0, %v4098_v6  ;;  %v4863_v1 = vadd.f32 %v4862_v15, %v4861_v47  ;;  %v4805_v19 = vadd.f32 %v4804_v55, %v4803_v22  ;;  %v3923_v22 = vadd.f32 %v4747_v13, %v3826_v10 }
 0x31c   : > { %v4806_v45 = vpop.f32.mrf.mxu0  ;;  %v4864_v53 = vpop.f32.mrf.mxu1 }
 0x31d   : > { %v4101_v44 = vadd.f32 %v4863_v1, %v4004_v33  ;;  %v4012_v3 = vadd.f32 %v4805_v19, %v3915_v29 }
 0x31e   : > { %v4807_v42 = vpop.f32.mrf.mxu0  ;;  %v4865_v56 = vpop.f32.mrf.mxu1 }
 0x31f   : > { %4132 = vst.msk [vmem:[%s7685_s8 + $0x58] sm:$0xff] %vm4120_vm0, %v4101_v44  ;;  %v4866_v24 = vadd.f32 %v4865_v56, %v4864_v53  ;;  %v4808_v2 = vadd.f32 %v4807_v42, %v4806_v45 }
 0x320   : > { %v4809_v9 = vpop.f32.mrf.mxu0  ;;  %v4867_v25 = vpop.f32.mrf.mxu1 }
 0x321   : > { %v4106_v8 = vadd.f32 %v4866_v24, %v4009_v31  ;;  %v4017_v43 = vadd.f32 %v4808_v2, %v3920_v40 }
 0x322   : > { %v4868_v17 = vpop.f32.mrf.mxu1  ;;  %v4810_v0 = vpop.f32.mrf.mxu0 }
 0x323   : > { %4133 = vst.msk [vmem:[%s7685_s8 + $0x60] sm:$0xff] %vm4120_vm0, %v4106_v8  ;;  %v4869_v28 = vadd.f32 %v4868_v17, %v4867_v25  ;;  %v4811_v14 = vadd.f32 %v4810_v0, %v4809_v9 }
 0x324   : > { %v4870_v61 = vpop.f32.mrf.mxu1 }
 0x325   : > { %v4109_v26 = vadd.f32 %v4869_v28, %v4012_v3  ;;  %v4020_v35 = vadd.f32 %v4811_v14, %v3923_v22 }
 0x326   : > { %v4871_v34 = vpop.f32.mrf.mxu1 }
 0x327   : > { %4134 = vst.msk [vmem:[%s7685_s8 + $0x68] sm:$0xff] %vm4120_vm0, %v4109_v26  ;;  %v4872_v51 = vadd.f32 %v4871_v34, %v4870_v61 }
 0x328   : > { %v4873_v27 = vpop.f32.mrf.mxu1 }
 0x329   : > { %v4114_v47 = vadd.f32 %v4872_v51, %v4017_v43 }
 0x32a   : > { %v4874_v49 = vpop.f32.mrf.mxu1 }
 0x32b   : > { %4135 = vst.msk [vmem:[%s7685_s8 + $0x70] sm:$0xff] %vm4120_vm0, %v4114_v47  ;;  %v4875_v11 = vadd.f32 %v4874_v49, %v4873_v27 }
 0x32d   : > { %v4117_v62 = vadd.f32 %v4875_v11, %v4020_v35 }
 0x32f   : > { %4136 = vst.msk [vmem:[%s7685_s8 + $0x78] sm:$0xff] %vm4120_vm0, %v4117_v62 }
 0x330 PF: > { %s13_s12 = sadd.s32 1, %s5806_s12  }
 0x331   : > { %p10_p4 = scmp.ge.s32.totalorder %s13_s12, 4  }
 0x333   :  { %12 = sbr.rel (!%p10_p4) target bundleno = 1 (0x1), region = 62 }

</bundles_post_ra>
